<compile_context>
chip_gen: v7x
topology: tpu7x:2x2x1
jax: 0.10.0
libtpu: 0.0.40
codegen_flags: <defaults>
</compile_context>

<pallas_src>
import jax
import jax.numpy as jnp
from jax.experimental import pallas as pl
from jax.experimental.pallas import tpu as pltpu


def _round_up(x, m):
    return (x + m - 1) // m * m


def _double_conv_kernel(x_ref, w1_ref, s1_ref, b1_ref, w2_ref, s2_ref, b2_ref,
                        o_ref, xpad_ref, ypad_ref, p1_ref, p2_ref):
    """Fused DoubleConv (conv3x3+BN+ReLU twice) for one batch element.

    x_ref:    (1, H, W, Cin)    bf16 input tile (unpadded; halo built in-kernel)
    w1_ref:   (9*Cin, Cmid)     bf16 conv1 weights in im2col layout
    s1_ref:   (1, Cmid)         f32 folded BN1 scale
    b1_ref:   (1, Cmid)         f32 folded BN1 bias (includes conv bias)
    w2_ref:   (9*Cmid, Cout)    bf16 conv2 weights in im2col layout
    s2_ref:   (1, Cout)         f32 folded BN2 scale
    b2_ref:   (1, Cout)         f32 folded BN2 bias
    o_ref:    (1, H*W, Cout)    f32 output (Cout padded to a multiple of 128)
    xpad_ref: (H+2, W+2, Cin)   f32 scratch: zero-halo padded input
    ypad_ref: (H+2, W+2, Cmid)  f32 scratch: zero-halo padded intermediate
    p1_ref:   (H*W, 9*Cin)      bf16 scratch: im2col slab for conv1
    p2_ref:   (H*W, 9*Cmid)     bf16 scratch: im2col slab for conv2
    """
    H = x_ref.shape[1]
    W = x_ref.shape[2]

    def conv3x3_bn_relu(pad_ref, patches_ref, w_ref, scale, bias):
        C = pad_ref.shape[-1]
        # Build the (H*W, 9*C) im2col slab once per tile (bf16 MXU operand).
        for dy in range(3):
            for dx in range(3):
                t = dy * 3 + dx
                tap = pad_ref[dy:dy + H, dx:dx + W, :].reshape(H * W, C)
                patches_ref[:, t * C:(t + 1) * C] = tap.astype(patches_ref.dtype)
        # One MXU matmul per layer (K = 9*C), f32 accumulation.
        acc = jnp.dot(patches_ref[...], w_ref[...],
                      preferred_element_type=jnp.float32)
        # Folded-BN affine + ReLU epilogue kept in f32 on the VPU.
        return jnp.maximum(acc * scale + bias, 0.0)

    # ---- layer 1: padding=1 halo handled in-kernel ----
    xpad_ref[...] = jnp.zeros_like(xpad_ref)
    xpad_ref[1:H + 1, 1:W + 1, :] = x_ref[0].astype(xpad_ref.dtype)
    y1 = conv3x3_bn_relu(xpad_ref, p1_ref, w1_ref, s1_ref[...], b1_ref[...])

    # ---- layer 2: intermediate activation never leaves VMEM ----
    Cmid = ypad_ref.shape[-1]
    ypad_ref[...] = jnp.zeros_like(ypad_ref)
    ypad_ref[1:H + 1, 1:W + 1, :] = y1.reshape(H, W, Cmid)
    y2 = conv3x3_bn_relu(ypad_ref, p2_ref, w2_ref, s2_ref[...], b2_ref[...])

    o_ref[0] = y2.astype(o_ref.dtype)


def double_conv_bn_relu(x_nhwc, w1, s1, b1, w2, s2, b2):
    """x_nhwc: (N,H,W,Cin) f32; w*: (3,3,Ci,Co) f32 HWIO; s*/b*: (Co,) f32."""
    N, H, W, Cin = x_nhwc.shape
    Cmid = w1.shape[-1]
    Cout = w2.shape[-1]

    Cin_p = _round_up(Cin, 8)       # sublane-friendly contraction chunk
    Cmid_p = _round_up(Cmid, 8)     # VMEM-resident intermediate channels
    Cout_p = _round_up(Cout, 128)   # lane-dense output stores

    # Channel padding + bf16 cast of the MXU operands (also halves the HBM read).
    xp = jnp.pad(x_nhwc, ((0, 0), (0, 0), (0, 0), (0, Cin_p - Cin)))
    xp = xp.astype(jnp.bfloat16)
    w1p = jnp.pad(w1, ((0, 0), (0, 0), (0, Cin_p - Cin), (0, Cmid_p - Cmid)))
    w1p = w1p.reshape(9 * Cin_p, Cmid_p).astype(jnp.bfloat16)
    w2p = jnp.pad(w2, ((0, 0), (0, 0), (0, Cmid_p - Cmid), (0, Cout_p - Cout)))
    w2p = w2p.reshape(9 * Cmid_p, Cout_p).astype(jnp.bfloat16)
    s1p = jnp.pad(s1, (0, Cmid_p - Cmid)).reshape(1, Cmid_p).astype(jnp.float32)
    b1p = jnp.pad(b1, (0, Cmid_p - Cmid)).reshape(1, Cmid_p).astype(jnp.float32)
    s2p = jnp.pad(s2, (0, Cout_p - Cout)).reshape(1, Cout_p).astype(jnp.float32)
    b2p = jnp.pad(b2, (0, Cout_p - Cout)).reshape(1, Cout_p).astype(jnp.float32)

    # Rough per-step VMEM need (double-buffered I/O blocks + weights + scratch).
    blk_bytes = 2 * (H * W * Cin_p * 2 + H * W * Cout_p * 4)
    wgt_bytes = (9 * Cin_p * Cmid_p + 9 * Cmid_p * Cout_p) * 2 \
        + 2 * (Cmid_p + Cout_p) * 4
    scr_bytes = (H + 2) * (W + 2) * (Cin_p + Cmid_p) * 4 \
        + H * W * 9 * (Cin_p + Cmid_p) * 2
    vmem_limit = min(max(2 * (blk_bytes + wgt_bytes + scr_bytes),
                         32 * 1024 * 1024), 64 * 1024 * 1024)

    flops = 2 * N * H * W * 9 * (Cin_p * Cmid_p + Cmid_p * Cout_p)
    bytes_accessed = (N * H * W * Cin_p * 2          # bf16 input
                      + N * H * W * Cout_p * 4       # f32 output
                      + (9 * Cin_p * Cmid_p + 9 * Cmid_p * Cout_p) * 2
                      + 2 * (Cmid_p + Cout_p) * 4)

    out = pl.pallas_call(
        _double_conv_kernel,
        out_shape=jax.ShapeDtypeStruct((N, H * W, Cout_p), jnp.float32),
        grid_spec=pltpu.PrefetchScalarGridSpec(
            num_scalar_prefetch=0,
            grid=(N,),
            in_specs=[
                pl.BlockSpec((1, H, W, Cin_p), lambda n: (n, 0, 0, 0)),
                pl.BlockSpec((9 * Cin_p, Cmid_p), lambda n: (0, 0)),
                pl.BlockSpec((1, Cmid_p), lambda n: (0, 0)),
                pl.BlockSpec((1, Cmid_p), lambda n: (0, 0)),
                pl.BlockSpec((9 * Cmid_p, Cout_p), lambda n: (0, 0)),
                pl.BlockSpec((1, Cout_p), lambda n: (0, 0)),
                pl.BlockSpec((1, Cout_p), lambda n: (0, 0)),
            ],
            out_specs=pl.BlockSpec((1, H * W, Cout_p), lambda n: (n, 0, 0)),
            scratch_shapes=[
                pltpu.VMEM((H + 2, W + 2, Cin_p), jnp.float32),
                pltpu.VMEM((H + 2, W + 2, Cmid_p), jnp.float32),
                pltpu.VMEM((H * W, 9 * Cin_p), jnp.bfloat16),
                pltpu.VMEM((H * W, 9 * Cmid_p), jnp.bfloat16),
            ],
        ),
        compiler_params=pltpu.CompilerParams(
            dimension_semantics=("parallel",),
            vmem_limit_bytes=vmem_limit),
        cost_estimate=pl.CostEstimate(
            flops=flops, transcendentals=0, bytes_accessed=bytes_accessed),
    )(xp, w1p, s1p, b1p, w2p, s2p, b2p)

    # Un-flatten the spatial dims and drop the channel padding.
    return out.reshape(N, H, W, Cout_p)[..., :Cout]


double_conv_bn_relu = jax.jit(double_conv_bn_relu)


def fold_bn(conv_bias, gamma, beta, running_mean, running_var, eps=1e-5):
    """Fold Conv2d bias + BatchNorm2d (eval) into per-channel scale/bias."""
    scale = gamma / jnp.sqrt(running_var + eps)
    bias = (conv_bias - running_mean) * scale + beta
    return scale, bias


class InConvPallas:
    """JAX/Pallas equivalent of InConv(in_ch, out_ch) forward (BN in eval mode)."""

    def __init__(self, in_ch, out_ch, key):
        k = jax.random.split(key, 8)
        f32 = jnp.float32
        # Conv1: (3,3,in_ch,out_ch), Conv2: (3,3,out_ch,out_ch)  (HWIO)
        self.w1 = 0.1 * jax.random.normal(k[0], (3, 3, in_ch, out_ch), f32)
        self.b1 = 0.1 * jax.random.normal(k[1], (out_ch,), f32)
        self.w2 = 0.1 * jax.random.normal(k[2], (3, 3, out_ch, out_ch), f32)
        self.b2 = 0.1 * jax.random.normal(k[3], (out_ch,), f32)
        # BatchNorm params / running stats (deterministic, non-trivial).
        self.g1 = 1.0 + 0.1 * jax.random.normal(k[4], (out_ch,), f32)
        self.be1 = 0.1 * jax.random.normal(k[5], (out_ch,), f32)
        self.rm1 = jnp.zeros((out_ch,), f32)
        self.rv1 = jnp.ones((out_ch,), f32)
        self.g2 = 1.0 + 0.1 * jax.random.normal(k[6], (out_ch,), f32)
        self.be2 = 0.1 * jax.random.normal(k[7], (out_ch,), f32)
        self.rm2 = jnp.zeros((out_ch,), f32)
        self.rv2 = jnp.ones((out_ch,), f32)

    def __call__(self, x_nchw):
        # layout: NCHW (PyTorch) -> NHWC for the TPU kernel, back to NCHW at end.
        x = jnp.transpose(x_nchw, (0, 2, 3, 1))
        s1, bb1 = fold_bn(self.b1, self.g1, self.be1, self.rm1, self.rv1)
        s2, bb2 = fold_bn(self.b2, self.g2, self.be2, self.rm2, self.rv2)
        y = double_conv_bn_relu(x, self.w1, s1, bb1, self.w2, s2, bb2)
        return jnp.transpose(y, (0, 3, 1, 2))


if __name__ == "__main__":
    key = jax.random.PRNGKey(0)
    k_param, k_x = jax.random.split(key)

    N, in_ch, out_ch, H, W = 2, 4, 8, 16, 16
    x = jax.random.normal(k_x, (N, in_ch, H, W), jnp.float32)

    model = InConvPallas(in_ch, out_ch, k_param)
    y = jax.block_until_ready(model(x))
    assert y.shape == (N, out_ch, H, W), y.shape

    # Reference: lax conv with the same bf16 operand rounding + folded BN + ReLU.
    def bf16r(a):
        return a.astype(jnp.bfloat16).astype(jnp.float32)

    def ref_layer(xin, w, s, b):
        yc = jax.lax.conv_general_dilated(
            bf16r(xin), bf16r(w), window_strides=(1, 1), padding="SAME",
            dimension_numbers=("NHWC", "HWIO", "NHWC"),
            preferred_element_type=jnp.float32,
            precision=jax.lax.Precision.HIGHEST)
        return jnp.maximum(yc * s + b, 0.0)

    xr = jnp.transpose(x, (0, 2, 3, 1))
    s1, bb1 = fold_bn(model.b1, model.g1, model.be1, model.rm1, model.rv1)
    s2, bb2 = fold_bn(model.b2, model.g2, model.be2, model.rm2, model.rv2)
    yr = ref_layer(ref_layer(xr, model.w1, s1, bb1), model.w2, s2, bb2)
    yr = jnp.transpose(yr, (0, 3, 1, 2))
    max_err = float(jnp.max(jnp.abs(y - yr)))
    assert jnp.allclose(y, yr, atol=1e-2, rtol=1e-2), max_err

    print("KERNEL_OK")
</pallas_src>

<mosaic_0001>
module attributes {stable_mosaic.version = 11 : i64} {
  func.func @_double_conv_kernel(%arg0: i32, %arg1: memref<1x16x16x8xbf16, #tpu.memory_space<vmem>>, %arg2: memref<72x8xbf16, #tpu.memory_space<vmem>>, %arg3: memref<1x8xf32, #tpu.memory_space<vmem>>, %arg4: memref<1x8xf32, #tpu.memory_space<vmem>>, %arg5: memref<72x128xbf16, #tpu.memory_space<vmem>>, %arg6: memref<1x128xf32, #tpu.memory_space<vmem>>, %arg7: memref<1x128xf32, #tpu.memory_space<vmem>>, %arg8: memref<1x256x128xf32, #tpu.memory_space<vmem>>, %arg9: memref<18x18x8xf32, #tpu.memory_space<vmem>>, %arg10: memref<18x18x8xf32, #tpu.memory_space<vmem>>, %arg11: memref<256x72xbf16, #tpu.memory_space<vmem>>, %arg12: memref<256x72xbf16, #tpu.memory_space<vmem>>) attributes {dimension_semantics = [#tpu.dimension_semantics<parallel>], iteration_bounds = array<i64: 2>, scalar_prefetch = 0 : i64, scratch_operands = 4 : i64, tpu.core_type = #tpu.core_type<tc>, window_params = [{transform_indices = @transform_0, window_bounds = array<i64: 1, 16, 16, 8>}, {pipeline_mode = #tpu.pipeline_mode<synchronous>, transform_indices = @transform_1, window_bounds = array<i64: 72, 8>}, {pipeline_mode = #tpu.pipeline_mode<synchronous>, transform_indices = @transform_2, window_bounds = array<i64: 1, 8>}, {pipeline_mode = #tpu.pipeline_mode<synchronous>, transform_indices = @transform_3, window_bounds = array<i64: 1, 8>}, {pipeline_mode = #tpu.pipeline_mode<synchronous>, transform_indices = @transform_4, window_bounds = array<i64: 72, 128>}, {pipeline_mode = #tpu.pipeline_mode<synchronous>, transform_indices = @transform_5, window_bounds = array<i64: 1, 128>}, {pipeline_mode = #tpu.pipeline_mode<synchronous>, transform_indices = @transform_6, window_bounds = array<i64: 1, 128>}, {transform_indices = @transform_7, window_bounds = array<i64: 1, 256, 128>}]} {
    %cst = arith.constant 0.000000e+00 : f32
    %0 = vector.broadcast %cst : f32 to vector<18x18x8xf32>
    %c0 = arith.constant 0 : index
    %c0_0 = arith.constant 0 : index
    %c0_1 = arith.constant 0 : index
    %1 = vector.load %arg9[%c0, %c0_0, %c0_1] : memref<18x18x8xf32, #tpu.memory_space<vmem>>, vector<18x18x8xf32>
    tpu.vector_store %arg9[%c0, %c0_0, %c0_1], %0 {strides = array<i32>} : memref<18x18x8xf32, #tpu.memory_space<vmem>>, vector<18x18x8xf32>,
    %c0_2 = arith.constant 0 : index
    %c0_3 = arith.constant 0 : index
    %c0_4 = arith.constant 0 : index
    %c0_5 = arith.constant 0 : index
    %2 = vector.load %arg1[%c0_2, %c0_3, %c0_4, %c0_5] : memref<1x16x16x8xbf16, #tpu.memory_space<vmem>>, vector<1x16x16x8xbf16>
    %3 = vector.shape_cast %2 : vector<1x16x16x8xbf16> to vector<16x16x8xbf16>
    %4 = arith.extf %3 : vector<16x16x8xbf16> to vector<16x16x8xf32>
    %c1 = arith.constant 1 : index
    %c1_6 = arith.constant 1 : index
    %c0_7 = arith.constant 0 : index
    %5 = vector.load %arg9[%c1, %c1_6, %c0_7] : memref<18x18x8xf32, #tpu.memory_space<vmem>>, vector<16x16x8xf32>
    tpu.vector_store %arg9[%c1, %c1_6, %c0_7], %4 {strides = array<i32>} : memref<18x18x8xf32, #tpu.memory_space<vmem>>, vector<16x16x8xf32>,
    %c0_8 = arith.constant 0 : index
    %c0_9 = arith.constant 0 : index
    %6 = vector.load %arg3[%c0_8, %c0_9] : memref<1x8xf32, #tpu.memory_space<vmem>>, vector<1x8xf32>
    %c0_10 = arith.constant 0 : index
    %c0_11 = arith.constant 0 : index
    %7 = vector.load %arg4[%c0_10, %c0_11] : memref<1x8xf32, #tpu.memory_space<vmem>>, vector<1x8xf32>
    %c0_12 = arith.constant 0 : index
    %c0_13 = arith.constant 0 : index
    %c0_14 = arith.constant 0 : index
    %8 = vector.load %arg9[%c0_12, %c0_13, %c0_14] : memref<18x18x8xf32, #tpu.memory_space<vmem>>, vector<16x16x8xf32>
    %9 = vector.shape_cast %8 : vector<16x16x8xf32> to vector<256x8xf32>
    %10 = arith.truncf %9 : vector<256x8xf32> to vector<256x8xbf16>
    %c0_15 = arith.constant 0 : index
    %c0_16 = arith.constant 0 : index
    %11 = vector.load %arg11[%c0_15, %c0_16] : memref<256x72xbf16, #tpu.memory_space<vmem>>, vector<256x8xbf16>
    tpu.vector_store %arg11[%c0_15, %c0_16], %10 {strides = array<i32>} : memref<256x72xbf16, #tpu.memory_space<vmem>>, vector<256x8xbf16>,
    %c0_17 = arith.constant 0 : index
    %c1_18 = arith.constant 1 : index
    %c0_19 = arith.constant 0 : index
    %12 = vector.load %arg9[%c0_17, %c1_18, %c0_19] : memref<18x18x8xf32, #tpu.memory_space<vmem>>, vector<16x16x8xf32>
    %13 = vector.shape_cast %12 : vector<16x16x8xf32> to vector<256x8xf32>
    %14 = arith.truncf %13 : vector<256x8xf32> to vector<256x8xbf16>
    %c0_20 = arith.constant 0 : index
    %c8 = arith.constant 8 : index
    %15 = vector.load %arg11[%c0_20, %c8] : memref<256x72xbf16, #tpu.memory_space<vmem>>, vector<256x8xbf16>
    tpu.vector_store %arg11[%c0_20, %c8], %14 {strides = array<i32>} : memref<256x72xbf16, #tpu.memory_space<vmem>>, vector<256x8xbf16>,
    %c0_21 = arith.constant 0 : index
    %c2 = arith.constant 2 : index
    %c0_22 = arith.constant 0 : index
    %16 = vector.load %arg9[%c0_21, %c2, %c0_22] : memref<18x18x8xf32, #tpu.memory_space<vmem>>, vector<16x16x8xf32>
    %17 = vector.shape_cast %16 : vector<16x16x8xf32> to vector<256x8xf32>
    %18 = arith.truncf %17 : vector<256x8xf32> to vector<256x8xbf16>
    %c0_23 = arith.constant 0 : index
    %c16 = arith.constant 16 : index
    %19 = vector.load %arg11[%c0_23, %c16] : memref<256x72xbf16, #tpu.memory_space<vmem>>, vector<256x8xbf16>
    tpu.vector_store %arg11[%c0_23, %c16], %18 {strides = array<i32>} : memref<256x72xbf16, #tpu.memory_space<vmem>>, vector<256x8xbf16>,
    %c1_24 = arith.constant 1 : index
    %c0_25 = arith.constant 0 : index
    %c0_26 = arith.constant 0 : index
    %20 = vector.load %arg9[%c1_24, %c0_25, %c0_26] : memref<18x18x8xf32, #tpu.memory_space<vmem>>, vector<16x16x8xf32>
    %21 = vector.shape_cast %20 : vector<16x16x8xf32> to vector<256x8xf32>
    %22 = arith.truncf %21 : vector<256x8xf32> to vector<256x8xbf16>
    %c0_27 = arith.constant 0 : index
    %c24 = arith.constant 24 : index
    %23 = vector.load %arg11[%c0_27, %c24] : memref<256x72xbf16, #tpu.memory_space<vmem>>, vector<256x8xbf16>
    tpu.vector_store %arg11[%c0_27, %c24], %22 {strides = array<i32>} : memref<256x72xbf16, #tpu.memory_space<vmem>>, vector<256x8xbf16>,
    %c1_28 = arith.constant 1 : index
    %c1_29 = arith.constant 1 : index
    %c0_30 = arith.constant 0 : index
    %24 = vector.load %arg9[%c1_28, %c1_29, %c0_30] : memref<18x18x8xf32, #tpu.memory_space<vmem>>, vector<16x16x8xf32>
    %25 = vector.shape_cast %24 : vector<16x16x8xf32> to vector<256x8xf32>
    %26 = arith.truncf %25 : vector<256x8xf32> to vector<256x8xbf16>
    %c0_31 = arith.constant 0 : index
    %c32 = arith.constant 32 : index
    %27 = vector.load %arg11[%c0_31, %c32] : memref<256x72xbf16, #tpu.memory_space<vmem>>, vector<256x8xbf16>
    tpu.vector_store %arg11[%c0_31, %c32], %26 {strides = array<i32>} : memref<256x72xbf16, #tpu.memory_space<vmem>>, vector<256x8xbf16>,
    %c1_32 = arith.constant 1 : index
    %c2_33 = arith.constant 2 : index
    %c0_34 = arith.constant 0 : index
    %28 = vector.load %arg9[%c1_32, %c2_33, %c0_34] : memref<18x18x8xf32, #tpu.memory_space<vmem>>, vector<16x16x8xf32>
    %29 = vector.shape_cast %28 : vector<16x16x8xf32> to vector<256x8xf32>
    %30 = arith.truncf %29 : vector<256x8xf32> to vector<256x8xbf16>
    %c0_35 = arith.constant 0 : index
    %c40 = arith.constant 40 : index
    %31 = vector.load %arg11[%c0_35, %c40] : memref<256x72xbf16, #tpu.memory_space<vmem>>, vector<256x8xbf16>
    tpu.vector_store %arg11[%c0_35, %c40], %30 {strides = array<i32>} : memref<256x72xbf16, #tpu.memory_space<vmem>>, vector<256x8xbf16>,
    %c2_36 = arith.constant 2 : index
    %c0_37 = arith.constant 0 : index
    %c0_38 = arith.constant 0 : index
    %32 = vector.load %arg9[%c2_36, %c0_37, %c0_38] : memref<18x18x8xf32, #tpu.memory_space<vmem>>, vector<16x16x8xf32>
    %33 = vector.shape_cast %32 : vector<16x16x8xf32> to vector<256x8xf32>
    %34 = arith.truncf %33 : vector<256x8xf32> to vector<256x8xbf16>
    %c0_39 = arith.constant 0 : index
    %c48 = arith.constant 48 : index
    %35 = vector.load %arg11[%c0_39, %c48] : memref<256x72xbf16, #tpu.memory_space<vmem>>, vector<256x8xbf16>
    tpu.vector_store %arg11[%c0_39, %c48], %34 {strides = array<i32>} : memref<256x72xbf16, #tpu.memory_space<vmem>>, vector<256x8xbf16>,
    %c2_40 = arith.constant 2 : index
    %c1_41 = arith.constant 1 : index
    %c0_42 = arith.constant 0 : index
    %36 = vector.load %arg9[%c2_40, %c1_41, %c0_42] : memref<18x18x8xf32, #tpu.memory_space<vmem>>, vector<16x16x8xf32>
    %37 = vector.shape_cast %36 : vector<16x16x8xf32> to vector<256x8xf32>
    %38 = arith.truncf %37 : vector<256x8xf32> to vector<256x8xbf16>
    %c0_43 = arith.constant 0 : index
    %c56 = arith.constant 56 : index
    %39 = vector.load %arg11[%c0_43, %c56] : memref<256x72xbf16, #tpu.memory_space<vmem>>, vector<256x8xbf16>
    tpu.vector_store %arg11[%c0_43, %c56], %38 {strides = array<i32>} : memref<256x72xbf16, #tpu.memory_space<vmem>>, vector<256x8xbf16>,
    %c2_44 = arith.constant 2 : index
    %c2_45 = arith.constant 2 : index
    %c0_46 = arith.constant 0 : index
    %40 = vector.load %arg9[%c2_44, %c2_45, %c0_46] : memref<18x18x8xf32, #tpu.memory_space<vmem>>, vector<16x16x8xf32>
    %41 = vector.shape_cast %40 : vector<16x16x8xf32> to vector<256x8xf32>
    %42 = arith.truncf %41 : vector<256x8xf32> to vector<256x8xbf16>
    %c0_47 = arith.constant 0 : index
    %c64 = arith.constant 64 : index
    %43 = vector.load %arg11[%c0_47, %c64] : memref<256x72xbf16, #tpu.memory_space<vmem>>, vector<256x8xbf16>
    tpu.vector_store %arg11[%c0_47, %c64], %42 {strides = array<i32>} : memref<256x72xbf16, #tpu.memory_space<vmem>>, vector<256x8xbf16>,
    %c0_48 = arith.constant 0 : index
    %c0_49 = arith.constant 0 : index
    %44 = vector.load %arg11[%c0_48, %c0_49] : memref<256x72xbf16, #tpu.memory_space<vmem>>, vector<256x72xbf16>
    %c0_50 = arith.constant 0 : index
    %c0_51 = arith.constant 0 : index
    %45 = vector.load %arg2[%c0_50, %c0_51] : memref<72x8xbf16, #tpu.memory_space<vmem>>, vector<72x8xbf16>
    %cst_52 = arith.constant dense<0.000000e+00> : vector<256x8xf32>
    %46 = tpu.matmul %44, %45, %cst_52 {dimension_numbers = #tpu.dot_dimension_numbers<[1], [0], [0], [1], [0, 0, 1, 1], [], []>} : vector<256x72xbf16>, vector<72x8xbf16>, vector<256x8xf32> -> vector<256x8xf32>
    %47 = vector.broadcast %6 : vector<1x8xf32> to vector<256x8xf32>
    %48 = arith.mulf %46, %47 : vector<256x8xf32>
    %49 = vector.broadcast %7 : vector<1x8xf32> to vector<256x8xf32>
    %50 = arith.addf %48, %49 : vector<256x8xf32>
    %cst_53 = arith.constant 0.000000e+00 : f32
    %51 = vector.broadcast %cst_53 : f32 to vector<256x8xf32>
    %52 = arith.maximumf %50, %51 : vector<256x8xf32>
    %cst_54 = arith.constant 0.000000e+00 : f32
    %53 = vector.broadcast %cst_54 : f32 to vector<18x18x8xf32>
    %c0_55 = arith.constant 0 : index
    %c0_56 = arith.constant 0 : index
    %c0_57 = arith.constant 0 : index
    %54 = vector.load %arg10[%c0_55, %c0_56, %c0_57] : memref<18x18x8xf32, #tpu.memory_space<vmem>>, vector<18x18x8xf32>
    tpu.vector_store %arg10[%c0_55, %c0_56, %c0_57], %53 {strides = array<i32>} : memref<18x18x8xf32, #tpu.memory_space<vmem>>, vector<18x18x8xf32>,
    %55 = vector.shape_cast %52 : vector<256x8xf32> to vector<16x16x8xf32>
    %c1_58 = arith.constant 1 : index
    %c1_59 = arith.constant 1 : index
    %c0_60 = arith.constant 0 : index
    %56 = vector.load %arg10[%c1_58, %c1_59, %c0_60] : memref<18x18x8xf32, #tpu.memory_space<vmem>>, vector<16x16x8xf32>
    tpu.vector_store %arg10[%c1_58, %c1_59, %c0_60], %55 {strides = array<i32>} : memref<18x18x8xf32, #tpu.memory_space<vmem>>, vector<16x16x8xf32>,
    %c0_61 = arith.constant 0 : index
    %c0_62 = arith.constant 0 : index
    %57 = vector.load %arg6[%c0_61, %c0_62] : memref<1x128xf32, #tpu.memory_space<vmem>>, vector<1x128xf32>
    %c0_63 = arith.constant 0 : index
    %c0_64 = arith.constant 0 : index
    %58 = vector.load %arg7[%c0_63, %c0_64] : memref<1x128xf32, #tpu.memory_space<vmem>>, vector<1x128xf32>
    %c0_65 = arith.constant 0 : index
    %c0_66 = arith.constant 0 : index
    %c0_67 = arith.constant 0 : index
    %59 = vector.load %arg10[%c0_65, %c0_66, %c0_67] : memref<18x18x8xf32, #tpu.memory_space<vmem>>, vector<16x16x8xf32>
    %60 = vector.shape_cast %59 : vector<16x16x8xf32> to vector<256x8xf32>
    %61 = arith.truncf %60 : vector<256x8xf32> to vector<256x8xbf16>
    %c0_68 = arith.constant 0 : index
    %c0_69 = arith.constant 0 : index
    %62 = vector.load %arg12[%c0_68, %c0_69] : memref<256x72xbf16, #tpu.memory_space<vmem>>, vector<256x8xbf16>
    tpu.vector_store %arg12[%c0_68, %c0_69], %61 {strides = array<i32>} : memref<256x72xbf16, #tpu.memory_space<vmem>>, vector<256x8xbf16>,
    %c0_70 = arith.constant 0 : index
    %c1_71 = arith.constant 1 : index
    %c0_72 = arith.constant 0 : index
    %63 = vector.load %arg10[%c0_70, %c1_71, %c0_72] : memref<18x18x8xf32, #tpu.memory_space<vmem>>, vector<16x16x8xf32>
    %64 = vector.shape_cast %63 : vector<16x16x8xf32> to vector<256x8xf32>
    %65 = arith.truncf %64 : vector<256x8xf32> to vector<256x8xbf16>
    %c0_73 = arith.constant 0 : index
    %c8_74 = arith.constant 8 : index
    %66 = vector.load %arg12[%c0_73, %c8_74] : memref<256x72xbf16, #tpu.memory_space<vmem>>, vector<256x8xbf16>
    tpu.vector_store %arg12[%c0_73, %c8_74], %65 {strides = array<i32>} : memref<256x72xbf16, #tpu.memory_space<vmem>>, vector<256x8xbf16>,
    %c0_75 = arith.constant 0 : index
    %c2_76 = arith.constant 2 : index
    %c0_77 = arith.constant 0 : index
    %67 = vector.load %arg10[%c0_75, %c2_76, %c0_77] : memref<18x18x8xf32, #tpu.memory_space<vmem>>, vector<16x16x8xf32>
    %68 = vector.shape_cast %67 : vector<16x16x8xf32> to vector<256x8xf32>
    %69 = arith.truncf %68 : vector<256x8xf32> to vector<256x8xbf16>
    %c0_78 = arith.constant 0 : index
    %c16_79 = arith.constant 16 : index
    %70 = vector.load %arg12[%c0_78, %c16_79] : memref<256x72xbf16, #tpu.memory_space<vmem>>, vector<256x8xbf16>
    tpu.vector_store %arg12[%c0_78, %c16_79], %69 {strides = array<i32>} : memref<256x72xbf16, #tpu.memory_space<vmem>>, vector<256x8xbf16>,
    %c1_80 = arith.constant 1 : index
    %c0_81 = arith.constant 0 : index
    %c0_82 = arith.constant 0 : index
    %71 = vector.load %arg10[%c1_80, %c0_81, %c0_82] : memref<18x18x8xf32, #tpu.memory_space<vmem>>, vector<16x16x8xf32>
    %72 = vector.shape_cast %71 : vector<16x16x8xf32> to vector<256x8xf32>
    %73 = arith.truncf %72 : vector<256x8xf32> to vector<256x8xbf16>
    %c0_83 = arith.constant 0 : index
    %c24_84 = arith.constant 24 : index
    %74 = vector.load %arg12[%c0_83, %c24_84] : memref<256x72xbf16, #tpu.memory_space<vmem>>, vector<256x8xbf16>
    tpu.vector_store %arg12[%c0_83, %c24_84], %73 {strides = array<i32>} : memref<256x72xbf16, #tpu.memory_space<vmem>>, vector<256x8xbf16>,
    %c1_85 = arith.constant 1 : index
    %c1_86 = arith.constant 1 : index
    %c0_87 = arith.constant 0 : index
    %75 = vector.load %arg10[%c1_85, %c1_86, %c0_87] : memref<18x18x8xf32, #tpu.memory_space<vmem>>, vector<16x16x8xf32>
    %76 = vector.shape_cast %75 : vector<16x16x8xf32> to vector<256x8xf32>
    %77 = arith.truncf %76 : vector<256x8xf32> to vector<256x8xbf16>
    %c0_88 = arith.constant 0 : index
    %c32_89 = arith.constant 32 : index
    %78 = vector.load %arg12[%c0_88, %c32_89] : memref<256x72xbf16, #tpu.memory_space<vmem>>, vector<256x8xbf16>
    tpu.vector_store %arg12[%c0_88, %c32_89], %77 {strides = array<i32>} : memref<256x72xbf16, #tpu.memory_space<vmem>>, vector<256x8xbf16>,
    %c1_90 = arith.constant 1 : index
    %c2_91 = arith.constant 2 : index
    %c0_92 = arith.constant 0 : index
    %79 = vector.load %arg10[%c1_90, %c2_91, %c0_92] : memref<18x18x8xf32, #tpu.memory_space<vmem>>, vector<16x16x8xf32>
    %80 = vector.shape_cast %79 : vector<16x16x8xf32> to vector<256x8xf32>
    %81 = arith.truncf %80 : vector<256x8xf32> to vector<256x8xbf16>
    %c0_93 = arith.constant 0 : index
    %c40_94 = arith.constant 40 : index
    %82 = vector.load %arg12[%c0_93, %c40_94] : memref<256x72xbf16, #tpu.memory_space<vmem>>, vector<256x8xbf16>
    tpu.vector_store %arg12[%c0_93, %c40_94], %81 {strides = array<i32>} : memref<256x72xbf16, #tpu.memory_space<vmem>>, vector<256x8xbf16>,
    %c2_95 = arith.constant 2 : index
    %c0_96 = arith.constant 0 : index
    %c0_97 = arith.constant 0 : index
    %83 = vector.load %arg10[%c2_95, %c0_96, %c0_97] : memref<18x18x8xf32, #tpu.memory_space<vmem>>, vector<16x16x8xf32>
    %84 = vector.shape_cast %83 : vector<16x16x8xf32> to vector<256x8xf32>
    %85 = arith.truncf %84 : vector<256x8xf32> to vector<256x8xbf16>
    %c0_98 = arith.constant 0 : index
    %c48_99 = arith.constant 48 : index
    %86 = vector.load %arg12[%c0_98, %c48_99] : memref<256x72xbf16, #tpu.memory_space<vmem>>, vector<256x8xbf16>
    tpu.vector_store %arg12[%c0_98, %c48_99], %85 {strides = array<i32>} : memref<256x72xbf16, #tpu.memory_space<vmem>>, vector<256x8xbf16>,
    %c2_100 = arith.constant 2 : index
    %c1_101 = arith.constant 1 : index
    %c0_102 = arith.constant 0 : index
    %87 = vector.load %arg10[%c2_100, %c1_101, %c0_102] : memref<18x18x8xf32, #tpu.memory_space<vmem>>, vector<16x16x8xf32>
    %88 = vector.shape_cast %87 : vector<16x16x8xf32> to vector<256x8xf32>
    %89 = arith.truncf %88 : vector<256x8xf32> to vector<256x8xbf16>
    %c0_103 = arith.constant 0 : index
    %c56_104 = arith.constant 56 : index
    %90 = vector.load %arg12[%c0_103, %c56_104] : memref<256x72xbf16, #tpu.memory_space<vmem>>, vector<256x8xbf16>
    tpu.vector_store %arg12[%c0_103, %c56_104], %89 {strides = array<i32>} : memref<256x72xbf16, #tpu.memory_space<vmem>>, vector<256x8xbf16>,
    %c2_105 = arith.constant 2 : index
    %c2_106 = arith.constant 2 : index
    %c0_107 = arith.constant 0 : index
    %91 = vector.load %arg10[%c2_105, %c2_106, %c0_107] : memref<18x18x8xf32, #tpu.memory_space<vmem>>, vector<16x16x8xf32>
    %92 = vector.shape_cast %91 : vector<16x16x8xf32> to vector<256x8xf32>
    %93 = arith.truncf %92 : vector<256x8xf32> to vector<256x8xbf16>
    %c0_108 = arith.constant 0 : index
    %c64_109 = arith.constant 64 : index
    %94 = vector.load %arg12[%c0_108, %c64_109] : memref<256x72xbf16, #tpu.memory_space<vmem>>, vector<256x8xbf16>
    tpu.vector_store %arg12[%c0_108, %c64_109], %93 {strides = array<i32>} : memref<256x72xbf16, #tpu.memory_space<vmem>>, vector<256x8xbf16>,
    %c0_110 = arith.constant 0 : index
    %c0_111 = arith.constant 0 : index
    %95 = vector.load %arg12[%c0_110, %c0_111] : memref<256x72xbf16, #tpu.memory_space<vmem>>, vector<256x72xbf16>
    %c0_112 = arith.constant 0 : index
    %c0_113 = arith.constant 0 : index
    %96 = vector.load %arg5[%c0_112, %c0_113] : memref<72x128xbf16, #tpu.memory_space<vmem>>, vector<72x128xbf16>
    %cst_114 = arith.constant dense<0.000000e+00> : vector<256x128xf32>
    %97 = tpu.matmul %95, %96, %cst_114 {dimension_numbers = #tpu.dot_dimension_numbers<[1], [0], [0], [1], [0, 0, 1, 1], [], []>} : vector<256x72xbf16>, vector<72x128xbf16>, vector<256x128xf32> -> vector<256x128xf32>
    %98 = vector.broadcast %57 : vector<1x128xf32> to vector<256x128xf32>
    %99 = arith.mulf %97, %98 : vector<256x128xf32>
    %100 = vector.broadcast %58 : vector<1x128xf32> to vector<256x128xf32>
    %101 = arith.addf %99, %100 : vector<256x128xf32>
    %cst_115 = arith.constant 0.000000e+00 : f32
    %102 = vector.broadcast %cst_115 : f32 to vector<256x128xf32>
    %103 = arith.maximumf %101, %102 : vector<256x128xf32>
    %c0_116 = arith.constant 0 : index
    %c0_117 = arith.constant 0 : index
    %c0_118 = arith.constant 0 : index
    %104 = vector.load %arg8[%c0_116, %c0_117, %c0_118] : memref<1x256x128xf32, #tpu.memory_space<vmem>>, vector<1x256x128xf32>
    %105 = vector.shape_cast %104 : vector<1x256x128xf32> to vector<256x128xf32>
    %106 = vector.shape_cast %103 : vector<256x128xf32> to vector<1x256x128xf32>
    tpu.vector_store %arg8[%c0_116, %c0_117, %c0_118], %106 {strides = array<i32>} : memref<1x256x128xf32, #tpu.memory_space<vmem>>, vector<1x256x128xf32>,
    return
  }
  func.func @transform_0(%arg0: i32) -> (i32, i32, i32, i32) {
    %c0_i32 = arith.constant 0 : i32
    %c0_i32_0 = arith.constant 0 : i32
    %c0_i32_1 = arith.constant 0 : i32
    %c0_i32_2 = arith.constant 0 : i32
    return %arg0, %c0_i32, %c0_i32_0, %c0_i32_1 : i32, i32, i32, i32
  }
  func.func @transform_1(%arg0: i32) -> (i32, i32) {
    %c0_i32 = arith.constant 0 : i32
    %c0_i32_0 = arith.constant 0 : i32
    %c0_i32_1 = arith.constant 0 : i32
    return %c0_i32, %c0_i32_0 : i32, i32
  }
  func.func @transform_2(%arg0: i32) -> (i32, i32) {
    %c0_i32 = arith.constant 0 : i32
    %c0_i32_0 = arith.constant 0 : i32
    %c0_i32_1 = arith.constant 0 : i32
    return %c0_i32, %c0_i32_0 : i32, i32
  }
  func.func @transform_3(%arg0: i32) -> (i32, i32) {
    %c0_i32 = arith.constant 0 : i32
    %c0_i32_0 = arith.constant 0 : i32
    %c0_i32_1 = arith.constant 0 : i32
    return %c0_i32, %c0_i32_0 : i32, i32
  }
  func.func @transform_4(%arg0: i32) -> (i32, i32) {
    %c0_i32 = arith.constant 0 : i32
    %c0_i32_0 = arith.constant 0 : i32
    %c0_i32_1 = arith.constant 0 : i32
    return %c0_i32, %c0_i32_0 : i32, i32
  }
  func.func @transform_5(%arg0: i32) -> (i32, i32) {
    %c0_i32 = arith.constant 0 : i32
    %c0_i32_0 = arith.constant 0 : i32
    %c0_i32_1 = arith.constant 0 : i32
    return %c0_i32, %c0_i32_0 : i32, i32
  }
  func.func @transform_6(%arg0: i32) -> (i32, i32) {
    %c0_i32 = arith.constant 0 : i32
    %c0_i32_0 = arith.constant 0 : i32
    %c0_i32_1 = arith.constant 0 : i32
    return %c0_i32, %c0_i32_0 : i32, i32
  }
  func.func @transform_7(%arg0: i32) -> (i32, i32, i32) {
    %c0_i32 = arith.constant 0 : i32
    %c0_i32_0 = arith.constant 0 : i32
    %c0_i32_1 = arith.constant 0 : i32
    return %arg0, %c0_i32, %c0_i32_0 : i32, i32, i32
  }
}

</mosaic_0001>

<bundles_post_ra>
// kernel: double_conv_bn_relu.1
= control target key start
LH: loop header
LB: loop body
LE: loop exit
PB: predicated region body
PF: predicated region fallthrough
CT: control target
= control target key end

     0   :  { %s3893_s24 = smov 0   ;;  %s5108_s0 = inlined_call_operand.vmem [shape: bf16[2,16,16,8], index: 0, kind: input, shape index: {}]   ;;  %s5109_s1 = inlined_call_operand.vmem [shape: bf16[72,8], index: 1, kind: input, shape index: {}]   ;;  %s5110_s2 = inlined_call_operand.vmem [shape: f32[1,8], index: 2, kind: input, shape index: {}]   ;;  %s5111_s3 = inlined_call_operand.vmem [shape: f32[1,8], index: 3, kind: input, shape index: {}]   ;;  %s5112_s4 = inlined_call_operand.vmem [shape: bf16[72,128], index: 4, kind: input, shape index: {}]   ;;  %s5113_s5 = inlined_call_operand.vmem [shape: f32[1,128], index: 5, kind: input, shape index: {}]   ;;  %s5114_s6 = inlined_call_operand.vmem [shape: f32[1,128], index: 6, kind: input, shape index: {}]   ;;  %s5115_s7 = inlined_call_operand.vmem [shape: f32[2,256,128], index: 7, kind: output, shape index: {}]  }
   0x1 LB: > { %s3543_s25 = sadd.s32 4294967295, %s3842_s24   ;;  %p3547_p0 = scmp.ge.s32.totalorder %s3842_s24, 1  ;;  %s3842_s24 = sphi %s3893_s24, %s17_s24  }
   0x2   : > { %p237_p1 = scmp.lt.s32.totalorder %s3842_s24, 3 }
   0x4   : > { %p238_p2 = pnand %p3547_p0, %p237_p1 }
   0x5   : > { %vm280_vm0 = vcmask (!%p238_p2), 64512   ;;  %vm283_vm1 = vcmask (!%p238_p2), 58368   ;;  %v3844_v0 = vmov (!%p238_p2), 0.0   ;;  %p269_p3 = scmp.lt.s32.totalorder (!%p238_p2), %s3543_s25, 1  ;;  %s3845_s30 = smov (!%p238_p2), 8   ;;  %vm1633_vm2 = vcmask (!%p238_p2), 1043456  }
   0x6   : > { %241 = sbr.rel (%p238_p2) target bundleno = 1064 (0x428), region = 48  ;;  %281 = vst.msk [vmem:[#allocation2] sm:$0xff] (!%p238_p2), %vm280_vm0, %v3844_v0  ;;  %282 = vst.msk [vmem:[#allocation2 + $0x8] sm:$0xff] (!%p238_p2), %vm280_vm0, %v3844_v0  ;;  %s3846_s8 = smov (!%p238_p2), 16   ;;  %vm611_vm3 = vcmask (!%p238_p2), 130112   ;;  %vm740_vm4 = vcmask (!%p238_p2), 195712  }
   0x7   : > { %284 = vst.msk [vmem:[#allocation2 + $0x10] sm:$0x3] (!%p238_p2), %vm283_vm1, %v3844_v0  ;;  %287 = vst.msk [vmem:[#allocation2 + $0x28] sm:$0x3] (!%p238_p2), %vm283_vm1, %v3844_v0  ;;  %s3847_s9 = smov (!%p238_p2), 24   ;;  %s3848_s10 = smov (!%p238_p2), 32  }
   0x8   : > { %285 = vst.msk [vmem:[#allocation2 + $0x18] sm:$0xff] (!%p238_p2), %vm280_vm0, %v3844_v0  ;;  %286 = vst.msk [vmem:[#allocation2 + $0x20] sm:$0xff] (!%p238_p2), %vm280_vm0, %v3844_v0  ;;  %s3849_s11 = smov (!%p238_p2), 40   ;;  %s3850_s14 = smov (!%p238_p2), 48   ;;  %vm869_vm5 = vcmask (!%p238_p2), 261312   ;;  %vm998_vm6 = vcmask (!%p238_p2), 326912  }
   0x9   : > { %288 = vst.msk [vmem:[#allocation2 + $0x30] sm:$0xff] (!%p238_p2), %vm280_vm0, %v3844_v0  ;;  %289 = vst.msk [vmem:[#allocation2 + $0x38] sm:$0xff] (!%p238_p2), %vm280_vm0, %v3844_v0  ;;  %s3851_s19 = smov (!%p238_p2), 56   ;;  %s3852_s22 = smov (!%p238_p2), 64   ;;  %vm1127_vm7 = vcmask (!%p238_p2), 392512   ;;  %vm1257_vm8 = vcmask (!%p238_p2), 458112  }
   0xa   : > { %290 = vst.msk [vmem:[#allocation2 + $0x40] sm:$0x3] (!%p238_p2), %vm283_vm1, %v3844_v0  ;;  %293 = vst.msk [vmem:[#allocation2 + $0x58] sm:$0x3] (!%p238_p2), %vm283_vm1, %v3844_v0  ;;  %vm1386_vm9 = vcmask (!%p238_p2), 523712   ;;  %vm1515_vm10 = vcmask (!%p238_p2), 589312  }
   0xb   : > { %291 = vst.msk [vmem:[#allocation2 + $0x48] sm:$0xff] (!%p238_p2), %vm280_vm0, %v3844_v0  ;;  %292 = vst.msk [vmem:[#allocation2 + $0x50] sm:$0xff] (!%p238_p2), %vm280_vm0, %v3844_v0  ;;  %vm1584_vm11 = vcmask (!%p238_p2), 588800  }
   0xc   : > { %294 = vst.msk [vmem:[#allocation2 + $0x60] sm:$0xff] (!%p238_p2), %vm280_vm0, %v3844_v0  ;;  %295 = vst.msk [vmem:[#allocation2 + $0x68] sm:$0xff] (!%p238_p2), %vm280_vm0, %v3844_v0 }
   0xd   : > { %296 = vst.msk [vmem:[#allocation2 + $0x70] sm:$0x3] %vm283_vm1, %v3844_v0  ;;  %299 = vst.msk [vmem:[#allocation2 + $0x88] sm:$0x3] %vm283_vm1, %v3844_v0  ;;  %s5117_s25 = smov (!%p269_p3, %s3543_s25), 1  ;;  %v499_v4 = vld [vmem:[#allocation2 + $0x1] sm:$0xff] }
   0xe   : > { %297 = vst.msk [vmem:[#allocation2 + $0x78] sm:$0xff] %vm280_vm0, %v3844_v0  ;;  %298 = vst.msk [vmem:[#allocation2 + $0x80] sm:$0xff] %vm280_vm0, %v3844_v0  ;;  %s3600_s26 = sshll.u32 %s5117_s25, 7  ;;  %v500_v5 = vld [vmem:[#allocation2 + $0x9] sm:$0xff]  ;;  %v435_v29 = vld [vmem:[#allocation2] sm:$0xff] }
   0xf   : > { %300 = vst.msk [vmem:[#allocation2 + $0x90] sm:$0xff] %vm280_vm0, %v3844_v0  ;;  %301 = vst.msk [vmem:[#allocation2 + $0x98] sm:$0xff] %vm280_vm0, %v3844_v0  ;;  %s4127_s29 = scalar_lea.vmem %s5108_s0, %s3600_s26  ;;  %v628_v6 = vld [vmem:[#allocation2 + $0x2] sm:$0xff]  ;;  %v531_v11 = vpack.c.bf16 %v500_v5, %v499_v4  ;;  %v629_v12 = vld [vmem:[#allocation2 + $0xa] sm:$0xff] }
  0x10   : > { %302 = vst.msk [vmem:[#allocation2 + $0xa0] sm:$0x3] %vm283_vm1, %v3844_v0  ;;  %305 = vst.msk [vmem:[#allocation2 + $0xb8] sm:$0x3] %vm283_vm1, %v3844_v0  ;;  %v3603_v1 = vld [vmem:[%s4127_s29] sm:$0xff]   ;;  %v3666_v2 = vld [vmem:[%s4127_s29 + $0x8] sm:$0xff]   ;;  %v660_v17 = vpack.c.bf16 %v629_v12, %v628_v6 }
  0x11   : > { %303 = vst.msk [vmem:[#allocation2 + $0xa8] sm:$0xff] %vm280_vm0, %v3844_v0  ;;  %304 = vst.msk [vmem:[#allocation2 + $0xb0] sm:$0xff] %vm280_vm0, %v3844_v0  ;;  %v3667_v3 = vld [vmem:[%s4127_s29 + $0x10] sm:$0xff]   ;;  %v3604_v7 = vunpack.c.l.bf16 %v3603_v1  ;;  %v3605_v8 = vunpack.c.h.bf16 %v3603_v1  ;;  %v3608_v9 = vunpack.c.l.bf16 %v3666_v2  ;;  %v3609_v10 = vunpack.c.h.bf16 %v3666_v2  ;;  %v3668_v15 = vld [vmem:[%s4127_s29 + $0x18] sm:$0xff]   ;;  %563 = vrot.lane.b32.xlu0 %v531_v11, %s3845_s30 }
  0x12   : > { %306 = vst.msk [vmem:[#allocation2 + $0xc0] sm:$0xff] %vm280_vm0, %v3844_v0  ;;  %307 = vst.msk [vmem:[#allocation2 + $0xc8] sm:$0xff] %vm280_vm0, %v3844_v0  ;;  %v3612_v13 = vunpack.c.l.bf16 %v3667_v3  ;;  %v3613_v14 = vunpack.c.h.bf16 %v3667_v3  ;;  %v3669_v16 = vld [vmem:[%s4127_s29 + $0x20] sm:$0xff]   ;;  %v3616_v18 = vunpack.c.l.bf16 %v3668_v15  ;;  %v3617_v19 = vunpack.c.h.bf16 %v3668_v15  ;;  %v3670_v21 = vld [vmem:[%s4127_s29 + $0x28] sm:$0xff]   ;;  %692 = vrot.lane.b32.xlu1 %v660_v17, %s3846_s8 }
  0x13   : > { %308 = vst.msk [vmem:[#allocation2 + $0xd0] sm:$0x3] %vm283_vm1, %v3844_v0  ;;  %311 = vst.msk [vmem:[#allocation2 + $0xe8] sm:$0x3] %vm283_vm1, %v3844_v0  ;;  %v3620_v20 = vunpack.c.l.bf16 %v3669_v16  ;;  %v3671_v22 = vld [vmem:[%s4127_s29 + $0x30] sm:$0xff]   ;;  %v3672_v23 = vld [vmem:[%s4127_s29 + $0x38] sm:$0xff]   ;;  %v3621_v24 = vunpack.c.h.bf16 %v3669_v16  ;;  %v3624_v25 = vunpack.c.l.bf16 %v3670_v21  ;;  %v3625_v26 = vunpack.c.h.bf16 %v3670_v21 }
  0x14   : > { %309 = vst.msk [vmem:[#allocation2 + $0xd8] sm:$0xff] %vm280_vm0, %v3844_v0  ;;  %310 = vst.msk [vmem:[#allocation2 + $0xe0] sm:$0xff] %vm280_vm0, %v3844_v0  ;;  %v3628_v27 = vunpack.c.l.bf16 %v3671_v22  ;;  %v436_v28 = vld [vmem:[#allocation2 + $0x8] sm:$0xff]  ;;  %v3673_v30 = vld [vmem:[%s4127_s29 + $0x40] sm:$0xff]   ;;  %v3629_v31 = vunpack.c.h.bf16 %v3671_v22  ;;  %v3632_v32 = vunpack.c.l.bf16 %v3672_v23  ;;  %v3633_v33 = vunpack.c.h.bf16 %v3672_v23 }
  0x15   : > { %312 = vst.msk [vmem:[#allocation2 + $0xf0] sm:$0xff] %vm280_vm0, %v3844_v0  ;;  %313 = vst.msk [vmem:[#allocation2 + $0xf8] sm:$0xff] %vm280_vm0, %v3844_v0  ;;  %v467_v34 = vpack.c.bf16 %v436_v28, %v435_v29  ;;  %v3674_v35 = vld [vmem:[%s4127_s29 + $0x48] sm:$0xff]   ;;  %v3636_v36 = vunpack.c.l.bf16 %v3673_v30  ;;  %v3637_v37 = vunpack.c.h.bf16 %v3673_v30  ;;  %v3828_v21 = vld [vmem:[%s5109_s1 + $0x10] sm:$0xff]  }
  0x16   : > { %314 = vst.msk [vmem:[#allocation2 + $0x100] sm:$0x3] %vm283_vm1, %v3844_v0  ;;  %317 = vst.msk [vmem:[#allocation2 + $0x118] sm:$0x3] %vm283_vm1, %v3844_v0  ;;  %v3640_v38 = vunpack.c.l.bf16 %v3674_v35  ;;  %v3641_v39 = vunpack.c.h.bf16 %v3674_v35  ;;  %v3676_v28 = vld [vmem:[%s4127_s29 + $0x58] sm:$0xff]  }
  0x17   : > { %315 = vst.msk [vmem:[#allocation2 + $0x108] sm:$0xff] %vm280_vm0, %v3844_v0  ;;  %316 = vst.msk [vmem:[#allocation2 + $0x110] sm:$0xff] %vm280_vm0, %v3844_v0  ;;  %v3648_v29 = vunpack.c.l.bf16 %v3676_v28  ;;  %v3649_v30 = vunpack.c.h.bf16 %v3676_v28 }
  0x18   : > { %318 = vst.msk [vmem:[#allocation2 + $0x120] sm:$0xff] %vm280_vm0, %v3844_v0  ;;  %319 = vst.msk [vmem:[#allocation2 + $0x128] sm:$0xff] %vm280_vm0, %v3844_v0 }
  0x19   : > { %320 = vst.msk [vmem:[#allocation2 + $0x130] sm:$0x3] %vm283_vm1, %v3844_v0  ;;  %323 = vst.msk [vmem:[#allocation2 + $0x148] sm:$0x3] %vm283_vm1, %v3844_v0 }
  0x1a   : > { %321 = vst.msk [vmem:[#allocation2 + $0x138] sm:$0xff] %vm280_vm0, %v3844_v0  ;;  %322 = vst.msk [vmem:[#allocation2 + $0x140] sm:$0xff] %vm280_vm0, %v3844_v0 }
  0x1b   : > { %324 = vst.msk [vmem:[#allocation2 + $0x150] sm:$0xff] %vm280_vm0, %v3844_v0  ;;  %325 = vst.msk [vmem:[#allocation2 + $0x158] sm:$0xff] %vm280_vm0, %v3844_v0 }
  0x1c   : > { %326 = vst.msk [vmem:[#allocation2 + $0x160] sm:$0x3] %vm283_vm1, %v3844_v0  ;;  %329 = vst.msk [vmem:[#allocation2 + $0x178] sm:$0x3] %vm283_vm1, %v3844_v0 }
  0x1d   : > { %327 = vst.msk [vmem:[#allocation2 + $0x168] sm:$0xff] %vm280_vm0, %v3844_v0  ;;  %328 = vst.msk [vmem:[#allocation2 + $0x170] sm:$0xff] %vm280_vm0, %v3844_v0 }
  0x1e   : > { %330 = vst.msk [vmem:[#allocation2 + $0x180] sm:$0xff] %vm280_vm0, %v3844_v0  ;;  %331 = vst.msk [vmem:[#allocation2 + $0x188] sm:$0xff] %vm280_vm0, %v3844_v0 }
  0x1f   : > { %332 = vst.msk [vmem:[#allocation2 + $0x190] sm:$0x3] %vm283_vm1, %v3844_v0  ;;  %335 = vst.msk [vmem:[#allocation2 + $0x1a8] sm:$0x3] %vm283_vm1, %v3844_v0 }
  0x20   : > { %333 = vst.msk [vmem:[#allocation2 + $0x198] sm:$0xff] %vm280_vm0, %v3844_v0  ;;  %334 = vst.msk [vmem:[#allocation2 + $0x1a0] sm:$0xff] %vm280_vm0, %v3844_v0 }
  0x21   : > { %1906 = vst.msk [vmem:[#allocation3] sm:$0xff] %vm280_vm0, %v3844_v0  ;;  %1907 = vst.msk [vmem:[#allocation3 + $0x8] sm:$0xff] %vm280_vm0, %v3844_v0 }
  0x22   : > { %1908 = vst.msk [vmem:[#allocation3 + $0x10] sm:$0x3] %vm283_vm1, %v3844_v0  ;;  %1911 = vst.msk [vmem:[#allocation3 + $0x28] sm:$0x3] %vm283_vm1, %v3844_v0 }
  0x23   : > { %1909 = vst.msk [vmem:[#allocation3 + $0x18] sm:$0xff] %vm280_vm0, %v3844_v0  ;;  %1910 = vst.msk [vmem:[#allocation3 + $0x20] sm:$0xff] %vm280_vm0, %v3844_v0 }
  0x24   : > { %1912 = vst.msk [vmem:[#allocation3 + $0x30] sm:$0xff] %vm280_vm0, %v3844_v0  ;;  %1913 = vst.msk [vmem:[#allocation3 + $0x38] sm:$0xff] %vm280_vm0, %v3844_v0 }
  0x25   : > { %1914 = vst.msk [vmem:[#allocation3 + $0x40] sm:$0x3] %vm283_vm1, %v3844_v0  ;;  %1917 = vst.msk [vmem:[#allocation3 + $0x58] sm:$0x3] %vm283_vm1, %v3844_v0 }
  0x26   : > { %1915 = vst.msk [vmem:[#allocation3 + $0x48] sm:$0xff] %vm280_vm0, %v3844_v0  ;;  %1916 = vst.msk [vmem:[#allocation3 + $0x50] sm:$0xff] %vm280_vm0, %v3844_v0 }
  0x27   : > { %1918 = vst.msk [vmem:[#allocation3 + $0x60] sm:$0xff] %vm280_vm0, %v3844_v0  ;;  %1919 = vst.msk [vmem:[#allocation3 + $0x68] sm:$0xff] %vm280_vm0, %v3844_v0 }
  0x28   : > { %1920 = vst.msk [vmem:[#allocation3 + $0x70] sm:$0x3] %vm283_vm1, %v3844_v0  ;;  %1923 = vst.msk [vmem:[#allocation3 + $0x88] sm:$0x3] %vm283_vm1, %v3844_v0 }
  0x29   : > { %1921 = vst.msk [vmem:[#allocation3 + $0x78] sm:$0xff] %vm280_vm0, %v3844_v0  ;;  %1922 = vst.msk [vmem:[#allocation3 + $0x80] sm:$0xff] %vm280_vm0, %v3844_v0 }
  0x2a   : > { %1924 = vst.msk [vmem:[#allocation3 + $0x90] sm:$0xff] %vm280_vm0, %v3844_v0  ;;  %1925 = vst.msk [vmem:[#allocation3 + $0x98] sm:$0xff] %vm280_vm0, %v3844_v0 }
  0x2b   : > { %1926 = vst.msk [vmem:[#allocation3 + $0xa0] sm:$0x3] %vm283_vm1, %v3844_v0  ;;  %1929 = vst.msk [vmem:[#allocation3 + $0xb8] sm:$0x3] %vm283_vm1, %v3844_v0 }
  0x2c   : > { %1927 = vst.msk [vmem:[#allocation3 + $0xa8] sm:$0xff] %vm280_vm0, %v3844_v0  ;;  %1928 = vst.msk [vmem:[#allocation3 + $0xb0] sm:$0xff] %vm280_vm0, %v3844_v0 }
  0x2d   : > { %1930 = vst.msk [vmem:[#allocation3 + $0xc0] sm:$0xff] %vm280_vm0, %v3844_v0  ;;  %1931 = vst.msk [vmem:[#allocation3 + $0xc8] sm:$0xff] %vm280_vm0, %v3844_v0 }
  0x2e   : > { %1932 = vst.msk [vmem:[#allocation3 + $0xd0] sm:$0x3] %vm283_vm1, %v3844_v0  ;;  %1935 = vst.msk [vmem:[#allocation3 + $0xe8] sm:$0x3] %vm283_vm1, %v3844_v0 }
  0x2f   : > { %1933 = vst.msk [vmem:[#allocation3 + $0xd8] sm:$0xff] %vm280_vm0, %v3844_v0  ;;  %1934 = vst.msk [vmem:[#allocation3 + $0xe0] sm:$0xff] %vm280_vm0, %v3844_v0 }
  0x30   : > { %1936 = vst.msk [vmem:[#allocation3 + $0xf0] sm:$0xff] %vm280_vm0, %v3844_v0  ;;  %1937 = vst.msk [vmem:[#allocation3 + $0xf8] sm:$0xff] %vm280_vm0, %v3844_v0 }
  0x31   : > { %1938 = vst.msk [vmem:[#allocation3 + $0x100] sm:$0x3] %vm283_vm1, %v3844_v0  ;;  %1941 = vst.msk [vmem:[#allocation3 + $0x118] sm:$0x3] %vm283_vm1, %v3844_v0 }
  0x32   : > { %1939 = vst.msk [vmem:[#allocation3 + $0x108] sm:$0xff] %vm280_vm0, %v3844_v0  ;;  %1940 = vst.msk [vmem:[#allocation3 + $0x110] sm:$0xff] %vm280_vm0, %v3844_v0 }
  0x33   : > { %1942 = vst.msk [vmem:[#allocation3 + $0x120] sm:$0xff] %vm280_vm0, %v3844_v0  ;;  %1943 = vst.msk [vmem:[#allocation3 + $0x128] sm:$0xff] %vm280_vm0, %v3844_v0 }
  0x34   : > { %1944 = vst.msk [vmem:[#allocation3 + $0x130] sm:$0x3] %vm283_vm1, %v3844_v0  ;;  %1947 = vst.msk [vmem:[#allocation3 + $0x148] sm:$0x3] %vm283_vm1, %v3844_v0 }
  0x35   : > { %1945 = vst.msk [vmem:[#allocation3 + $0x138] sm:$0xff] %vm280_vm0, %v3844_v0  ;;  %1946 = vst.msk [vmem:[#allocation3 + $0x140] sm:$0xff] %vm280_vm0, %v3844_v0 }
  0x36   : > { %1948 = vst.msk [vmem:[#allocation3 + $0x150] sm:$0xff] %vm280_vm0, %v3844_v0  ;;  %1949 = vst.msk [vmem:[#allocation3 + $0x158] sm:$0xff] %vm280_vm0, %v3844_v0 }
  0x37   : > { %1950 = vst.msk [vmem:[#allocation3 + $0x160] sm:$0x3] %vm283_vm1, %v3844_v0  ;;  %1953 = vst.msk [vmem:[#allocation3 + $0x178] sm:$0x3] %vm283_vm1, %v3844_v0 }
  0x38   : > { %1951 = vst.msk [vmem:[#allocation3 + $0x168] sm:$0xff] %vm280_vm0, %v3844_v0  ;;  %1952 = vst.msk [vmem:[#allocation3 + $0x170] sm:$0xff] %vm280_vm0, %v3844_v0 }
  0x39   : > { %1954 = vst.msk [vmem:[#allocation3 + $0x180] sm:$0xff] %vm280_vm0, %v3844_v0  ;;  %1955 = vst.msk [vmem:[#allocation3 + $0x188] sm:$0xff] %vm280_vm0, %v3844_v0 }
  0x3a   : > { %1956 = vst.msk [vmem:[#allocation3 + $0x190] sm:$0x3] %vm283_vm1, %v3844_v0  ;;  %1959 = vst.msk [vmem:[#allocation3 + $0x1a8] sm:$0x3] %vm283_vm1, %v3844_v0 }
  0x3b   : > { %1957 = vst.msk [vmem:[#allocation3 + $0x198] sm:$0xff] %vm280_vm0, %v3844_v0  ;;  %1958 = vst.msk [vmem:[#allocation3 + $0x1a0] sm:$0xff] %vm280_vm0, %v3844_v0 }
  0x3c   : > { %401 = vst.msk [vmem:[#allocation2 + $0x19] sm:$0xff] %vm280_vm0, %v3604_v7  ;;  %402 = vst.msk [vmem:[#allocation2 + $0x21] sm:$0xff] %vm280_vm0, %v3605_v8 }
  0x3d   : > { %403 = vst.msk [vmem:[#allocation2 + $0x31] sm:$0xff] %vm280_vm0, %v3608_v9  ;;  %404 = vst.msk [vmem:[#allocation2 + $0x39] sm:$0xff] %vm280_vm0, %v3609_v10 }
  0x3e   : > { %405 = vst.msk [vmem:[#allocation2 + $0x49] sm:$0xff] %vm280_vm0, %v3612_v13  ;;  %406 = vst.msk [vmem:[#allocation2 + $0x51] sm:$0xff] %vm280_vm0, %v3613_v14  ;;  %v3826_v14 = vld [vmem:[%s5109_s1] sm:$0xff]  }
  0x3f   : > { %407 = vst.msk [vmem:[#allocation2 + $0x61] sm:$0xff] %vm280_vm0, %v3616_v18  ;;  %408 = vst.msk [vmem:[#allocation2 + $0x69] sm:$0xff] %vm280_vm0, %v3617_v19  ;;  %v3827_v18 = vld [vmem:[%s5109_s1 + $0x8] sm:$0xff]   ;;  %3723 = vmatprep.subr.bf16.mxu0 %v3826_v14 }
  0x40   : > { %409 = vst.msk [vmem:[#allocation2 + $0x79] sm:$0xff] %vm280_vm0, %v3620_v20  ;;  %410 = vst.msk [vmem:[#allocation2 + $0x81] sm:$0xff] %vm280_vm0, %v3621_v24  ;;  %3724 = vmatpush3.bf16.msra.mxu0 %v3826_v14  ;;  %v3675_v20 = vld [vmem:[%s4127_s29 + $0x50] sm:$0xff]  }
  0x41   : > { %411 = vst.msk [vmem:[#allocation2 + $0x91] sm:$0xff] %vm280_vm0, %v3624_v25  ;;  %412 = vst.msk [vmem:[#allocation2 + $0x99] sm:$0xff] %vm280_vm0, %v3625_v26  ;;  %3725 = vmatprep.subr.bf16.mxu0 %v3827_v18  ;;  %v3644_v22 = vunpack.c.l.bf16 %v3675_v20  ;;  %v3645_v23 = vunpack.c.h.bf16 %v3675_v20  ;;  %v3829_v26 = vld [vmem:[%s5109_s1 + $0x18] sm:$0xff]  }
  0x42   : > { %413 = vst.msk [vmem:[#allocation2 + $0xa9] sm:$0xff] %vm280_vm0, %v3628_v27  ;;  %414 = vst.msk [vmem:[#allocation2 + $0xb1] sm:$0xff] %vm280_vm0, %v3629_v31  ;;  %v3830_v31 = vld [vmem:[%s5109_s1 + $0x20] ss:$0 sps:$4 sm:$0xff]  }
  0x43   : > { %415 = vst.msk [vmem:[#allocation2 + $0xc1] sm:$0xff] %vm280_vm0, %v3632_v32  ;;  %416 = vst.msk [vmem:[#allocation2 + $0xc9] sm:$0xff] %vm280_vm0, %v3633_v33  ;;  %v501_v40 = vld [vmem:[#allocation2 + $0x19] sm:$0xff]  ;;  %v502_v41 = vld [vmem:[#allocation2 + $0x21] sm:$0xff]  ;;  %v1635_v35 = vsel %vm1633_vm2, %v3830_v31, 0 }
  0x44   : > { %483 = vst.msk [vmem:[#allocation4] sm:$0xff] %vm280_vm0, %v467_v34  ;;  %417 = vst.msk [vmem:[#allocation2 + $0xd9] sm:$0xff] %vm280_vm0, %v3636_v36  ;;  %v630_v42 = vld [vmem:[#allocation2 + $0x1a] sm:$0xff]  ;;  %v532_v43 = vpack.c.bf16 %v502_v41, %v501_v40  ;;  %v631_v44 = vld [vmem:[#allocation2 + $0x22] sm:$0xff]  ;;  %3726 = vmatpush3.bf16.msra.mxu0 %v3827_v18 }
  0x45   : > { %418 = vst.msk [vmem:[#allocation2 + $0xe1] sm:$0xff] %vm280_vm0, %v3637_v37  ;;  %419 = vst.msk [vmem:[#allocation2 + $0xf1] sm:$0xff] %vm280_vm0, %v3640_v38  ;;  %v757_v45 = vld [vmem:[#allocation2 + $0x18] sm:$0xff]  ;;  %v758_v46 = vld [vmem:[#allocation2 + $0x20] sm:$0xff]  ;;  %v661_v47 = vpack.c.bf16 %v631_v44, %v630_v42  ;;  %3727 = vmatprep.subr.bf16.mxu0 %v3828_v21 }
  0x46   : > { %420 = vst.msk [vmem:[#allocation2 + $0xf9] sm:$0xff] %vm280_vm0, %v3641_v39  ;;  %v789_v48 = vpack.c.bf16 %v758_v46, %v757_v45  ;;  %v759_v49 = vld [vmem:[#allocation2 + $0x30] sm:$0xff]  ;;  %v760_v50 = vld [vmem:[#allocation2 + $0x38] sm:$0xff]  ;;  %565 = vrot.lane.b32.xlu0 %v532_v43, %s3845_s30  ;;  %v1147_v52 = vld [vmem:[#allocation2 + $0x48] sm:$0xff] }
  0x47   : > { %v790_v51 = vpack.c.bf16 %v760_v50, %v759_v49  ;;  %694 = vrot.lane.b32.xlu1 %v661_v47, %s3846_s8  ;;  %v1148_v53 = vld [vmem:[#allocation2 + $0x50] sm:$0xff]  ;;  %v889_v55 = vld [vmem:[#allocation2 + $0x39] sm:$0xff]  ;;  %v764_v58 = vld [vmem:[#allocation2 + $0x68] sm:$0xff]  ;;  %421 = vst.msk [vmem:[#allocation2 + $0x109] sm:$0xff] %vm280_vm0, %v3644_v22 }
  0x48   : > { %484 = vst.msk [vmem:[#allocation4 + $0x8] sm:$0xff] %vm280_vm0, %v789_v48  ;;  %v888_v54 = vld [vmem:[#allocation2 + $0x31] sm:$0xff]  ;;  %v4165_v56 = vpack.c.bf16 %v1148_v53, %v1147_v52  ;;  %v763_v57 = vld [vmem:[#allocation2 + $0x60] sm:$0xff]  ;;  %v1276_v11 = vld [vmem:[#allocation2 + $0x49] sm:$0xff]  ;;  %3728 = vmatpush3.bf16.msra.mxu0 %v3828_v21 }
  0x49   : > { %485 = vst.msk [vmem:[#allocation4 + $0x10] sm:$0xff] %vm280_vm0, %v790_v51  ;;  %v4169_v59 = vpack.c.bf16 %v764_v58, %v763_v57  ;;  %v919_v60 = vpack.c.bf16 %v889_v55, %v888_v54  ;;  %v1151_v61 = vld [vmem:[#allocation2 + $0x78] sm:$0xff]  ;;  %v1152_v62 = vld [vmem:[#allocation2 + $0x80] sm:$0xff]  ;;  %v767_v2 = vld [vmem:[#allocation2 + $0x90] sm:$0xff]  ;;  %3729 = vmatprep.subr.bf16.mxu0 %v3829_v26 }
  0x4a   : > { %821 = vrot.lane.b32.xlu0 %v789_v48, %s3847_s9  ;;  %486 = vst.msk [vmem:[#allocation4 + $0x18] sm:$0xff] %vm280_vm0, %v4165_v56  ;;  %v1017_v63 = vld [vmem:[#allocation2 + $0x32] sm:$0xff]  ;;  %v1018_v0 = vld [vmem:[#allocation2 + $0x3a] sm:$0xff]  ;;  %v4174_v1 = vpack.c.bf16 %v1152_v62, %v1151_v61  ;;  %v1155_v6 = vld [vmem:[#allocation2 + $0xa8] sm:$0xff] }
  0x4b   : > { %823 = vrot.lane.b32.xlu1 %v790_v51, %s3847_s9  ;;  %487 = vst.msk [vmem:[#allocation4 + $0x20] sm:$0xff] %vm280_vm0, %v4169_v59  ;;  %v768_v3 = vld [vmem:[#allocation2 + $0x98] sm:$0xff]  ;;  %v4184_v5 = vpack.c.bf16 %v1018_v0, %v1017_v63  ;;  %v1156_v7 = vld [vmem:[#allocation2 + $0xb0] sm:$0xff]  ;;  %422 = vst.msk [vmem:[#allocation2 + $0x111] sm:$0xff] %vm280_vm0, %v3645_v23 }
  0x4c   : > { %v4179_v4 = vpack.c.bf16 %v768_v3, %v767_v2  ;;  %488 = vst.msk [vmem:[#allocation4 + $0x28] sm:$0xff] %vm280_vm0, %v4174_v1  ;;  %v4186_v8 = vpack.c.bf16 %v1156_v7, %v1155_v6  ;;  %v1159_v9 = vld [vmem:[#allocation2 + $0xd8] sm:$0xff]  ;;  %v1160_v10 = vld [vmem:[#allocation2 + $0xe0] sm:$0xff]  ;;  %v775_v15 = vld [vmem:[#allocation2 + $0xf0] sm:$0xff]  ;;  %3730 = vmatpush3.bf16.msra.mxu0 %v3829_v26 }
  0x4d   : > { %v1277_v12 = vld [vmem:[#allocation2 + $0x51] sm:$0xff]  ;;  %v4195_v13 = vpack.c.bf16 %v1160_v10, %v1159_v9  ;;  %423 = vst.msk [vmem:[#allocation2 + $0x121] sm:$0xff] %vm280_vm0, %v3648_v29  ;;  %424 = vst.msk [vmem:[#allocation2 + $0x129] sm:$0xff] %vm280_vm0, %v3649_v30  ;;  %3807 = vmatprep.subr.msk.bf16.mxu0 %vm1633_vm2, %v3830_v31  ;;  %v892_v36 = vld [vmem:[#allocation2 + $0x61] sm:$0xff] }
  0x4e   : > { %950 = vrot.lane.b32.xlu0 %v532_v43, %s3848_s10  ;;  %489 = vst.msk [vmem:[#allocation4 + $0x30] sm:$0xff] %vm280_vm0, %v4179_v4  ;;  %490 = vst.msk [vmem:[#allocation4 + $0x38] sm:$0xff] %vm280_vm0, %v4186_v8  ;;  %v776_v16 = vld [vmem:[#allocation2 + $0xf8] sm:$0xff]  ;;  %v1307_v19 = vpack.c.bf16 %v1277_v12, %v1276_v11  ;;  %v1405_v24 = vld [vmem:[#allocation2 + $0x4a] sm:$0xff] }
  0x4f   : > { %952 = vrot.lane.b32.xlu1 %v919_v60, %s3848_s10  ;;  %v4201_v17 = vpack.c.bf16 %v776_v16, %v775_v15  ;;  %492 = vst.msk [vmem:[#allocation4 + $0x48] sm:$0xff] %vm280_vm0, %v4195_v13  ;;  %v1406_v25 = vld [vmem:[#allocation2 + $0x52] sm:$0xff]  ;;  %v1163_v32 = vld [vmem:[#allocation2 + $0x108] sm:$0xff]  ;;  %v3677_v41 = vld [vmem:[%s4127_s29 + $0x60] sm:$0xff]  }
  0x50   : > { %v1436_v27 = vpack.c.bf16 %v1406_v25, %v1405_v24  ;;  %v893_v37 = vld [vmem:[#allocation2 + $0x69] sm:$0xff]  ;;  %3732 = vmatpush3.bf16.msra.mxu0 %v1635_v35  ;;  %v3652_v43 = vunpack.c.l.bf16 %v3677_v41  ;;  %v3653_v44 = vunpack.c.h.bf16 %v3677_v41  ;;  %v1280_v48 = vld [vmem:[#allocation2 + $0x79] sm:$0xff]  ;;  %v1281_v49 = vld [vmem:[#allocation2 + $0x81] sm:$0xff] }
  0x51   : > { %493 = vst.msk [vmem:[#allocation4 + $0x50] sm:$0xff] %vm280_vm0, %v4201_v17  ;;  %v921_v42 = vpack.c.bf16 %v893_v37, %v892_v36  ;;  %v1021_v45 = vld [vmem:[#allocation2 + $0x62] sm:$0xff]  ;;  %v1022_v46 = vld [vmem:[#allocation2 + $0x6a] sm:$0xff]  ;;  %v1309_v53 = vpack.c.bf16 %v1281_v49, %v1280_v48  ;;  %v1409_v54 = vld [vmem:[#allocation2 + $0x7a] sm:$0xff] }
  0x52   : > { %1079 = vrot.lane.b32.xlu0 %v661_v47, %s3849_s11  ;;  %v1164_v33 = vld [vmem:[#allocation2 + $0x110] sm:$0xff]  ;;  %425 = vst.msk [vmem:[#allocation2 + $0x139] sm:$0xff] %vm280_vm0, %v3652_v43  ;;  %426 = vst.msk [vmem:[#allocation2 + $0x141] sm:$0xff] %vm280_vm0, %v3653_v44  ;;  %v1050_v47 = vpack.c.bf16 %v1022_v46, %v1021_v45  ;;  %v1410_v55 = vld [vmem:[#allocation2 + $0x82] sm:$0xff] }
  0x53   : > { %1081 = vrot.lane.b32.xlu1 %v4184_v5, %s3849_s11  ;;  %v4234_v34 = vpack.c.bf16 %v1164_v33, %v1163_v32  ;;  %v3678_v57 = vld [vmem:[%s4127_s29 + $0x68] sm:$0xff]   ;;  %v897_v61 = vld [vmem:[#allocation2 + $0x99] sm:$0xff]  ;;  %v3679_v2 = vld [vmem:[%s4127_s29 + $0x70] sm:$0xff]  }
  0x54   : > { %v779_v38 = vld [vmem:[#allocation2 + $0x120] sm:$0xff]  ;;  %v780_v39 = vld [vmem:[#allocation2 + $0x128] sm:$0xff]  ;;  %v3656_v58 = vunpack.c.l.bf16 %v3678_v57  ;;  %v3661_v6 = vunpack.c.h.bf16 %v3679_v2  ;;  %v1025_v7 = vld [vmem:[#allocation2 + $0x92] sm:$0xff] }
  0x55   : > { %494 = vst.msk [vmem:[#allocation4 + $0x58] sm:$0xff] %vm280_vm0, %v4234_v34  ;;  %v4243_v40 = vpack.c.bf16 %v780_v39, %v779_v38  ;;  %v1026_v9 = vld [vmem:[#allocation2 + $0x9a] sm:$0xff]  ;;  %v1284_v10 = vld [vmem:[#allocation2 + $0xa9] sm:$0xff]  ;;  %v1285_v11 = vld [vmem:[#allocation2 + $0xb1] sm:$0xff] }
  0x56   : > { %1209 = vrot.lane.b32.xlu0 %v790_v51, %s3850_s14  ;;  %427 = vst.msk [vmem:[#allocation2 + $0x151] sm:$0xff] %vm280_vm0, %v3656_v58  ;;  %430 = vst.msk [vmem:[#allocation2 + $0x171] sm:$0xff] %vm280_vm0, %v3661_v6  ;;  %v1311_v16 = vpack.c.bf16 %v1285_v11, %v1284_v10  ;;  %v1413_v18 = vld [vmem:[#allocation2 + $0xaa] sm:$0xff]  ;;  %v3680_v21 = vld [vmem:[%s4127_s29 + $0x78] sm:$0xff]  }
  0x57   : > { %1211 = vrot.lane.b32.xlu1 %v4165_v56, %s3850_s14  ;;  %495 = vst.msk [vmem:[#allocation4 + $0x60] sm:$0xff] %vm280_vm0, %v4243_v40  ;;  %v3665_v22 = vunpack.c.h.bf16 %v3680_v21  ;;  %v771_v23 = vld [vmem:[#allocation2 + $0xc0] sm:$0xff]  ;;  %v772_v24 = vld [vmem:[#allocation2 + $0xc8] sm:$0xff] }
  0x58   : > { %v796_v25 = vpack.c.bf16 %v772_v24, %v771_v23  ;;  %v900_v26 = vld [vmem:[#allocation2 + $0xc1] sm:$0xff]  ;;  %v1030_v30 = vld [vmem:[#allocation2 + $0xca] sm:$0xff]  ;;  %v1288_v37 = vld [vmem:[#allocation2 + $0xd9] sm:$0xff] }
  0x59   : > { %v1167_v50 = vld [vmem:[#allocation2 + $0x138] sm:$0xff]  ;;  %v1168_v51 = vld [vmem:[#allocation2 + $0x140] sm:$0xff]  ;;  %432 = vst.msk [vmem:[#allocation2 + $0x189] sm:$0xff] %vm280_vm0, %v3665_v22  ;;  %v1421_v11 = vld [vmem:[#allocation2 + $0x10a] sm:$0xff] }
  0x5a   : > { %1338 = vrot.lane.b32.xlu0 %v919_v60, %s3851_s19  ;;  %v4258_v52 = vpack.c.bf16 %v1168_v51, %v1167_v50  ;;  %v1029_v29 = vld [vmem:[#allocation2 + $0xc2] sm:$0xff]  ;;  %v1417_v43 = vld [vmem:[#allocation2 + $0xda] sm:$0xff] }
  0x5b   : > { %1340 = vrot.lane.b32.xlu1 %v1307_v19, %s3851_s19  ;;  %v1054_v31 = vpack.c.bf16 %v1030_v30, %v1029_v29  ;;  %v451_v35 = vld [vmem:[#allocation2 + $0xc0] sm:$0xff]  ;;  %v909_v24 = vld [vmem:[#allocation2 + $0x129] sm:$0xff] }
  0x5c   : > { %496 = vst.msk [vmem:[#allocation4 + $0x68] sm:$0xff] %vm280_vm0, %v4258_v52  ;;  %v1289_v38 = vld [vmem:[#allocation2 + $0xe1] sm:$0xff]  ;;  %v1038_v29 = vld [vmem:[#allocation2 + $0x12a] sm:$0xff] }
  0x5d   : > { %v783_v62 = vld [vmem:[#allocation2 + $0x150] sm:$0xff]  ;;  %v1313_v39 = vpack.c.bf16 %v1289_v38, %v1288_v37  ;;  %v1418_v44 = vld [vmem:[#allocation2 + $0xe2] sm:$0xff] }
  0x5e   : > { %1467 = vrot.lane.b32.xlu0 %v4184_v5, %s3852_s22  ;;  %v908_v23 = vld [vmem:[#allocation2 + $0x121] sm:$0xff] }
  0x5f   : > { %567 = vrot.lane.b32.xlu1 %v919_v60, %s3845_s30  ;;  %v896_v60 = vld [vmem:[#allocation2 + $0x91] sm:$0xff] }
  0x60   : > { %v923_v3 = vpack.c.bf16 %v897_v61, %v896_v60  ;;  %v1034_v60 = vld [vmem:[#allocation2 + $0xfa] sm:$0xff] }
  0x62   : > { %1469 = vrot.lane.b32.xlu0 %v1436_v27, %s3852_s22 }
  0x63   : > { %569 = vrot.lane.b32.xlu1 %v1307_v19, %s3845_s30 }
  0x66   : > { %696 = vrot.lane.b32.xlu0 %v4184_v5, %s3846_s8  ;;  %v3660_v5 = vunpack.c.l.bf16 %v3679_v2 }
  0x67   : > { %698 = vrot.lane.b32.xlu1 %v1436_v27, %s3846_s8 }
  0x68   : > { %429 = vst.msk [vmem:[#allocation2 + $0x169] sm:$0xff] %vm280_vm0, %v3660_v5  ;;  %v1293_v5 = vld [vmem:[#allocation2 + $0x111] sm:$0xff] }
  0x6a   : > { %825 = vrot.lane.b32.xlu0 %v4165_v56, %s3847_s9  ;;  %v1438_v56 = vpack.c.bf16 %v1410_v55, %v1409_v54  ;;  %v904_v54 = vld [vmem:[#allocation2 + $0xf1] sm:$0xff]  ;;  %v905_v55 = vld [vmem:[#allocation2 + $0xf9] sm:$0xff] }
  0x6b   : > { %827 = vrot.lane.b32.xlu1 %v4169_v59, %s3847_s9 }
  0x6e   : > { %954 = vrot.lane.b32.xlu0 %v1307_v19, %s3848_s10  ;;  %v1414_v19 = vld [vmem:[#allocation2 + $0xb2] sm:$0xff] }
  0x6f   : > { %956 = vrot.lane.b32.xlu1 %v921_v42, %s3848_s10  ;;  %v1171_v12 = vld [vmem:[#allocation2 + $0x168] sm:$0xff]  ;;  %v1172_v14 = vld [vmem:[#allocation2 + $0x170] sm:$0xff]  ;;  %v1440_v20 = vpack.c.bf16 %v1414_v19, %v1413_v18 }
  0x70   : > { %v4292_v15 = vpack.c.bf16 %v1172_v14, %v1171_v12 }
  0x72   : > { %1083 = vrot.lane.b32.xlu0 %v1436_v27, %s3849_s11  ;;  %498 = vst.msk [vmem:[#allocation4 + $0x78] sm:$0xff] %vm280_vm0, %v4292_v15  ;;  %v901_v27 = vld [vmem:[#allocation2 + $0xc9] sm:$0xff] }
  0x73   : > { %1085 = vrot.lane.b32.xlu1 %v1050_v47, %s3849_s11  ;;  %v925_v28 = vpack.c.bf16 %v901_v27, %v900_v26  ;;  %v929_v26 = vpack.c.bf16 %v909_v24, %v908_v23  ;;  %v917_v24 = vld [vmem:[#allocation2 + $0x189] sm:$0xff] }
  0x76   : > { %1213 = vrot.lane.b32.xlu0 %v4169_v59, %s3850_s14  ;;  %v3657_v59 = vunpack.c.h.bf16 %v3678_v57  ;;  %v927_v57 = vpack.c.bf16 %v905_v55, %v904_v54 }
  0x77   : > { %1215 = vrot.lane.b32.xlu1 %v4174_v1, %s3850_s14 }
  0x78   : > { %428 = vst.msk [vmem:[#allocation2 + $0x159] sm:$0xff] %vm280_vm0, %v3657_v59  ;;  %v1033_v59 = vld [vmem:[#allocation2 + $0xf2] sm:$0xff] }
  0x7a   : > { %1342 = vrot.lane.b32.xlu0 %v921_v42, %s3851_s19 }
  0x7b   : > { %1344 = vrot.lane.b32.xlu1 %v1309_v53, %s3851_s19 }
  0x7e   : > { %1471 = vrot.lane.b32.xlu0 %v1050_v47, %s3852_s22 }
  0x7f   : > { %571 = vrot.lane.b32.xlu1 %v921_v42, %s3845_s30  ;;  %v784_v63 = vld [vmem:[#allocation2 + $0x158] sm:$0xff] }
  0x80   : > { %v4277_v0 = vpack.c.bf16 %v784_v63, %v783_v62  ;;  %v1056_v62 = vpack.c.bf16 %v1034_v60, %v1033_v59  ;;  %v913_v54 = vld [vmem:[#allocation2 + $0x159] sm:$0xff] }
  0x81   : > { %v1042_v59 = vld [vmem:[#allocation2 + $0x15a] sm:$0xff] }
  0x82   : > { %1473 = vrot.lane.b32.xlu0 %v1438_v56, %s3852_s22  ;;  %497 = vst.msk [vmem:[#allocation4 + $0x70] sm:$0xff] %vm280_vm0, %v4277_v0 }
  0x83   : > { %573 = vrot.lane.b32.xlu1 %v1309_v53, %s3845_s30  ;;  %v564_v32 = vpop.permute.xlu0 %563 }
  0x84   : > { %612 = vst.msk [vmem:[#allocation4] sm:$0xff] %vm611_vm3, %v564_v32  ;;  %v693_v33 = vpop.permute.xlu1 %692 }
  0x85   : > { %741 = vst.msk [vmem:[#allocation4] sm:$0xff] %vm740_vm4, %v693_v33 }
  0x86   : > { %700 = vrot.lane.b32.xlu0 %v1050_v47, %s3846_s8  ;;  %v1442_v47 = vpack.c.bf16 %v1418_v44, %v1417_v43  ;;  %v1426_v43 = vld [vmem:[#allocation2 + $0x142] sm:$0xff] }
  0x87   : > { %702 = vrot.lane.b32.xlu1 %v1438_v56, %s3846_s8 }
  0x8a   : > { %829 = vrot.lane.b32.xlu0 %v4174_v1, %s3847_s9  ;;  %v1052_v1 = vpack.c.bf16 %v1026_v9, %v1025_v7 }
  0x8b   : > { %831 = vrot.lane.b32.xlu1 %v4179_v4, %s3847_s9 }
  0x8e   : > { %958 = vrot.lane.b32.xlu0 %v1309_v53, %s3848_s10 }
  0x8f   : > { %960 = vrot.lane.b32.xlu1 %v923_v3, %s3848_s10 }
  0x92   : > { %1087 = vrot.lane.b32.xlu0 %v1438_v56, %s3849_s11 }
  0x93   : > { %1089 = vrot.lane.b32.xlu1 %v1052_v1, %s3849_s11 }
  0x96   : > { %1217 = vrot.lane.b32.xlu0 %v4179_v4, %s3850_s14  ;;  %v3664_v4 = vunpack.c.l.bf16 %v3680_v21 }
  0x97   : > { %1219 = vrot.lane.b32.xlu1 %v4186_v8, %s3850_s14 }
  0x98   : > { %431 = vst.msk [vmem:[#allocation2 + $0x181] sm:$0xff] %vm280_vm0, %v3664_v4 }
  0x9a   : > { %1346 = vrot.lane.b32.xlu0 %v923_v3, %s3851_s19 }
  0x9b   : > { %1348 = vrot.lane.b32.xlu1 %v1311_v16, %s3851_s19 }
  0x9e   : > { %1475 = vrot.lane.b32.xlu0 %v1052_v1, %s3852_s22 }
  0x9f   : > { %575 = vrot.lane.b32.xlu1 %v923_v3, %s3845_s30  ;;  %v1292_v3 = vld [vmem:[#allocation2 + $0x109] sm:$0xff]  ;;  %v916_v23 = vld [vmem:[#allocation2 + $0x181] sm:$0xff] }
  0xa0   : > { %v1315_v7 = vpack.c.bf16 %v1293_v5, %v1292_v3 }
  0xa2   : > { %1477 = vrot.lane.b32.xlu0 %v1440_v20, %s3852_s22 }
  0xa3   : > { %577 = vrot.lane.b32.xlu1 %v1311_v16, %s3845_s30 }
  0xa6   : > { %704 = vrot.lane.b32.xlu0 %v1052_v1, %s3846_s8 }
  0xa7   : > { %706 = vrot.lane.b32.xlu1 %v1440_v20, %s3846_s8 }
  0xaa   : > { %833 = vrot.lane.b32.xlu0 %v4186_v8, %s3847_s9  ;;  %v452_v8 = vld [vmem:[#allocation2 + $0xc8] sm:$0xff] }
  0xab   : > { %835 = vrot.lane.b32.xlu1 %v796_v25, %s3847_s9  ;;  %v475_v36 = vpack.c.bf16 %v452_v8, %v451_v35  ;;  %v1296_v35 = vld [vmem:[#allocation2 + $0x139] sm:$0xff]  ;;  %v1297_v8 = vld [vmem:[#allocation2 + $0x141] sm:$0xff] }
  0xac   : > { %v1317_v37 = vpack.c.bf16 %v1297_v8, %v1296_v35 }
  0xad   : > { %491 = vst.msk [vmem:[#allocation4 + $0x40] sm:$0xff] %vm280_vm0, %v475_v36 }
  0xae   : > { %962 = vrot.lane.b32.xlu0 %v1311_v16, %s3848_s10 }
  0xaf   : > { %964 = vrot.lane.b32.xlu1 %v925_v28, %s3848_s10 }
  0xb2   : > { %1091 = vrot.lane.b32.xlu0 %v1440_v20, %s3849_s11 }
  0xb3   : > { %1093 = vrot.lane.b32.xlu1 %v1054_v31, %s3849_s11 }
  0xb6   : > { %1221 = vrot.lane.b32.xlu0 %v796_v25, %s3850_s14 }
  0xb7   : > { %1223 = vrot.lane.b32.xlu1 %v4195_v13, %s3850_s14 }
  0xb8   : > { %v566_v41 = vpop.permute.xlu0 %565 }
  0xb9   : > { %613 = vst.msk [vmem:[#allocation4 + $0x8] sm:$0xff] %vm611_vm3, %v566_v41  ;;  %v695_v42 = vpop.permute.xlu1 %694 }
  0xba   : > { %742 = vst.msk [vmem:[#allocation4 + $0x8] sm:$0xff] %vm740_vm4, %v695_v42  ;;  %1350 = vrot.lane.b32.xlu0 %v925_v28, %s3851_s19  ;;  %v1425_v42 = vld [vmem:[#allocation2 + $0x13a] sm:$0xff] }
  0xbb   : > { %1352 = vrot.lane.b32.xlu1 %v1313_v39, %s3851_s19 }
  0xbc   : > { %v822_v45 = vpop.permute.xlu0 %821 }
  0xbd   : > { %870 = vst.msk [vmem:[#allocation4] sm:$0xff] %vm869_vm5, %v822_v45  ;;  %v824_v46 = vpop.permute.xlu1 %823 }
  0xbe   : > { %871 = vst.msk [vmem:[#allocation4 + $0x8] sm:$0xff] %vm869_vm5, %v824_v46  ;;  %1479 = vrot.lane.b32.xlu0 %v1054_v31, %s3852_s22  ;;  %v1446_v46 = vpack.c.bf16 %v1426_v43, %v1425_v42  ;;  %v1433_v43 = vld [vmem:[#allocation2 + $0x19a] sm:$0xff] }
  0xbf   : > { %579 = vrot.lane.b32.xlu1 %v925_v28, %s3845_s30  ;;  %v1037_v28 = vld [vmem:[#allocation2 + $0x122] sm:$0xff] }
  0xc0   : > { %v951_v48 = vpop.permute.xlu0 %950 }
  0xc1   : > { %999 = vst.msk [vmem:[#allocation4] sm:$0xff] %vm998_vm6, %v951_v48  ;;  %v953_v49 = vpop.permute.xlu1 %952 }
  0xc2   : > { %1000 = vst.msk [vmem:[#allocation4 + $0x8] sm:$0xff] %vm998_vm6, %v953_v49  ;;  %1481 = vrot.lane.b32.xlu0 %v1442_v47, %s3852_s22 }
  0xc3   : > { %581 = vrot.lane.b32.xlu1 %v1313_v39, %s3845_s30 }
  0xc4   : > { %v1080_v50 = vpop.permute.xlu0 %1079 }
  0xc5   : > { %1128 = vst.msk [vmem:[#allocation4] sm:$0xff] %vm1127_vm7, %v1080_v50  ;;  %v1082_v51 = vpop.permute.xlu1 %1081 }
  0xc6   : > { %1129 = vst.msk [vmem:[#allocation4 + $0x8] sm:$0xff] %vm1127_vm7, %v1082_v51  ;;  %708 = vrot.lane.b32.xlu0 %v1054_v31, %s3846_s8  ;;  %v1058_v31 = vpack.c.bf16 %v1038_v29, %v1037_v28  ;;  %v1045_v28 = vld [vmem:[#allocation2 + $0x182] sm:$0xff]  ;;  %v1046_v29 = vld [vmem:[#allocation2 + $0x18a] sm:$0xff] }
  0xc7   : > { %710 = vrot.lane.b32.xlu1 %v1442_v47, %s3846_s8 }
  0xc8   : > { %v1210_v53 = vpop.permute.xlu0 %1209 }
  0xc9   : > { %1258 = vst.msk [vmem:[#allocation4] sm:$0xff] %vm1257_vm8, %v1210_v53  ;;  %v1212_v56 = vpop.permute.xlu1 %1211  ;;  %v912_v53 = vld [vmem:[#allocation2 + $0x151] sm:$0xff] }
  0xca   : > { %1259 = vst.msk [vmem:[#allocation4 + $0x8] sm:$0xff] %vm1257_vm8, %v1212_v56  ;;  %837 = vrot.lane.b32.xlu0 %v4195_v13, %s3847_s9  ;;  %v931_v56 = vpack.c.bf16 %v913_v54, %v912_v53  ;;  %v2187_v53 = vld [vmem:[#allocation3 + $0x2] sm:$0xff]  ;;  %v2188_v54 = vld [vmem:[#allocation3 + $0xa] sm:$0xff] }
  0xcb   : > { %839 = vrot.lane.b32.xlu1 %v4201_v17, %s3847_s9 }
  0xcc   : > { %v1339_v58 = vpop.permute.xlu0 %1338 }
  0xcd   : > { %1387 = vst.msk [vmem:[#allocation4] sm:$0xff] %vm1386_vm9, %v1339_v58  ;;  %v1341_v61 = vpop.permute.xlu1 %1340  ;;  %v1041_v58 = vld [vmem:[#allocation2 + $0x152] sm:$0xff] }
  0xce   : > { %1388 = vst.msk [vmem:[#allocation4 + $0x8] sm:$0xff] %vm1386_vm9, %v1341_v61  ;;  %966 = vrot.lane.b32.xlu0 %v1313_v39, %s3848_s10  ;;  %v1060_v61 = vpack.c.bf16 %v1042_v59, %v1041_v58 }
  0xcf   : > { %968 = vrot.lane.b32.xlu1 %v927_v57, %s3848_s10 }
  0xd0   : > { %v1468_v13 = vpop.permute.xlu0 %1467 }
  0xd1   : > { %1516 = vst.msk [vmem:[#allocation4] sm:$0xff] %vm1515_vm10, %v1468_v13  ;;  %v568_v63 = vpop.permute.xlu1 %567 }
  0xd2   : > { %614 = vst.msk [vmem:[#allocation4 + $0x10] sm:$0xff] %vm611_vm3, %v568_v63  ;;  %1095 = vrot.lane.b32.xlu0 %v1442_v47, %s3849_s11  ;;  %v1300_v63 = vld [vmem:[#allocation2 + $0x169] sm:$0xff] }
  0xd3   : > { %1097 = vrot.lane.b32.xlu1 %v1056_v62, %s3849_s11 }
  0xd4   : > { %v1470_v2 = vpop.permute.xlu0 %1469 }
  0xd5   : > { %1517 = vst.msk [vmem:[#allocation4 + $0x8] sm:$0xff] %vm1515_vm10, %v1470_v2  ;;  %v570_v6 = vpop.permute.xlu1 %569  ;;  %v1301_v2 = vld [vmem:[#allocation2 + $0x171] sm:$0xff] }
  0xd6   : > { %615 = vst.msk [vmem:[#allocation4 + $0x18] sm:$0xff] %vm611_vm3, %v570_v6  ;;  %1225 = vrot.lane.b32.xlu0 %v4201_v17, %s3850_s14  ;;  %v1422_v17 = vld [vmem:[#allocation2 + $0x112] sm:$0xff]  ;;  %v1319_v5 = vpack.c.bf16 %v1301_v2, %v1300_v63 }
  0xd7   : > { %1227 = vrot.lane.b32.xlu1 %v4234_v34, %s3850_s14  ;;  %v1444_v18 = vpack.c.bf16 %v1422_v17, %v1421_v11 }
  0xd8   : > { %v697_v9 = vpop.permute.xlu0 %696  ;;  %v1532_v1 = vld [vmem:[#allocation4] sm:$0xff] }
  0xd9   : > { %743 = vst.msk [vmem:[#allocation4 + $0x10] sm:$0xff] %vm740_vm4, %v697_v9  ;;  %v699_v10 = vpop.permute.xlu1 %698  ;;  %3733 = vmatprep.mubr.msk.bf16.mxu0 %vm1584_vm11, %v1532_v1  ;;  %v1429_v1 = vld [vmem:[#allocation2 + $0x16a] sm:$0xff] }
  0xda   : > { %744 = vst.msk [vmem:[#allocation4 + $0x18] sm:$0xff] %vm740_vm4, %v699_v10  ;;  %1354 = vrot.lane.b32.xlu0 %v927_v57, %s3851_s19  ;;  %v1430_v10 = vld [vmem:[#allocation2 + $0x172] sm:$0xff] }
  0xdb   : > { %1356 = vrot.lane.b32.xlu1 %v1315_v7, %s3851_s19 }
  0xdc   : > { %v826_v12 = vpop.permute.xlu0 %825  ;;  %v1533_v14 = vld [vmem:[#allocation4 + $0x8] sm:$0xff] }
  0xdd   : > { %872 = vst.msk [vmem:[#allocation4 + $0x10] sm:$0xff] %vm869_vm5, %v826_v12  ;;  %v828_v16 = vpop.permute.xlu1 %827  ;;  %3734 = vmatmul.mubr.msk.bf16.vlgmr.msra.gmra.mrb[0].mxu0 %vm1584_vm11, %v1533_v14  ;;  %v1448_v12 = vpack.c.bf16 %v1430_v10, %v1429_v1 }
  0xde   : > { %873 = vst.msk [vmem:[#allocation4 + $0x18] sm:$0xff] %vm869_vm5, %v828_v16  ;;  %1483 = vrot.lane.b32.xlu0 %v1056_v62, %s3852_s22 }
  0xdf   : > { %583 = vrot.lane.b32.xlu1 %v927_v57, %s3845_s30 }
  0xe0   : > { %v955_v19 = vpop.permute.xlu0 %954 }
  0xe1   : > { %1001 = vst.msk [vmem:[#allocation4 + $0x10] sm:$0xff] %vm998_vm6, %v955_v19  ;;  %v957_v20 = vpop.permute.xlu1 %956  ;;  %v787_v19 = vld [vmem:[#allocation2 + $0x180] sm:$0xff] }
  0xe2   : > { %1002 = vst.msk [vmem:[#allocation4 + $0x18] sm:$0xff] %vm998_vm6, %v957_v20  ;;  %1485 = vrot.lane.b32.xlu0 %v1444_v18, %s3852_s22  ;;  %v788_v20 = vld [vmem:[#allocation2 + $0x188] sm:$0xff] }
  0xe3   : > { %585 = vrot.lane.b32.xlu1 %v1315_v7, %s3845_s30 }
  0xe4   : > { %v1084_v21 = vpop.permute.xlu0 %1083 }
  0xe5   : > { %1130 = vst.msk [vmem:[#allocation4 + $0x10] sm:$0xff] %vm1127_vm7, %v1084_v21  ;;  %v1086_v4 = vpop.permute.xlu1 %1085 }
  0xe6   : > { %1131 = vst.msk [vmem:[#allocation4 + $0x18] sm:$0xff] %vm1127_vm7, %v1086_v4  ;;  %712 = vrot.lane.b32.xlu0 %v1056_v62, %s3846_s8  ;;  %v804_v4 = vpack.c.bf16 %v788_v20, %v787_v19 }
  0xe7   : > { %714 = vrot.lane.b32.xlu1 %v1444_v18, %s3846_s8 }
  0xe8   : > { %v1214_v22 = vpop.permute.xlu0 %1213 }
  0xe9   : > { %1260 = vst.msk [vmem:[#allocation4 + $0x10] sm:$0xff] %vm1257_vm8, %v1214_v22  ;;  %v1216_v25 = vpop.permute.xlu1 %1215 }
  0xea   : > { %1261 = vst.msk [vmem:[#allocation4 + $0x18] sm:$0xff] %vm1257_vm8, %v1216_v25  ;;  %841 = vrot.lane.b32.xlu0 %v4234_v34, %s3847_s9 }
  0xeb   : > { %843 = vrot.lane.b32.xlu1 %v4243_v40, %s3847_s9 }
  0xec   : > { %v1343_v27 = vpop.permute.xlu0 %1342 }
  0xed   : > { %1389 = vst.msk [vmem:[#allocation4 + $0x10] sm:$0xff] %vm1386_vm9, %v1343_v27  ;;  %v1345_v30 = vpop.permute.xlu1 %1344 }
  0xee   : > { %1390 = vst.msk [vmem:[#allocation4 + $0x18] sm:$0xff] %vm1386_vm9, %v1345_v30  ;;  %970 = vrot.lane.b32.xlu0 %v1315_v7, %s3848_s10 }
  0xef   : > { %972 = vrot.lane.b32.xlu1 %v929_v26, %s3848_s10 }
  0xf0   : > { %v1472_v32 = vpop.permute.xlu0 %1471 }
  0xf1   : > { %1518 = vst.msk [vmem:[#allocation4 + $0x10] sm:$0xff] %vm1515_vm10, %v1472_v32  ;;  %v572_v34 = vpop.permute.xlu1 %571 }
  0xf2   : > { %616 = vst.msk [vmem:[#allocation4 + $0x20] sm:$0xff] %vm611_vm3, %v572_v34  ;;  %1099 = vrot.lane.b32.xlu0 %v1444_v18, %s3849_s11  ;;  %v1175_v34 = vld [vmem:[#allocation2 + $0x198] sm:$0xff] }
  0xf3   : > { %1101 = vrot.lane.b32.xlu1 %v1058_v31, %s3849_s11 }
  0xf4   : > { %v1474_v33 = vpop.permute.xlu0 %1473 }
  0xf5   : > { %1519 = vst.msk [vmem:[#allocation4 + $0x18] sm:$0xff] %vm1515_vm10, %v1474_v33  ;;  %v574_v36 = vpop.permute.xlu1 %573  ;;  %v1176_v33 = vld [vmem:[#allocation2 + $0x1a0] sm:$0xff] }
  0xf6   : > { %617 = vst.msk [vmem:[#allocation4 + $0x28] sm:$0xff] %vm611_vm3, %v574_v36  ;;  %1229 = vrot.lane.b32.xlu0 %v4243_v40, %s3850_s14  ;;  %v1192_v35 = vpack.c.bf16 %v1176_v33, %v1175_v34  ;;  %v1304_v36 = vld [vmem:[#allocation2 + $0x199] sm:$0xff] }
  0xf7   : > { %1231 = vrot.lane.b32.xlu1 %v4258_v52, %s3850_s14 }
  0xf8   : > { %v701_v38 = vpop.permute.xlu0 %700  ;;  %v1534_v39 = vld [vmem:[#allocation4 + $0x10] sm:$0xff] }
  0xf9   : > { %745 = vst.msk [vmem:[#allocation4 + $0x20] sm:$0xff] %vm740_vm4, %v701_v38  ;;  %v703_v41 = vpop.permute.xlu1 %702  ;;  %3737 = vmatprep.mubr.msk.bf16.mxu0 %vm1584_vm11, %v1534_v39 }
  0xfa   : > { %746 = vst.msk [vmem:[#allocation4 + $0x28] sm:$0xff] %vm740_vm4, %v703_v41  ;;  %1358 = vrot.lane.b32.xlu0 %v929_v26, %s3851_s19 }
  0xfb   : > { %1360 = vrot.lane.b32.xlu1 %v1317_v37, %s3851_s19 }
  0xfc   : > { %v830_v40 = vpop.permute.xlu0 %829  ;;  %v1535_v44 = vld [vmem:[#allocation4 + $0x18] sm:$0xff] }
  0xfd   : > { %874 = vst.msk [vmem:[#allocation4 + $0x20] sm:$0xff] %vm869_vm5, %v830_v40  ;;  %v832_v45 = vpop.permute.xlu1 %831  ;;  %3738 = vmatmul.mubr.msk.bf16.gmra.mrb[4].mxu0 %vm1584_vm11, %v1535_v44  ;;  %v1434_v40 = vld [vmem:[#allocation2 + $0x1a2] sm:$0xff] }
  0xfe   : > { %875 = vst.msk [vmem:[#allocation4 + $0x28] sm:$0xff] %vm869_vm5, %v832_v45  ;;  %1487 = vrot.lane.b32.xlu0 %v1058_v31, %s3852_s22  ;;  %v1450_v45 = vpack.c.bf16 %v1434_v40, %v1433_v43 }
  0xff   : > { %587 = vrot.lane.b32.xlu1 %v929_v26, %s3845_s30  ;;  %v933_v26 = vpack.c.bf16 %v917_v24, %v916_v23 }
 0x100   : > { %v959_v47 = vpop.permute.xlu0 %958 }
 0x101   : > { %1003 = vst.msk [vmem:[#allocation4 + $0x20] sm:$0xff] %vm998_vm6, %v959_v47  ;;  %v961_v48 = vpop.permute.xlu1 %960  ;;  %v2060_v47 = vld [vmem:[#allocation3 + $0x9] sm:$0xff] }
 0x102   : > { %1004 = vst.msk [vmem:[#allocation4 + $0x28] sm:$0xff] %vm998_vm6, %v961_v48  ;;  %1489 = vrot.lane.b32.xlu0 %v1446_v46, %s3852_s22 }
 0x103   : > { %589 = vrot.lane.b32.xlu1 %v1317_v37, %s3845_s30 }
 0x104   : > { %v1088_v49 = vpop.permute.xlu0 %1087 }
 0x105   : > { %1132 = vst.msk [vmem:[#allocation4 + $0x20] sm:$0xff] %vm1127_vm7, %v1088_v49  ;;  %v1090_v50 = vpop.permute.xlu1 %1089 }
 0x106   : > { %1133 = vst.msk [vmem:[#allocation4 + $0x28] sm:$0xff] %vm1127_vm7, %v1090_v50  ;;  %716 = vrot.lane.b32.xlu0 %v1058_v31, %s3846_s8  ;;  %v1062_v31 = vpack.c.bf16 %v1046_v29, %v1045_v28 }
 0x107   : > { %718 = vrot.lane.b32.xlu1 %v1446_v46, %s3846_s8 }
 0x108   : > { %v1218_v51 = vpop.permute.xlu0 %1217 }
 0x109   : > { %1262 = vst.msk [vmem:[#allocation4 + $0x20] sm:$0xff] %vm1257_vm8, %v1218_v51  ;;  %v1220_v55 = vpop.permute.xlu1 %1219 }
 0x10a   : > { %1263 = vst.msk [vmem:[#allocation4 + $0x28] sm:$0xff] %vm1257_vm8, %v1220_v55  ;;  %845 = vrot.lane.b32.xlu0 %v4258_v52, %s3847_s9 }
 0x10b   : > { %847 = vrot.lane.b32.xlu1 %v4277_v0, %s3847_s9 }
 0x10c   : > { %v1347_v57 = vpop.permute.xlu0 %1346 }
 0x10d   : > { %1391 = vst.msk [vmem:[#allocation4 + $0x20] sm:$0xff] %vm1386_vm9, %v1347_v57  ;;  %v1349_v60 = vpop.permute.xlu1 %1348  ;;  %v2219_v57 = vpack.c.bf16 %v2188_v54, %v2187_v53  ;;  %v1996_v53 = vld [vmem:[#allocation3 + $0x8] sm:$0xff] }
 0x10e   : > { %1392 = vst.msk [vmem:[#allocation4 + $0x28] sm:$0xff] %vm1386_vm9, %v1349_v60  ;;  %974 = vrot.lane.b32.xlu0 %v1317_v37, %s3848_s10  ;;  %v1305_v37 = vld [vmem:[#allocation2 + $0x1a1] sm:$0xff] }
 0x10f   : > { %976 = vrot.lane.b32.xlu1 %v931_v56, %s3848_s10  ;;  %v1321_v39 = vpack.c.bf16 %v1305_v37, %v1304_v36 }
 0x110   : > { %v1476_v62 = vpop.permute.xlu0 %1475 }
 0x111   : > { %1520 = vst.msk [vmem:[#allocation4 + $0x20] sm:$0xff] %vm1515_vm10, %v1476_v62  ;;  %v576_v52 = vpop.permute.xlu1 %575 }
 0x112   : > { %618 = vst.msk [vmem:[#allocation4 + $0x30] sm:$0xff] %vm611_vm3, %v576_v52  ;;  %1103 = vrot.lane.b32.xlu0 %v1446_v46, %s3849_s11  ;;  %v2059_v46 = vld [vmem:[#allocation3 + $0x1] sm:$0xff] }
 0x113   : > { %1105 = vrot.lane.b32.xlu1 %v1060_v61, %s3849_s11  ;;  %v2091_v51 = vpack.c.bf16 %v2060_v47, %v2059_v46 }
 0x114   : > { %v1478_v13 = vpop.permute.xlu0 %1477 }
 0x115   : > { %1521 = vst.msk [vmem:[#allocation4 + $0x28] sm:$0xff] %vm1515_vm10, %v1478_v13  ;;  %v578_v3 = vpop.permute.xlu1 %577 }
 0x116   : > { %619 = vst.msk [vmem:[#allocation4 + $0x38] sm:$0xff] %vm611_vm3, %v578_v3  ;;  %1233 = vrot.lane.b32.xlu0 %v4277_v0, %s3850_s14 }
 0x117   : > { %1235 = vrot.lane.b32.xlu1 %v4292_v15, %s3850_s14 }
 0x118   : > { %v705_v6 = vpop.permute.xlu0 %704  ;;  %v1536_v7 = vld [vmem:[#allocation4 + $0x20] sm:$0xff] }
 0x119   : > { %747 = vst.msk [vmem:[#allocation4 + $0x30] sm:$0xff] %vm740_vm4, %v705_v6  ;;  %v707_v9 = vpop.permute.xlu1 %706  ;;  %3741 = vmatprep.mubr.msk.bf16.mxu0 %vm1584_vm11, %v1536_v7 }
 0x11a   : > { %748 = vst.msk [vmem:[#allocation4 + $0x38] sm:$0xff] %vm740_vm4, %v707_v9  ;;  %1362 = vrot.lane.b32.xlu0 %v931_v56, %s3851_s19 }
 0x11b   : > { %1364 = vrot.lane.b32.xlu1 %v1319_v5, %s3851_s19 }
 0x11c   : > { %v834_v0 = vpop.permute.xlu0 %833  ;;  %v1537_v11 = vld [vmem:[#allocation4 + $0x28] sm:$0xff] }
 0x11d   : > { %876 = vst.msk [vmem:[#allocation4 + $0x30] sm:$0xff] %vm869_vm5, %v834_v0  ;;  %v836_v17 = vpop.permute.xlu1 %835  ;;  %3742 = vmatmul.mubr.msk.bf16.gmra.mrb[8].mxu0 %vm1584_vm11, %v1537_v11 }
 0x11e   : > { %877 = vst.msk [vmem:[#allocation4 + $0x38] sm:$0xff] %vm869_vm5, %v836_v17  ;;  %1491 = vrot.lane.b32.xlu0 %v1060_v61, %s3852_s22 }
 0x11f   : > { %591 = vrot.lane.b32.xlu1 %v931_v56, %s3845_s30 }
 0x120   : > { %v963_v14 = vpop.permute.xlu0 %962 }
 0x121   : > { %1005 = vst.msk [vmem:[#allocation4 + $0x30] sm:$0xff] %vm998_vm6, %v963_v14  ;;  %v965_v16 = vpop.permute.xlu1 %964 }
 0x122   : > { %1006 = vst.msk [vmem:[#allocation4 + $0x38] sm:$0xff] %vm998_vm6, %v965_v16  ;;  %1493 = vrot.lane.b32.xlu0 %v1448_v12, %s3852_s22 }
 0x123   : > { %593 = vrot.lane.b32.xlu1 %v1319_v5, %s3845_s30 }
 0x124   : > { %v1092_v18 = vpop.permute.xlu0 %1091 }
 0x125   : > { %1134 = vst.msk [vmem:[#allocation4 + $0x30] sm:$0xff] %vm1127_vm7, %v1092_v18  ;;  %v1094_v21 = vpop.permute.xlu1 %1093 }
 0x126   : > { %1135 = vst.msk [vmem:[#allocation4 + $0x38] sm:$0xff] %vm1127_vm7, %v1094_v21  ;;  %720 = vrot.lane.b32.xlu0 %v1060_v61, %s3846_s8 }
 0x127   : > { %722 = vrot.lane.b32.xlu1 %v1448_v12, %s3846_s8 }
 0x128   : > { %v1222_v22 = vpop.permute.xlu0 %1221 }
 0x129   : > { %1264 = vst.msk [vmem:[#allocation4 + $0x30] sm:$0xff] %vm1257_vm8, %v1222_v22  ;;  %v1224_v25 = vpop.permute.xlu1 %1223 }
 0x12a   : > { %1265 = vst.msk [vmem:[#allocation4 + $0x38] sm:$0xff] %vm1257_vm8, %v1224_v25  ;;  %849 = vrot.lane.b32.xlu0 %v4292_v15, %s3847_s9 }
 0x12b   : > { %851 = vrot.lane.b32.xlu1 %v804_v4, %s3847_s9 }
 0x12c   : > { %v1351_v27 = vpop.permute.xlu0 %1350 }
 0x12d   : > { %1393 = vst.msk [vmem:[#allocation4 + $0x30] sm:$0xff] %vm1386_vm9, %v1351_v27  ;;  %v1353_v30 = vpop.permute.xlu1 %1352 }
 0x12e   : > { %1394 = vst.msk [vmem:[#allocation4 + $0x38] sm:$0xff] %vm1386_vm9, %v1353_v30  ;;  %978 = vrot.lane.b32.xlu0 %v1319_v5, %s3848_s10 }
 0x12f   : > { %980 = vrot.lane.b32.xlu1 %v933_v26, %s3848_s10 }
 0x130   : > { %v1480_v32 = vpop.permute.xlu0 %1479 }
 0x131   : > { %1522 = vst.msk [vmem:[#allocation4 + $0x30] sm:$0xff] %vm1515_vm10, %v1480_v32  ;;  %v580_v15 = vpop.permute.xlu1 %579 }
 0x132   : > { %620 = vst.msk [vmem:[#allocation4 + $0x40] sm:$0xff] %vm611_vm3, %v580_v15  ;;  %1107 = vrot.lane.b32.xlu0 %v1448_v12, %s3849_s11 }
 0x133   : > { %1109 = vrot.lane.b32.xlu1 %v1062_v31, %s3849_s11 }
 0x134   : > { %v1482_v8 = vpop.permute.xlu0 %1481 }
 0x135   : > { %1523 = vst.msk [vmem:[#allocation4 + $0x38] sm:$0xff] %vm1515_vm10, %v1482_v8  ;;  %v582_v38 = vpop.permute.xlu1 %581 }
 0x136   : > { %621 = vst.msk [vmem:[#allocation4 + $0x48] sm:$0xff] %vm611_vm3, %v582_v38  ;;  %1237 = vrot.lane.b32.xlu0 %v804_v4, %s3850_s14 }
 0x137   : > { %1239 = vrot.lane.b32.xlu1 %v1192_v35, %s3850_s14 }
 0x138   : > { %v709_v41 = vpop.permute.xlu0 %708  ;;  %v1538_v42 = vld [vmem:[#allocation4 + $0x30] sm:$0xff] }
 0x139   : > { %749 = vst.msk [vmem:[#allocation4 + $0x40] sm:$0xff] %vm740_vm4, %v709_v41  ;;  %v711_v44 = vpop.permute.xlu1 %710  ;;  %3745 = vmatprep.mubr.msk.bf16.mxu0 %vm1584_vm11, %v1538_v42 }
 0x13a   : > { %750 = vst.msk [vmem:[#allocation4 + $0x48] sm:$0xff] %vm740_vm4, %v711_v44  ;;  %1366 = vrot.lane.b32.xlu0 %v933_v26, %s3851_s19 }
 0x13b   : > { %1368 = vrot.lane.b32.xlu1 %v1321_v39, %s3851_s19 }
 0x13c   : > { %v838_v48 = vpop.permute.xlu0 %837  ;;  %v1539_v49 = vld [vmem:[#allocation4 + $0x38] sm:$0xff] }
 0x13d   : > { %878 = vst.msk [vmem:[#allocation4 + $0x40] sm:$0xff] %vm869_vm5, %v838_v48  ;;  %v840_v50 = vpop.permute.xlu1 %839  ;;  %3746 = vmatmul.mubr.msk.bf16.gmra.mrb[12].mxu0 %vm1584_vm11, %v1539_v49 }
 0x13e   : > { %879 = vst.msk [vmem:[#allocation4 + $0x48] sm:$0xff] %vm869_vm5, %v840_v50  ;;  %1495 = vrot.lane.b32.xlu0 %v1062_v31, %s3852_s22 }
 0x13f   : > { %1497 = vrot.lane.b32.xlu1 %v1450_v45, %s3852_s22 }
 0x140   : > { %v967_v55 = vpop.permute.xlu0 %966 }
 0x141   : > { %1007 = vst.msk [vmem:[#allocation4 + $0x40] sm:$0xff] %vm998_vm6, %v967_v55  ;;  %v969_v56 = vpop.permute.xlu1 %968 }
 0x142   : > { %1008 = vst.msk [vmem:[#allocation4 + $0x48] sm:$0xff] %vm998_vm6, %v969_v56  ;;  %2123 = vrot.lane.b32.xlu0 %v2091_v51, %s3845_s30  ;;  %v1995_v51 = vld [vmem:[#allocation3] sm:$0xff] }
 0x143   : > { %v2027_v55 = vpack.c.bf16 %v1996_v53, %v1995_v51 }
 0x144   : > { %v1096_v58 = vpop.permute.xlu0 %1095 }
 0x145   : > { %1136 = vst.msk [vmem:[#allocation4 + $0x40] sm:$0xff] %vm1127_vm7, %v1096_v58  ;;  %v1098_v59 = vpop.permute.xlu1 %1097 }
 0x146   : > { %1137 = vst.msk [vmem:[#allocation4 + $0x48] sm:$0xff] %vm1127_vm7, %v1098_v59  ;;  %2251 = vrot.lane.b32.xlu0 %v2219_v57, %s3846_s8  ;;  %v4548_v57 = vld [vmem:[%s5110_s2] ss:$0 sm:$0xff] }
 0x147   : > { %2043 = vst.msk [vmem:[#allocation5] sm:$0xff] %vm280_vm0, %v2027_v55  ;;  %v4554_v59 = vld [vmem:[%s5111_s3] ss:$0 sm:$0xff] }
 0x148   : > { %v1226_v60 = vpop.permute.xlu0 %1225 }
 0x149   : > { %1266 = vst.msk [vmem:[#allocation4 + $0x40] sm:$0xff] %vm1257_vm8, %v1226_v60  ;;  %v1228_v61 = vpop.permute.xlu1 %1227 }
 0x14a   : > { %1267 = vst.msk [vmem:[#allocation4 + $0x48] sm:$0xff] %vm1257_vm8, %v1228_v61 }
 0x14c   : > { %v1355_v62 = vpop.permute.xlu0 %1354 }
 0x14d   : > { %1395 = vst.msk [vmem:[#allocation4 + $0x40] sm:$0xff] %vm1386_vm9, %v1355_v62  ;;  %v1357_v52 = vpop.permute.xlu1 %1356 }
 0x14e   : > { %1396 = vst.msk [vmem:[#allocation4 + $0x48] sm:$0xff] %vm1386_vm9, %v1357_v52 }
 0x150   : > { %v1484_v13 = vpop.permute.xlu0 %1483 }
 0x151   : > { %1524 = vst.msk [vmem:[#allocation4 + $0x40] sm:$0xff] %vm1515_vm10, %v1484_v13  ;;  %v584_v63 = vpop.permute.xlu1 %583 }
 0x152   : > { %622 = vst.msk [vmem:[#allocation4 + $0x50] sm:$0xff] %vm611_vm3, %v584_v63 }
 0x154   : > { %v1486_v2 = vpop.permute.xlu0 %1485 }
 0x155   : > { %1525 = vst.msk [vmem:[#allocation4 + $0x48] sm:$0xff] %vm1515_vm10, %v1486_v2  ;;  %v586_v3 = vpop.permute.xlu1 %585 }
 0x156   : > { %623 = vst.msk [vmem:[#allocation4 + $0x58] sm:$0xff] %vm611_vm3, %v586_v3 }
 0x158   : > { %v713_v5 = vpop.permute.xlu0 %712  ;;  %v1540_v6 = vld [vmem:[#allocation4 + $0x40] sm:$0xff] }
 0x159   : > { %751 = vst.msk [vmem:[#allocation4 + $0x50] sm:$0xff] %vm740_vm4, %v713_v5  ;;  %v715_v7 = vpop.permute.xlu1 %714  ;;  %3749 = vmatprep.mubr.msk.bf16.mxu0 %vm1584_vm11, %v1540_v6 }
 0x15a   : > { %752 = vst.msk [vmem:[#allocation4 + $0x58] sm:$0xff] %vm740_vm4, %v715_v7 }
 0x15c   : > { %v842_v9 = vpop.permute.xlu0 %841  ;;  %v1541_v1 = vld [vmem:[#allocation4 + $0x48] sm:$0xff] }
 0x15d   : > { %880 = vst.msk [vmem:[#allocation4 + $0x50] sm:$0xff] %vm869_vm5, %v842_v9  ;;  %v844_v10 = vpop.permute.xlu1 %843  ;;  %3750 = vmatmul.mubr.msk.bf16.gmra.mrb[16].mxu0 %vm1584_vm11, %v1541_v1 }
 0x15e   : > { %881 = vst.msk [vmem:[#allocation4 + $0x58] sm:$0xff] %vm869_vm5, %v844_v10 }
 0x160   : > { %v971_v0 = vpop.permute.xlu0 %970 }
 0x161   : > { %1009 = vst.msk [vmem:[#allocation4 + $0x50] sm:$0xff] %vm998_vm6, %v971_v0  ;;  %v973_v11 = vpop.permute.xlu1 %972 }
 0x162   : > { %1010 = vst.msk [vmem:[#allocation4 + $0x58] sm:$0xff] %vm998_vm6, %v973_v11 }
 0x164   : > { %v1100_v17 = vpop.permute.xlu0 %1099 }
 0x165   : > { %1138 = vst.msk [vmem:[#allocation4 + $0x50] sm:$0xff] %vm1127_vm7, %v1100_v17  ;;  %v1102_v12 = vpop.permute.xlu1 %1101 }
 0x166   : > { %1139 = vst.msk [vmem:[#allocation4 + $0x58] sm:$0xff] %vm1127_vm7, %v1102_v12 }
 0x168   : > { %v1230_v14 = vpop.permute.xlu0 %1229 }
 0x169   : > { %1268 = vst.msk [vmem:[#allocation4 + $0x50] sm:$0xff] %vm1257_vm8, %v1230_v14  ;;  %v1232_v16 = vpop.permute.xlu1 %1231 }
 0x16a   : > { %1269 = vst.msk [vmem:[#allocation4 + $0x58] sm:$0xff] %vm1257_vm8, %v1232_v16 }
 0x16c   : > { %v1359_v18 = vpop.permute.xlu0 %1358 }
 0x16d   : > { %1397 = vst.msk [vmem:[#allocation4 + $0x50] sm:$0xff] %vm1386_vm9, %v1359_v18  ;;  %v1361_v19 = vpop.permute.xlu1 %1360 }
 0x16e   : > { %1398 = vst.msk [vmem:[#allocation4 + $0x58] sm:$0xff] %vm1386_vm9, %v1361_v19 }
 0x170   : > { %v1488_v20 = vpop.permute.xlu0 %1487 }
 0x171   : > { %1526 = vst.msk [vmem:[#allocation4 + $0x50] sm:$0xff] %vm1515_vm10, %v1488_v20  ;;  %v588_v21 = vpop.permute.xlu1 %587 }
 0x172   : > { %624 = vst.msk [vmem:[#allocation4 + $0x60] sm:$0xff] %vm611_vm3, %v588_v21 }
 0x174   : > { %v1490_v4 = vpop.permute.xlu0 %1489 }
 0x175   : > { %1527 = vst.msk [vmem:[#allocation4 + $0x58] sm:$0xff] %vm1515_vm10, %v1490_v4  ;;  %v590_v22 = vpop.permute.xlu1 %589 }
 0x176   : > { %625 = vst.msk [vmem:[#allocation4 + $0x68] sm:$0xff] %vm611_vm3, %v590_v22 }
 0x178   : > { %v717_v23 = vpop.permute.xlu0 %716  ;;  %v1542_v24 = vld [vmem:[#allocation4 + $0x50] sm:$0xff] }
 0x179   : > { %753 = vst.msk [vmem:[#allocation4 + $0x60] sm:$0xff] %vm740_vm4, %v717_v23  ;;  %v719_v25 = vpop.permute.xlu1 %718  ;;  %3753 = vmatprep.mubr.msk.bf16.mxu0 %vm1584_vm11, %v1542_v24 }
 0x17a   : > { %754 = vst.msk [vmem:[#allocation4 + $0x68] sm:$0xff] %vm740_vm4, %v719_v25 }
 0x17c   : > { %v846_v26 = vpop.permute.xlu0 %845  ;;  %v1543_v27 = vld [vmem:[#allocation4 + $0x58] sm:$0xff] }
 0x17d   : > { %882 = vst.msk [vmem:[#allocation4 + $0x60] sm:$0xff] %vm869_vm5, %v846_v26  ;;  %v848_v28 = vpop.permute.xlu1 %847  ;;  %3754 = vmatmul.mubr.msk.bf16.gmra.mrb[20].mxu0 %vm1584_vm11, %v1543_v27 }
 0x17e   : > { %883 = vst.msk [vmem:[#allocation4 + $0x68] sm:$0xff] %vm869_vm5, %v848_v28 }
 0x180   : > { %v975_v29 = vpop.permute.xlu0 %974 }
 0x181   : > { %1011 = vst.msk [vmem:[#allocation4 + $0x60] sm:$0xff] %vm998_vm6, %v975_v29  ;;  %v977_v30 = vpop.permute.xlu1 %976 }
 0x182   : > { %1012 = vst.msk [vmem:[#allocation4 + $0x68] sm:$0xff] %vm998_vm6, %v977_v30 }
 0x184   : > { %v1104_v31 = vpop.permute.xlu0 %1103 }
 0x185   : > { %1140 = vst.msk [vmem:[#allocation4 + $0x60] sm:$0xff] %vm1127_vm7, %v1104_v31  ;;  %v1106_v32 = vpop.permute.xlu1 %1105 }
 0x186   : > { %1141 = vst.msk [vmem:[#allocation4 + $0x68] sm:$0xff] %vm1127_vm7, %v1106_v32 }
 0x188   : > { %v1234_v34 = vpop.permute.xlu0 %1233 }
 0x189   : > { %1270 = vst.msk [vmem:[#allocation4 + $0x60] sm:$0xff] %vm1257_vm8, %v1234_v34  ;;  %v1236_v33 = vpop.permute.xlu1 %1235 }
 0x18a   : > { %1271 = vst.msk [vmem:[#allocation4 + $0x68] sm:$0xff] %vm1257_vm8, %v1236_v33 }
 0x18c   : > { %v1363_v15 = vpop.permute.xlu0 %1362 }
 0x18d   : > { %1399 = vst.msk [vmem:[#allocation4 + $0x60] sm:$0xff] %vm1386_vm9, %v1363_v15  ;;  %v1365_v35 = vpop.permute.xlu1 %1364 }
 0x18e   : > { %1400 = vst.msk [vmem:[#allocation4 + $0x68] sm:$0xff] %vm1386_vm9, %v1365_v35 }
 0x190   : > { %v1492_v8 = vpop.permute.xlu0 %1491 }
 0x191   : > { %1528 = vst.msk [vmem:[#allocation4 + $0x60] sm:$0xff] %vm1515_vm10, %v1492_v8  ;;  %v592_v36 = vpop.permute.xlu1 %591 }
 0x192   : > { %626 = vst.msk [vmem:[#allocation4 + $0x70] sm:$0xff] %vm611_vm3, %v592_v36 }
 0x194   : > { %v1494_v37 = vpop.permute.xlu0 %1493 }
 0x195   : > { %1529 = vst.msk [vmem:[#allocation4 + $0x68] sm:$0xff] %vm1515_vm10, %v1494_v37  ;;  %v594_v38 = vpop.permute.xlu1 %593 }
 0x196   : > { %627 = vst.msk [vmem:[#allocation4 + $0x78] sm:$0xff] %vm611_vm3, %v594_v38 }
 0x198   : > { %v721_v39 = vpop.permute.xlu0 %720  ;;  %v1544_v41 = vld [vmem:[#allocation4 + $0x60] sm:$0xff] }
 0x199   : > { %755 = vst.msk [vmem:[#allocation4 + $0x70] sm:$0xff] %vm740_vm4, %v721_v39  ;;  %v723_v42 = vpop.permute.xlu1 %722  ;;  %3757 = vmatprep.mubr.msk.bf16.mxu0 %vm1584_vm11, %v1544_v41 }
 0x19a   : > { %756 = vst.msk [vmem:[#allocation4 + $0x78] sm:$0xff] %vm740_vm4, %v723_v42 }
 0x19c   : > { %v850_v43 = vpop.permute.xlu0 %849  ;;  %v1545_v40 = vld [vmem:[#allocation4 + $0x68] sm:$0xff] }
 0x19d   : > { %884 = vst.msk [vmem:[#allocation4 + $0x70] sm:$0xff] %vm869_vm5, %v850_v43  ;;  %v852_v44 = vpop.permute.xlu1 %851  ;;  %3758 = vmatmul.mubr.msk.bf16.gmra.mrb[24].mxu0 %vm1584_vm11, %v1545_v40 }
 0x19e   : > { %885 = vst.msk [vmem:[#allocation4 + $0x78] sm:$0xff] %vm869_vm5, %v852_v44 }
 0x1a0   : > { %v979_v45 = vpop.permute.xlu0 %978 }
 0x1a1   : > { %1013 = vst.msk [vmem:[#allocation4 + $0x70] sm:$0xff] %vm998_vm6, %v979_v45  ;;  %v981_v46 = vpop.permute.xlu1 %980 }
 0x1a2   : > { %1014 = vst.msk [vmem:[#allocation4 + $0x78] sm:$0xff] %vm998_vm6, %v981_v46 }
 0x1a4   : > { %v1108_v47 = vpop.permute.xlu0 %1107 }
 0x1a5   : > { %1142 = vst.msk [vmem:[#allocation4 + $0x70] sm:$0xff] %vm1127_vm7, %v1108_v47  ;;  %v1110_v48 = vpop.permute.xlu1 %1109 }
 0x1a6   : > { %1143 = vst.msk [vmem:[#allocation4 + $0x78] sm:$0xff] %vm1127_vm7, %v1110_v48 }
 0x1a8   : > { %v1238_v49 = vpop.permute.xlu0 %1237 }
 0x1a9   : > { %1272 = vst.msk [vmem:[#allocation4 + $0x70] sm:$0xff] %vm1257_vm8, %v1238_v49  ;;  %v1240_v50 = vpop.permute.xlu1 %1239 }
 0x1aa   : > { %1273 = vst.msk [vmem:[#allocation4 + $0x78] sm:$0xff] %vm1257_vm8, %v1240_v50  ;;  %v3831_v50 = vld [vmem:[%s5112_s4] sm:$0xff]  }
 0x1ab   : > { %3765 = vmatprep.subr.bf16.mxu1 %v3831_v50 }
 0x1ac   : > { %v1367_v54 = vpop.permute.xlu0 %1366  ;;  %3766 = vmatpush3.bf16.msra.mxu1 %v3831_v50 }
 0x1ad   : > { %1401 = vst.msk [vmem:[#allocation4 + $0x70] sm:$0xff] %vm1386_vm9, %v1367_v54  ;;  %v1369_v56 = vpop.permute.xlu1 %1368 }
 0x1ae   : > { %1402 = vst.msk [vmem:[#allocation4 + $0x78] sm:$0xff] %vm1386_vm9, %v1369_v56 }
 0x1b0   : > { %v1496_v58 = vpop.permute.xlu0 %1495  ;;  %v3735_v60 = vpop.f32.mrb[0].mxu0 }
 0x1b1   : > { %1530 = vst.msk [vmem:[#allocation4 + $0x70] sm:$0xff] %vm1515_vm10, %v1496_v58  ;;  %v1806_v61 = vmul.f32 %v3735_v60, %v4548_v57  ;;  %v1498_v62 = vpop.permute.xlu1 %1497  ;;  %v1671_v52 = vpop.f32.mrb[1].mxu0  ;;  %v3832_v60 = vld [vmem:[%s5112_s4 + $0x8] sm:$0xff]  }
 0x1b2   : > { %1531 = vst.msk [vmem:[#allocation4 + $0x78] sm:$0xff] %vm1515_vm10, %v1498_v62  ;;  %v1804_v13 = vmul.f32 %v4548_v57, %v1671_v52  ;;  %v3736_v63 = vpop.f32.mrb[2].mxu0  ;;  %3767 = vmatprep.subr.bf16.mxu1 %v3832_v60 }
 0x1b3   : > { %v1844_v2 = vadd.f32 %v4554_v59, %v1806_v61  ;;  %v1807_v3 = vmul.f32 %v3736_v63, %v4548_v57  ;;  %v1674_v5 = vpop.f32.mrb[3].mxu0  ;;  %3768 = vmatpush3.bf16.msra.mxu1 %v3832_v60 }
 0x1b4   : > { %v1842_v6 = vadd.f32 %v4554_v59, %v1804_v13  ;;  %v1805_v7 = vmul.f32 %v4548_v57, %v1674_v5  ;;  %v2124_v9 = vpop.permute.xlu0 %2123  ;;  %v3834_v5 = vld [vmem:[%s5112_s4 + $0x18] sm:$0xff]  }
 0x1b5   : > { %v1876_v1 = vmax.f32 %v1844_v2, 0.0  ;;  %v1845_v10 = vadd.f32 %v4554_v59, %v1807_v3  ;;  %2171 = vst.msk [vmem:[#allocation5] sm:$0xff] %vm611_vm3, %v2124_v9  ;;  %v3833_v2 = vld [vmem:[%s5112_s4 + $0x10] sm:$0xff]   ;;  %v3835_v9 = vld [vmem:[%s5112_s4 + $0x20] ss:$0 sps:$4 sm:$0xff]  }
 0x1b6   : > { %v1874_v0 = vmax.f32 %v1842_v6, 0.0  ;;  %v1843_v11 = vadd.f32 %v4554_v59, %v1805_v7  ;;  %3769 = vmatprep.subr.bf16.mxu1 %v3833_v2 }
 0x1b7   : > { %1963 = vst.msk [vmem:[#allocation3 + $0x31] sm:$0xff] %vm280_vm0, %v1876_v1  ;;  %v1877_v17 = vmax.f32 %v1845_v10, 0.0  ;;  %3770 = vmatpush3.bf16.msra.mxu1 %v3833_v2  ;;  %v3185_v10 = vsel %vm1633_vm2, %v3835_v9, 0 }
 0x1b8   : > { %1961 = vst.msk [vmem:[#allocation3 + $0x19] sm:$0xff] %vm280_vm0, %v1874_v0  ;;  %v1875_v12 = vmax.f32 %v1843_v11, 0.0  ;;  %v1546_v14 = vld [vmem:[#allocation4 + $0x70] sm:$0xff]  ;;  %v2252_v16 = vpop.permute.xlu0 %2251  ;;  %3771 = vmatprep.subr.bf16.mxu1 %v3834_v5 }
 0x1b9   : > { %1964 = vst.msk [vmem:[#allocation3 + $0x39] sm:$0xff] %vm280_vm0, %v1877_v17  ;;  %3761 = vmatprep.mubr.msk.bf16.mxu0 %vm1584_vm11, %v1546_v14  ;;  %v1547_v18 = vld [vmem:[#allocation4 + $0x78] sm:$0xff] }
 0x1ba   : > { %2299 = vst.msk [vmem:[#allocation5] sm:$0xff] %vm740_vm4, %v2252_v16  ;;  %3762 = vmatmul.mubr.msk.bf16.gmra.mrb[28].mxu0 %vm1584_vm11, %v1547_v18 }
 0x1bb   : > { %1962 = vst.msk [vmem:[#allocation3 + $0x21] sm:$0xff] %vm280_vm0, %v1875_v12  ;;  %3772 = vmatpush3.bf16.msra.mxu1 %v3834_v5 }
 0x1bc   : > { %3808 = vmatprep.subr.msk.bf16.mxu1 %vm1633_vm2, %v3835_v9 }
 0x1be   : > { %v2700_v19 = vld [vmem:[#allocation3 + $0x30] sm:$0xff] }
 0x1bf   : > { %v2315_v4 = vld [vmem:[#allocation3 + $0x18] sm:$0xff]  ;;  %3774 = vmatpush3.bf16.msra.mxu1 %v3185_v10 }
 0x1c0   : > { %v2701_v20 = vld [vmem:[#allocation3 + $0x38] sm:$0xff] }
 0x1c1   : > { %v2732_v21 = vpack.c.bf16 %v2701_v20, %v2700_v19  ;;  %v2829_v23 = vld [vmem:[#allocation3 + $0x39] sm:$0xff]  ;;  %v2828_v25 = vld [vmem:[#allocation3 + $0x31] sm:$0xff] }
 0x1c2   : > { %v2316_v22 = vld [vmem:[#allocation3 + $0x20] sm:$0xff]  ;;  %v2860_v26 = vpack.c.bf16 %v2829_v23, %v2828_v25  ;;  %v2956_v27 = vld [vmem:[#allocation3 + $0x32] sm:$0xff] }
 0x1c3   : > { %v2347_v24 = vpack.c.bf16 %v2316_v22, %v2315_v4  ;;  %2764 = vrot.lane.b32.xlu0 %v2732_v21, %s3850_s14  ;;  %2381 = vrot.lane.b32.xlu1 %v2732_v21, %s3847_s9  ;;  %2045 = vst.msk [vmem:[#allocation5 + $0x10] sm:$0xff] %vm280_vm0, %v2732_v21  ;;  %v2957_v28 = vld [vmem:[#allocation3 + $0x3a] sm:$0xff]  ;;  %v2190_v37 = vld [vmem:[#allocation3 + $0x22] sm:$0xff] }
 0x1c4   : > { %v2988_v29 = vpack.c.bf16 %v2957_v28, %v2956_v27  ;;  %v2062_v30 = vld [vmem:[#allocation3 + $0x21] sm:$0xff]  ;;  %v2061_v32 = vld [vmem:[#allocation3 + $0x19] sm:$0xff] }
 0x1c5   : > { %2044 = vst.msk [vmem:[#allocation5 + $0x8] sm:$0xff] %vm280_vm0, %v2347_v24  ;;  %v2092_v15 = vpack.c.bf16 %v2062_v30, %v2061_v32  ;;  %v2189_v36 = vld [vmem:[#allocation3 + $0x1a] sm:$0xff] }
 0x1c6   : > { %v2220_v45 = vpack.c.bf16 %v2190_v37, %v2189_v36 }
 0x1c7   : > { %2892 = vrot.lane.b32.xlu0 %v2860_v26, %s3851_s19  ;;  %2509 = vrot.lane.b32.xlu1 %v2860_v26, %s3848_s10 }
 0x1cb   : > { %3020 = vrot.lane.b32.xlu0 %v2988_v29, %s3852_s22  ;;  %2637 = vrot.lane.b32.xlu1 %v2988_v29, %s3849_s11 }
 0x1cf   : > { %2255 = vrot.lane.b32.xlu0 %v2988_v29, %s3846_s8  ;;  %2127 = vrot.lane.b32.xlu1 %v2860_v26, %s3845_s30 }
 0x1d0   : > { %v3739_v31 = vpop.f32.mrb[4].mxu0 }
 0x1d1   : > { %v1810_v34 = vmul.f32 %v3739_v31, %v4548_v57  ;;  %v1687_v33 = vpop.f32.mrb[5].mxu0 }
 0x1d2   : > { %v1808_v35 = vmul.f32 %v4548_v57, %v1687_v33  ;;  %v3740_v8 = vpop.f32.mrb[6].mxu0 }
 0x1d3   : > { %v1848_v38 = vadd.f32 %v4554_v59, %v1810_v34  ;;  %v1811_v39 = vmul.f32 %v3740_v8, %v4548_v57  ;;  %2379 = vrot.lane.b32.xlu0 %v2347_v24, %s3847_s9  ;;  %2125 = vrot.lane.b32.xlu1 %v2092_v15, %s3845_s30  ;;  %v1690_v41 = vpop.f32.mrb[7].mxu0 }
 0x1d4   : > { %v1846_v42 = vadd.f32 %v4554_v59, %v1808_v35  ;;  %v1809_v43 = vmul.f32 %v4548_v57, %v1690_v41 }
 0x1d5   : > { %v1880_v40 = vmax.f32 %v1848_v38, 0.0  ;;  %v1849_v44 = vadd.f32 %v4554_v59, %v1811_v39 }
 0x1d6   : > { %v1878_v46 = vmax.f32 %v1846_v42, 0.0  ;;  %v1847_v47 = vadd.f32 %v4554_v59, %v1809_v43 }
 0x1d7   : > { %1967 = vst.msk [vmem:[#allocation3 + $0x61] sm:$0xff] %vm280_vm0, %v1880_v40  ;;  %v1881_v48 = vmax.f32 %v1849_v44, 0.0  ;;  %2507 = vrot.lane.b32.xlu0 %v2092_v15, %s3848_s10  ;;  %2253 = vrot.lane.b32.xlu1 %v2220_v45, %s3846_s8 }
 0x1d8   : > { %1965 = vst.msk [vmem:[#allocation3 + $0x49] sm:$0xff] %vm280_vm0, %v1878_v46  ;;  %v1879_v49 = vmax.f32 %v1847_v47, 0.0 }
 0x1d9   : > { %1968 = vst.msk [vmem:[#allocation3 + $0x69] sm:$0xff] %vm280_vm0, %v1881_v48 }
 0x1da   : > { %1966 = vst.msk [vmem:[#allocation3 + $0x51] sm:$0xff] %vm280_vm0, %v1879_v49 }
 0x1db   : > { %2635 = vrot.lane.b32.xlu0 %v2220_v45, %s3849_s11 }
 0x1de   : > { %v2704_v51 = vld [vmem:[#allocation3 + $0x60] sm:$0xff] }
 0x1df   : > { %v2702_v55 = vld [vmem:[#allocation3 + $0x48] sm:$0xff] }
 0x1e0   : > { %v2705_v53 = vld [vmem:[#allocation3 + $0x68] sm:$0xff] }
 0x1e1   : > { %v2734_v54 = vpack.c.bf16 %v2705_v53, %v2704_v51  ;;  %v2833_v56 = vld [vmem:[#allocation3 + $0x69] sm:$0xff]  ;;  %v2832_v62 = vld [vmem:[#allocation3 + $0x61] sm:$0xff]  ;;  %v2959_v7 = vld [vmem:[#allocation3 + $0x52] sm:$0xff] }
 0x1e2   : > { %v2703_v58 = vld [vmem:[#allocation3 + $0x50] sm:$0xff]  ;;  %v2862_v52 = vpack.c.bf16 %v2833_v56, %v2832_v62  ;;  %v2960_v13 = vld [vmem:[#allocation3 + $0x62] sm:$0xff] }
 0x1e3   : > { %2768 = vrot.lane.b32.xlu0 %v2734_v54, %s3850_s14  ;;  %2385 = vrot.lane.b32.xlu1 %v2734_v54, %s3847_s9  ;;  %v2733_v61 = vpack.c.bf16 %v2703_v58, %v2702_v55  ;;  %2047 = vst.msk [vmem:[#allocation5 + $0x20] sm:$0xff] %vm280_vm0, %v2734_v54  ;;  %v2961_v63 = vld [vmem:[#allocation3 + $0x6a] sm:$0xff] }
 0x1e4   : > { %v2990_v3 = vpack.c.bf16 %v2961_v63, %v2960_v13  ;;  %v2958_v6 = vld [vmem:[#allocation3 + $0x4a] sm:$0xff] }
 0x1e5   : > { %2046 = vst.msk [vmem:[#allocation5 + $0x18] sm:$0xff] %vm280_vm0, %v2733_v61  ;;  %v2989_v17 = vpack.c.bf16 %v2959_v7, %v2958_v6  ;;  %v2831_v16 = vld [vmem:[#allocation3 + $0x51] sm:$0xff]  ;;  %v2830_v22 = vld [vmem:[#allocation3 + $0x49] sm:$0xff] }
 0x1e6   : > { %v2861_v25 = vpack.c.bf16 %v2831_v16, %v2830_v22 }
 0x1e7   : > { %2896 = vrot.lane.b32.xlu0 %v2862_v52, %s3851_s19  ;;  %2513 = vrot.lane.b32.xlu1 %v2862_v52, %s3848_s10 }
 0x1eb   : > { %3024 = vrot.lane.b32.xlu0 %v2990_v3, %s3852_s22  ;;  %2641 = vrot.lane.b32.xlu1 %v2990_v3, %s3849_s11 }
 0x1ef   : > { %2259 = vrot.lane.b32.xlu0 %v2990_v3, %s3846_s8  ;;  %2131 = vrot.lane.b32.xlu1 %v2862_v52, %s3845_s30 }
 0x1f0   : > { %v3743_v1 = vpop.f32.mrb[8].mxu0 }
 0x1f1   : > { %v1814_v0 = vmul.f32 %v3743_v1, %v4548_v57  ;;  %v1703_v11 = vpop.f32.mrb[9].mxu0 }
 0x1f2   : > { %v1812_v12 = vmul.f32 %v4548_v57, %v1703_v11  ;;  %v3744_v14 = vpop.f32.mrb[10].mxu0 }
 0x1f3   : > { %v1852_v18 = vadd.f32 %v4554_v59, %v1814_v0  ;;  %v1815_v19 = vmul.f32 %v3744_v14, %v4548_v57  ;;  %3022 = vrot.lane.b32.xlu0 %v2989_v17, %s3852_s22  ;;  %2766 = vrot.lane.b32.xlu1 %v2733_v61, %s3850_s14  ;;  %v1706_v20 = vpop.f32.mrb[11].mxu0 }
 0x1f4   : > { %v1850_v21 = vadd.f32 %v4554_v59, %v1812_v12  ;;  %v1813_v4 = vmul.f32 %v4548_v57, %v1706_v20 }
 0x1f5   : > { %v1884_v23 = vmax.f32 %v1852_v18, 0.0  ;;  %v1853_v24 = vadd.f32 %v4554_v59, %v1815_v19 }
 0x1f6   : > { %v1882_v26 = vmax.f32 %v1850_v21, 0.0  ;;  %v1851_v27 = vadd.f32 %v4554_v59, %v1813_v4 }
 0x1f7   : > { %1971 = vst.msk [vmem:[#allocation3 + $0x91] sm:$0xff] %vm280_vm0, %v1884_v23  ;;  %v1885_v28 = vmax.f32 %v1853_v24, 0.0  ;;  %2894 = vrot.lane.b32.xlu1 %v2861_v25, %s3851_s19  ;;  %2383 = vrot.lane.b32.xlu0 %v2733_v61, %s3847_s9 }
 0x1f8   : > { %1969 = vst.msk [vmem:[#allocation3 + $0x79] sm:$0xff] %vm280_vm0, %v1882_v26  ;;  %v1883_v29 = vmax.f32 %v1851_v27, 0.0 }
 0x1f9   : > { %1972 = vst.msk [vmem:[#allocation3 + $0x99] sm:$0xff] %vm280_vm0, %v1885_v28 }
 0x1fa   : > { %1970 = vst.msk [vmem:[#allocation3 + $0x81] sm:$0xff] %vm280_vm0, %v1883_v29 }
 0x1fb   : > { %2511 = vrot.lane.b32.xlu0 %v2861_v25, %s3848_s10  ;;  %2129 = vrot.lane.b32.xlu1 %v2861_v25, %s3845_s30 }
 0x1fe   : > { %v2708_v30 = vld [vmem:[#allocation3 + $0x90] sm:$0xff] }
 0x1ff   : > { %2639 = vrot.lane.b32.xlu0 %v2989_v17, %s3849_s11  ;;  %2257 = vrot.lane.b32.xlu1 %v2989_v17, %s3846_s8  ;;  %v2706_v33 = vld [vmem:[#allocation3 + $0x78] sm:$0xff] }
 0x200   : > { %v2709_v31 = vld [vmem:[#allocation3 + $0x98] sm:$0xff] }
 0x201   : > { %v2736_v32 = vpack.c.bf16 %v2709_v31, %v2708_v30  ;;  %v2837_v34 = vld [vmem:[#allocation3 + $0x99] sm:$0xff]  ;;  %v2836_v8 = vld [vmem:[#allocation3 + $0x91] sm:$0xff]  ;;  %v2963_v42 = vld [vmem:[#allocation3 + $0x82] sm:$0xff] }
 0x202   : > { %v2707_v15 = vld [vmem:[#allocation3 + $0x80] sm:$0xff]  ;;  %v2864_v36 = vpack.c.bf16 %v2837_v34, %v2836_v8  ;;  %v2964_v37 = vld [vmem:[#allocation3 + $0x92] sm:$0xff] }
 0x203   : > { %2772 = vrot.lane.b32.xlu0 %v2736_v32, %s3850_s14  ;;  %2389 = vrot.lane.b32.xlu1 %v2736_v32, %s3847_s9  ;;  %v2735_v35 = vpack.c.bf16 %v2707_v15, %v2706_v33  ;;  %2049 = vst.msk [vmem:[#allocation5 + $0x30] sm:$0xff] %vm280_vm0, %v2736_v32  ;;  %v2965_v38 = vld [vmem:[#allocation3 + $0x9a] sm:$0xff] }
 0x204   : > { %v2992_v39 = vpack.c.bf16 %v2965_v38, %v2964_v37  ;;  %v2962_v41 = vld [vmem:[#allocation3 + $0x7a] sm:$0xff] }
 0x205   : > { %2048 = vst.msk [vmem:[#allocation5 + $0x28] sm:$0xff] %vm280_vm0, %v2735_v35  ;;  %v2991_v45 = vpack.c.bf16 %v2963_v42, %v2962_v41  ;;  %v2835_v48 = vld [vmem:[#allocation3 + $0x81] sm:$0xff]  ;;  %v2834_v55 = vld [vmem:[#allocation3 + $0x79] sm:$0xff] }
 0x206   : > { %v2863_v60 = vpack.c.bf16 %v2835_v48, %v2834_v55 }
 0x207   : > { %2900 = vrot.lane.b32.xlu0 %v2864_v36, %s3851_s19  ;;  %2517 = vrot.lane.b32.xlu1 %v2864_v36, %s3848_s10 }
 0x20b   : > { %3028 = vrot.lane.b32.xlu0 %v2992_v39, %s3852_s22  ;;  %2645 = vrot.lane.b32.xlu1 %v2992_v39, %s3849_s11 }
 0x20f   : > { %2263 = vrot.lane.b32.xlu0 %v2992_v39, %s3846_s8  ;;  %2135 = vrot.lane.b32.xlu1 %v2864_v36, %s3845_s30 }
 0x210   : > { %v3747_v43 = vpop.f32.mrb[12].mxu0 }
 0x211   : > { %v1818_v40 = vmul.f32 %v3747_v43, %v4548_v57  ;;  %v1719_v44 = vpop.f32.mrb[13].mxu0 }
 0x212   : > { %v1816_v46 = vmul.f32 %v4548_v57, %v1719_v44  ;;  %v3748_v47 = vpop.f32.mrb[14].mxu0 }
 0x213   : > { %v1856_v49 = vadd.f32 %v4554_v59, %v1818_v40  ;;  %v1819_v50 = vmul.f32 %v3748_v47, %v4548_v57  ;;  %3026 = vrot.lane.b32.xlu0 %v2991_v45, %s3852_s22  ;;  %2770 = vrot.lane.b32.xlu1 %v2735_v35, %s3850_s14  ;;  %v1722_v51 = vpop.f32.mrb[15].mxu0 }
 0x214   : > { %v1854_v53 = vadd.f32 %v4554_v59, %v1816_v46  ;;  %v1817_v54 = vmul.f32 %v4548_v57, %v1722_v51 }
 0x215   : > { %v1888_v56 = vmax.f32 %v1856_v49, 0.0  ;;  %v1857_v58 = vadd.f32 %v4554_v59, %v1819_v50 }
 0x216   : > { %v1886_v61 = vmax.f32 %v1854_v53, 0.0  ;;  %v1855_v62 = vadd.f32 %v4554_v59, %v1817_v54 }
 0x217   : > { %1975 = vst.msk [vmem:[#allocation3 + $0xc1] sm:$0xff] %vm280_vm0, %v1888_v56  ;;  %v1889_v52 = vmax.f32 %v1857_v58, 0.0  ;;  %2898 = vrot.lane.b32.xlu1 %v2863_v60, %s3851_s19  ;;  %2387 = vrot.lane.b32.xlu0 %v2735_v35, %s3847_s9 }
 0x218   : > { %1973 = vst.msk [vmem:[#allocation3 + $0xa9] sm:$0xff] %vm280_vm0, %v1886_v61  ;;  %v1887_v13 = vmax.f32 %v1855_v62, 0.0 }
 0x219   : > { %1976 = vst.msk [vmem:[#allocation3 + $0xc9] sm:$0xff] %vm280_vm0, %v1889_v52 }
 0x21a   : > { %1974 = vst.msk [vmem:[#allocation3 + $0xb1] sm:$0xff] %vm280_vm0, %v1887_v13 }
 0x21b   : > { %2515 = vrot.lane.b32.xlu0 %v2863_v60, %s3848_s10  ;;  %2133 = vrot.lane.b32.xlu1 %v2863_v60, %s3845_s30 }
 0x21e   : > { %v2712_v63 = vld [vmem:[#allocation3 + $0xc0] sm:$0xff] }
 0x21f   : > { %2643 = vrot.lane.b32.xlu0 %v2991_v45, %s3849_s11  ;;  %2261 = vrot.lane.b32.xlu1 %v2991_v45, %s3846_s8  ;;  %v2710_v6 = vld [vmem:[#allocation3 + $0xa8] sm:$0xff] }
 0x220   : > { %v2713_v2 = vld [vmem:[#allocation3 + $0xc8] sm:$0xff] }
 0x221   : > { %v2738_v3 = vpack.c.bf16 %v2713_v2, %v2712_v63  ;;  %v2841_v5 = vld [vmem:[#allocation3 + $0xc9] sm:$0xff]  ;;  %v2840_v1 = vld [vmem:[#allocation3 + $0xc1] sm:$0xff]  ;;  %v2967_v14 = vld [vmem:[#allocation3 + $0xb2] sm:$0xff] }
 0x222   : > { %v2711_v7 = vld [vmem:[#allocation3 + $0xb0] sm:$0xff]  ;;  %v2866_v10 = vpack.c.bf16 %v2841_v5, %v2840_v1  ;;  %v2968_v0 = vld [vmem:[#allocation3 + $0xc2] sm:$0xff] }
 0x223   : > { %2776 = vrot.lane.b32.xlu0 %v2738_v3, %s3850_s14  ;;  %2393 = vrot.lane.b32.xlu1 %v2738_v3, %s3847_s9  ;;  %v2737_v9 = vpack.c.bf16 %v2711_v7, %v2710_v6  ;;  %2051 = vst.msk [vmem:[#allocation5 + $0x40] sm:$0xff] %vm280_vm0, %v2738_v3  ;;  %v2969_v11 = vld [vmem:[#allocation3 + $0xca] sm:$0xff] }
 0x224   : > { %v2994_v17 = vpack.c.bf16 %v2969_v11, %v2968_v0  ;;  %v2966_v12 = vld [vmem:[#allocation3 + $0xaa] sm:$0xff] }
 0x225   : > { %2050 = vst.msk [vmem:[#allocation5 + $0x38] sm:$0xff] %vm280_vm0, %v2737_v9  ;;  %v2993_v20 = vpack.c.bf16 %v2967_v14, %v2966_v12  ;;  %v2839_v22 = vld [vmem:[#allocation3 + $0xb1] sm:$0xff]  ;;  %v2838_v28 = vld [vmem:[#allocation3 + $0xa9] sm:$0xff] }
 0x226   : > { %v2865_v34 = vpack.c.bf16 %v2839_v22, %v2838_v28 }
 0x227   : > { %2904 = vrot.lane.b32.xlu0 %v2866_v10, %s3851_s19  ;;  %2521 = vrot.lane.b32.xlu1 %v2866_v10, %s3848_s10 }
 0x22b   : > { %3032 = vrot.lane.b32.xlu0 %v2994_v17, %s3852_s22  ;;  %2649 = vrot.lane.b32.xlu1 %v2994_v17, %s3849_s11 }
 0x22f   : > { %2267 = vrot.lane.b32.xlu0 %v2994_v17, %s3846_s8  ;;  %2139 = vrot.lane.b32.xlu1 %v2866_v10, %s3845_s30 }
 0x230   : > { %v3751_v16 = vpop.f32.mrb[16].mxu0 }
 0x231   : > { %v1822_v18 = vmul.f32 %v3751_v16, %v4548_v57  ;;  %v1735_v19 = vpop.f32.mrb[17].mxu0 }
 0x232   : > { %v1820_v21 = vmul.f32 %v4548_v57, %v1735_v19  ;;  %v3752_v4 = vpop.f32.mrb[18].mxu0 }
 0x233   : > { %v1860_v23 = vadd.f32 %v4554_v59, %v1822_v18  ;;  %v1823_v24 = vmul.f32 %v3752_v4, %v4548_v57  ;;  %3030 = vrot.lane.b32.xlu0 %v2993_v20, %s3852_s22  ;;  %2774 = vrot.lane.b32.xlu1 %v2737_v9, %s3850_s14  ;;  %v1738_v25 = vpop.f32.mrb[19].mxu0 }
 0x234   : > { %v1858_v26 = vadd.f32 %v4554_v59, %v1820_v21  ;;  %v1821_v27 = vmul.f32 %v4548_v57, %v1738_v25 }
 0x235   : > { %v1892_v29 = vmax.f32 %v1860_v23, 0.0  ;;  %v1861_v30 = vadd.f32 %v4554_v59, %v1823_v24  ;;  %v2765_v31 = vpop.permute.xlu0 %2764  ;;  %v2382_v32 = vpop.permute.xlu1 %2381 }
 0x236   : > { %v1890_v33 = vmax.f32 %v1858_v26, 0.0  ;;  %v1859_v15 = vadd.f32 %v4554_v59, %v1821_v27 }
 0x237   : > { %1979 = vst.msk [vmem:[#allocation3 + $0xf1] sm:$0xff] %vm280_vm0, %v1892_v29  ;;  %v1893_v35 = vmax.f32 %v1861_v30, 0.0  ;;  %2902 = vrot.lane.b32.xlu1 %v2865_v34, %s3851_s19  ;;  %2391 = vrot.lane.b32.xlu0 %v2737_v9, %s3847_s9 }
 0x238   : > { %1977 = vst.msk [vmem:[#allocation3 + $0xd9] sm:$0xff] %vm280_vm0, %v1890_v33  ;;  %v1891_v8 = vmax.f32 %v1859_v15, 0.0 }
 0x239   : > { %1980 = vst.msk [vmem:[#allocation3 + $0xf9] sm:$0xff] %vm280_vm0, %v1893_v35  ;;  %v2893_v36 = vpop.permute.xlu0 %2892  ;;  %v2510_v37 = vpop.permute.xlu1 %2509 }
 0x23a   : > { %1978 = vst.msk [vmem:[#allocation3 + $0xe1] sm:$0xff] %vm280_vm0, %v1891_v8 }
 0x23b   : > { %2519 = vrot.lane.b32.xlu0 %v2865_v34, %s3848_s10  ;;  %2137 = vrot.lane.b32.xlu1 %v2865_v34, %s3845_s30 }
 0x23d   : > { %v3021_v38 = vpop.permute.xlu0 %3020  ;;  %v2638_v39 = vpop.permute.xlu1 %2637 }
 0x23e   : > { %v2716_v41 = vld [vmem:[#allocation3 + $0xf0] sm:$0xff] }
 0x23f   : > { %2647 = vrot.lane.b32.xlu0 %v2993_v20, %s3849_s11  ;;  %2265 = vrot.lane.b32.xlu1 %v2993_v20, %s3846_s8  ;;  %v2714_v46 = vld [vmem:[#allocation3 + $0xd8] sm:$0xff] }
 0x240   : > { %v2717_v42 = vld [vmem:[#allocation3 + $0xf8] sm:$0xff] }
 0x241   : > { %v2256_v43 = vpop.permute.xlu0 %2255  ;;  %v2128_v40 = vpop.permute.xlu1 %2127  ;;  %v2740_v44 = vpack.c.bf16 %v2717_v42, %v2716_v41  ;;  %v2845_v45 = vld [vmem:[#allocation3 + $0xf9] sm:$0xff]  ;;  %v2844_v49 = vld [vmem:[#allocation3 + $0xf1] sm:$0xff]  ;;  %v2971_v62 = vld [vmem:[#allocation3 + $0xe2] sm:$0xff] }
 0x242   : > { %2173 = vst.msk [vmem:[#allocation5 + $0x10] sm:$0xff] %vm611_vm3, %v2128_v40  ;;  %v2715_v47 = vld [vmem:[#allocation3 + $0xe0] sm:$0xff]  ;;  %v2868_v53 = vpack.c.bf16 %v2845_v45, %v2844_v49  ;;  %v2972_v54 = vld [vmem:[#allocation3 + $0xf2] sm:$0xff] }
 0x243   : > { %2301 = vst.msk [vmem:[#allocation5 + $0x10] sm:$0xff] %vm740_vm4, %v2256_v43  ;;  %2780 = vrot.lane.b32.xlu0 %v2740_v44, %s3850_s14  ;;  %2397 = vrot.lane.b32.xlu1 %v2740_v44, %s3847_s9  ;;  %v2739_v48 = vpack.c.bf16 %v2715_v47, %v2714_v46  ;;  %v2973_v55 = vld [vmem:[#allocation3 + $0xfa] sm:$0xff] }
 0x244   : > { %2053 = vst.msk [vmem:[#allocation5 + $0x50] sm:$0xff] %vm280_vm0, %v2740_v44  ;;  %v2996_v60 = vpack.c.bf16 %v2973_v55, %v2972_v54  ;;  %v2970_v61 = vld [vmem:[#allocation3 + $0xda] sm:$0xff] }
 0x245   : > { %v2380_v50 = vpop.permute.xlu0 %2379  ;;  %v2126_v51 = vpop.permute.xlu1 %2125  ;;  %2052 = vst.msk [vmem:[#allocation5 + $0x48] sm:$0xff] %vm280_vm0, %v2739_v48  ;;  %v2995_v13 = vpack.c.bf16 %v2971_v62, %v2970_v61  ;;  %v2843_v7 = vld [vmem:[#allocation3 + $0xe1] sm:$0xff]  ;;  %v2842_v17 = vld [vmem:[#allocation3 + $0xd9] sm:$0xff] }
 0x246   : > { %2427 = vst.msk [vmem:[#allocation5] sm:$0xff] %vm869_vm5, %v2380_v50  ;;  %v2867_v19 = vpack.c.bf16 %v2843_v7, %v2842_v17 }
 0x247   : > { %2172 = vst.msk [vmem:[#allocation5 + $0x8] sm:$0xff] %vm611_vm3, %v2126_v51  ;;  %2908 = vrot.lane.b32.xlu0 %v2868_v53, %s3851_s19  ;;  %2525 = vrot.lane.b32.xlu1 %v2868_v53, %s3848_s10 }
 0x249   : > { %v2508_v56 = vpop.permute.xlu0 %2507  ;;  %v2254_v58 = vpop.permute.xlu1 %2253 }
 0x24a   : > { %2555 = vst.msk [vmem:[#allocation5] sm:$0xff] %vm998_vm6, %v2508_v56 }
 0x24b   : > { %2300 = vst.msk [vmem:[#allocation5 + $0x8] sm:$0xff] %vm740_vm4, %v2254_v58  ;;  %3036 = vrot.lane.b32.xlu0 %v2996_v60, %s3852_s22  ;;  %2653 = vrot.lane.b32.xlu1 %v2996_v60, %s3849_s11 }
 0x24c   : > { %2428 = vst.msk [vmem:[#allocation5 + $0x8] sm:$0xff] %vm869_vm5, %v2382_v32 }
 0x24d   : > { %2556 = vst.msk [vmem:[#allocation5 + $0x8] sm:$0xff] %vm998_vm6, %v2510_v37  ;;  %v2636_v52 = vpop.permute.xlu0 %2635 }
 0x24e   : > { %2684 = vst.msk [vmem:[#allocation5 + $0x8] sm:$0xff] %vm1127_vm7, %v2638_v39  ;;  %2683 = vst.msk [vmem:[#allocation5] sm:$0xff] %vm1127_vm7, %v2636_v52 }
 0x24f   : > { %2812 = vst.msk [vmem:[#allocation5] sm:$0xff] %vm1257_vm8, %v2765_v31  ;;  %2143 = vrot.lane.b32.xlu1 %v2868_v53, %s3845_s30  ;;  %3034 = vrot.lane.b32.xlu0 %v2995_v13, %s3852_s22 }
 0x250   : > { %2940 = vst.msk [vmem:[#allocation5] sm:$0xff] %vm1386_vm9, %v2893_v36  ;;  %v3755_v63 = vpop.f32.mrb[20].mxu0 }
 0x251   : > { %3068 = vst.msk [vmem:[#allocation5] sm:$0xff] %vm1515_vm10, %v3021_v38  ;;  %v1826_v2 = vmul.f32 %v3755_v63, %v4548_v57  ;;  %v1751_v3 = vpop.f32.mrb[21].mxu0 }
 0x252   : > { %v1824_v5 = vmul.f32 %v4548_v57, %v1751_v3  ;;  %v3756_v6 = vpop.f32.mrb[22].mxu0 }
 0x253   : > { %v1864_v9 = vadd.f32 %v4554_v59, %v1826_v2  ;;  %v1827_v1 = vmul.f32 %v3756_v6, %v4548_v57  ;;  %2778 = vrot.lane.b32.xlu1 %v2739_v48, %s3850_s14  ;;  %2395 = vrot.lane.b32.xlu0 %v2739_v48, %s3847_s9  ;;  %v1754_v10 = vpop.f32.mrb[23].mxu0 }
 0x254   : > { %v1862_v0 = vadd.f32 %v4554_v59, %v1824_v5  ;;  %v1825_v11 = vmul.f32 %v4548_v57, %v1754_v10 }
 0x255   : > { %v1896_v12 = vmax.f32 %v1864_v9, 0.0  ;;  %v1865_v14 = vadd.f32 %v4554_v59, %v1827_v1  ;;  %v4740_v16 = vpop.permute.xlu0 %2768  ;;  %v4742_v18 = vpop.permute.xlu1 %2385 }
 0x256   : > { %v1894_v20 = vmax.f32 %v1862_v0, 0.0  ;;  %v1863_v21 = vadd.f32 %v4554_v59, %v1825_v11 }
 0x257   : > { %1983 = vst.msk [vmem:[#allocation3 + $0x121] sm:$0xff] %vm280_vm0, %v1896_v12  ;;  %v1897_v4 = vmax.f32 %v1865_v14, 0.0  ;;  %2906 = vrot.lane.b32.xlu1 %v2867_v19, %s3851_s19  ;;  %2523 = vrot.lane.b32.xlu0 %v2867_v19, %s3848_s10 }
 0x258   : > { %1981 = vst.msk [vmem:[#allocation3 + $0x109] sm:$0xff] %vm280_vm0, %v1894_v20  ;;  %v1895_v22 = vmax.f32 %v1863_v21, 0.0  ;;  %v3084_v23 = vld [vmem:[#allocation5] sm:$0xff] }
 0x259   : > { %1984 = vst.msk [vmem:[#allocation3 + $0x129] sm:$0xff] %vm280_vm0, %v1897_v4  ;;  %3775 = vmatprep.mubr.msk.bf16.mxu1 %vm1584_vm11, %v3084_v23  ;;  %v2897_v24 = vpop.permute.xlu0 %2896  ;;  %v2514_v25 = vpop.permute.xlu1 %2513 }
 0x25a   : > { %1982 = vst.msk [vmem:[#allocation3 + $0x111] sm:$0xff] %vm280_vm0, %v1895_v22 }
 0x25b   : > { %2651 = vrot.lane.b32.xlu0 %v2995_v13, %s3849_s11  ;;  %2141 = vrot.lane.b32.xlu1 %v2867_v19, %s3845_s30 }
 0x25d   : > { %v4754_v26 = vpop.permute.xlu0 %3024  ;;  %v4756_v27 = vpop.permute.xlu1 %2641 }
 0x25e   : > { %v2720_v29 = vld [vmem:[#allocation3 + $0x120] sm:$0xff] }
 0x25f   : > { %2271 = vrot.lane.b32.xlu0 %v2996_v60, %s3846_s8  ;;  %2269 = vrot.lane.b32.xlu1 %v2995_v13, %s3846_s8  ;;  %v2718_v28 = vld [vmem:[#allocation3 + $0x108] sm:$0xff] }
 0x260   : > { %v2721_v30 = vld [vmem:[#allocation3 + $0x128] sm:$0xff] }
 0x261   : > { %v2260_v31 = vpop.permute.xlu0 %2259  ;;  %v2132_v32 = vpop.permute.xlu1 %2131  ;;  %v2974_v34 = vld [vmem:[#allocation3 + $0x10a] sm:$0xff]  ;;  %v2975_v33 = vld [vmem:[#allocation3 + $0x112] sm:$0xff]  ;;  %v2742_v35 = vpack.c.bf16 %v2721_v30, %v2720_v29  ;;  %v2848_v2 = vld [vmem:[#allocation3 + $0x121] sm:$0xff] }
 0x262   : > { %v2719_v15 = vld [vmem:[#allocation3 + $0x110] sm:$0xff]  ;;  %2175 = vst.msk [vmem:[#allocation5 + $0x20] sm:$0xff] %vm611_vm3, %v2132_v32  ;;  %v2997_v8 = vpack.c.bf16 %v2975_v33, %v2974_v34  ;;  %v2976_v9 = vld [vmem:[#allocation3 + $0x122] sm:$0xff] }
 0x263   : > { %v2741_v36 = vpack.c.bf16 %v2719_v15, %v2718_v28  ;;  %2303 = vst.msk [vmem:[#allocation5 + $0x20] sm:$0xff] %vm740_vm4, %v2260_v31  ;;  %v2847_v37 = vld [vmem:[#allocation3 + $0x111] sm:$0xff]  ;;  %v2846_v41 = vld [vmem:[#allocation3 + $0x109] sm:$0xff] }
 0x264   : > { %2055 = vst.msk [vmem:[#allocation5 + $0x60] sm:$0xff] %vm280_vm0, %v2742_v35  ;;  %3038 = vrot.lane.b32.xlu0 %v2997_v8, %s3852_s22  ;;  %v2869_v42 = vpack.c.bf16 %v2847_v37, %v2846_v41  ;;  %v2849_v56 = vld [vmem:[#allocation3 + $0x129] sm:$0xff] }
 0x265   : > { %2782 = vrot.lane.b32.xlu1 %v2741_v36, %s3850_s14  ;;  %2054 = vst.msk [vmem:[#allocation5 + $0x58] sm:$0xff] %vm280_vm0, %v2741_v36  ;;  %v3023_v38 = vpop.permute.xlu0 %3022  ;;  %v2767_v39 = vpop.permute.xlu1 %2766  ;;  %v2870_v5 = vpack.c.bf16 %v2849_v56, %v2848_v2  ;;  %v2977_v1 = vld [vmem:[#allocation3 + $0x12a] sm:$0xff] }
 0x266   : > { %2813 = vst.msk [vmem:[#allocation5 + $0x8] sm:$0xff] %vm1257_vm8, %v2767_v39  ;;  %v2998_v12 = vpack.c.bf16 %v2977_v1, %v2976_v9 }
 0x268   : > { %2399 = vrot.lane.b32.xlu0 %v2741_v36, %s3847_s9 }
 0x269   : > { %2910 = vrot.lane.b32.xlu1 %v2869_v42, %s3851_s19  ;;  %v2895_v43 = vpop.permute.xlu1 %2894  ;;  %v2384_v40 = vpop.permute.xlu0 %2383 }
 0x26a   : > { %2941 = vst.msk [vmem:[#allocation5 + $0x8] sm:$0xff] %vm1386_vm9, %v2895_v43 }
 0x26b   : > { %2429 = vst.msk [vmem:[#allocation5 + $0x10] sm:$0xff] %vm869_vm5, %v2384_v40 }
 0x26c   : > { %3069 = vst.msk [vmem:[#allocation5 + $0x8] sm:$0xff] %vm1515_vm10, %v3023_v38  ;;  %2527 = vrot.lane.b32.xlu0 %v2869_v42, %s3848_s10 }
 0x26d   : > { %2145 = vrot.lane.b32.xlu1 %v2869_v42, %s3845_s30  ;;  %v2512_v44 = vpop.permute.xlu0 %2511  ;;  %v2130_v45 = vpop.permute.xlu1 %2129 }
 0x26e   : > { %2557 = vst.msk [vmem:[#allocation5 + $0x10] sm:$0xff] %vm998_vm6, %v2512_v44 }
 0x26f   : > { %2174 = vst.msk [vmem:[#allocation5 + $0x18] sm:$0xff] %vm611_vm3, %v2130_v45 }
 0x270   : > { %2655 = vrot.lane.b32.xlu0 %v2997_v8, %s3849_s11  ;;  %v3759_v46 = vpop.f32.mrb[24].mxu0 }
 0x271   : > { %2273 = vrot.lane.b32.xlu1 %v2997_v8, %s3846_s8  ;;  %v1830_v47 = vmul.f32 %v3759_v46, %v4548_v57  ;;  %v2640_v48 = vpop.permute.xlu0 %2639  ;;  %v2258_v49 = vpop.permute.xlu1 %2257 }
 0x272   : > { %2685 = vst.msk [vmem:[#allocation5 + $0x10] sm:$0xff] %vm1127_vm7, %v2640_v48  ;;  %v1767_v50 = vpop.f32.mrb[25].mxu0 }
 0x273   : > { %2302 = vst.msk [vmem:[#allocation5 + $0x18] sm:$0xff] %vm740_vm4, %v2258_v49  ;;  %v3085_v51 = vld [vmem:[#allocation5 + $0x8] sm:$0xff]  ;;  %v1868_v53 = vadd.f32 %v4554_v59, %v1830_v47  ;;  %v1828_v54 = vmul.f32 %v4548_v57, %v1767_v50  ;;  %v3760_v55 = vpop.f32.mrb[26].mxu0 }
 0x274   : > { %2814 = vst.msk [vmem:[#allocation5 + $0x10] sm:$0xff] %vm1257_vm8, %v4740_v16  ;;  %3776 = vmatmul.mubr.msk.bf16.vlgmr.msra.gmra.mrb[0].mxu1 %vm1584_vm11, %v3085_v51  ;;  %v1831_v58 = vmul.f32 %v3760_v55, %v4548_v57  ;;  %v1770_v60 = vpop.f32.mrb[27].mxu0  ;;  %2784 = vrot.lane.b32.xlu0 %v2742_v35, %s3850_s14 }
 0x275   : > { %2430 = vst.msk [vmem:[#allocation5 + $0x18] sm:$0xff] %vm869_vm5, %v4742_v18  ;;  %2401 = vrot.lane.b32.xlu1 %v2742_v35, %s3847_s9  ;;  %v1900_v61 = vmax.f32 %v1868_v53, 0.0  ;;  %v1866_v62 = vadd.f32 %v4554_v59, %v1828_v54  ;;  %v1829_v52 = vmul.f32 %v4548_v57, %v1770_v60  ;;  %v4799_v13 = vpop.permute.xlu0 %2772  ;;  %v4801_v63 = vpop.permute.xlu1 %2389 }
 0x276   : > { %2942 = vst.msk [vmem:[#allocation5 + $0x10] sm:$0xff] %vm1386_vm9, %v2897_v24  ;;  %v1869_v3 = vadd.f32 %v4554_v59, %v1831_v58 }
 0x277   : > { %2558 = vst.msk [vmem:[#allocation5 + $0x18] sm:$0xff] %vm998_vm6, %v2514_v25  ;;  %v1898_v6 = vmax.f32 %v1866_v62, 0.0  ;;  %v1867_v7 = vadd.f32 %v4554_v59, %v1829_v52 }
 0x278   : > { %3070 = vst.msk [vmem:[#allocation5 + $0x10] sm:$0xff] %vm1515_vm10, %v4754_v26  ;;  %v1901_v10 = vmax.f32 %v1869_v3, 0.0  ;;  %2912 = vrot.lane.b32.xlu0 %v2870_v5, %s3851_s19 }
 0x279   : > { %2686 = vst.msk [vmem:[#allocation5 + $0x18] sm:$0xff] %vm1127_vm7, %v4756_v27  ;;  %2529 = vrot.lane.b32.xlu1 %v2870_v5, %s3848_s10  ;;  %v1899_v0 = vmax.f32 %v1867_v7, 0.0  ;;  %v4809_v11 = vpop.permute.xlu0 %2900  ;;  %v4811_v17 = vpop.permute.xlu1 %2517 }
 0x27a   : > { %1987 = vst.msk [vmem:[#allocation3 + $0x151] sm:$0xff] %vm280_vm0, %v1900_v61  ;;  %1985 = vst.msk [vmem:[#allocation3 + $0x139] sm:$0xff] %vm280_vm0, %v1898_v6 }
 0x27b   : > { %1988 = vst.msk [vmem:[#allocation3 + $0x159] sm:$0xff] %vm280_vm0, %v1901_v10  ;;  %1986 = vst.msk [vmem:[#allocation3 + $0x141] sm:$0xff] %vm280_vm0, %v1899_v0 }
 0x27c   : > { %3040 = vrot.lane.b32.xlu0 %v2998_v12, %s3852_s22 }
 0x27d   : > { %2657 = vrot.lane.b32.xlu1 %v2998_v12, %s3849_s11  ;;  %v4818_v16 = vpop.permute.xlu0 %3028  ;;  %v4820_v18 = vpop.permute.xlu1 %2645 }
 0x27f   : > { %v3086_v14 = vld [vmem:[#allocation5 + $0x10] sm:$0xff] }
 0x280   : > { %3779 = vmatprep.mubr.msk.bf16.mxu1 %vm1584_vm11, %v3086_v14 }
 0x281   : > { %v2264_v19 = vpop.permute.xlu0 %2263  ;;  %v2136_v20 = vpop.permute.xlu1 %2135  ;;  %v2722_v21 = vld [vmem:[#allocation3 + $0x138] sm:$0xff]  ;;  %v2724_v4 = vld [vmem:[#allocation3 + $0x150] sm:$0xff] }
 0x282   : > { %v2725_v22 = vld [vmem:[#allocation3 + $0x158] sm:$0xff]  ;;  %2177 = vst.msk [vmem:[#allocation5 + $0x30] sm:$0xff] %vm611_vm3, %v2136_v20  ;;  %v2979_v24 = vld [vmem:[#allocation3 + $0x142] sm:$0xff] }
 0x283   : > { %v2978_v23 = vld [vmem:[#allocation3 + $0x13a] sm:$0xff]  ;;  %v4823_v26 = vpack.c.bf16 %v2725_v22, %v2724_v4  ;;  %2305 = vst.msk [vmem:[#allocation5 + $0x30] sm:$0xff] %vm740_vm4, %v2264_v19  ;;  %v2852_v61 = vld [vmem:[#allocation3 + $0x151] sm:$0xff] }
 0x284   : > { %v2723_v25 = vld [vmem:[#allocation3 + $0x140] sm:$0xff]  ;;  %v2999_v27 = vpack.c.bf16 %v2979_v24, %v2978_v23 }
 0x285   : > { %v2743_v28 = vpack.c.bf16 %v2723_v25, %v2722_v21  ;;  %v2851_v29 = vld [vmem:[#allocation3 + $0x141] sm:$0xff]  ;;  %2057 = vst.msk [vmem:[#allocation5 + $0x70] sm:$0xff] %vm280_vm0, %v4823_v26  ;;  %v3027_v30 = vpop.permute.xlu0 %3026  ;;  %v2771_v31 = vpop.permute.xlu1 %2770  ;;  %v2850_v32 = vld [vmem:[#allocation3 + $0x139] sm:$0xff] }
 0x286   : > { %3042 = vrot.lane.b32.xlu0 %v2999_v27, %s3852_s22  ;;  %2815 = vst.msk [vmem:[#allocation5 + $0x18] sm:$0xff] %vm1257_vm8, %v2771_v31  ;;  %v2871_v34 = vpack.c.bf16 %v2851_v29, %v2850_v32  ;;  %v2853_v56 = vld [vmem:[#allocation3 + $0x159] sm:$0xff] }
 0x287   : > { %2786 = vrot.lane.b32.xlu1 %v2743_v28, %s3850_s14  ;;  %2056 = vst.msk [vmem:[#allocation5 + $0x68] sm:$0xff] %vm280_vm0, %v2743_v28  ;;  %v2872_v62 = vpack.c.bf16 %v2853_v56, %v2852_v61 }
 0x289   : > { %v2899_v33 = vpop.permute.xlu1 %2898  ;;  %v2388_v15 = vpop.permute.xlu0 %2387 }
 0x28a   : > { %2275 = vrot.lane.b32.xlu0 %v2998_v12, %s3846_s8  ;;  %2943 = vst.msk [vmem:[#allocation5 + $0x18] sm:$0xff] %vm1386_vm9, %v2899_v33 }
 0x28b   : > { %2914 = vrot.lane.b32.xlu1 %v2871_v34, %s3851_s19  ;;  %2431 = vst.msk [vmem:[#allocation5 + $0x20] sm:$0xff] %vm869_vm5, %v2388_v15 }
 0x28c   : > { %3071 = vst.msk [vmem:[#allocation5 + $0x18] sm:$0xff] %vm1515_vm10, %v3027_v30 }
 0x28d   : > { %v2516_v35 = vpop.permute.xlu0 %2515  ;;  %v2134_v8 = vpop.permute.xlu1 %2133 }
 0x28e   : > { %2403 = vrot.lane.b32.xlu0 %v2743_v28, %s3847_s9  ;;  %2559 = vst.msk [vmem:[#allocation5 + $0x20] sm:$0xff] %vm998_vm6, %v2516_v35  ;;  %v3763_v36 = vpop.f32.mrb[28].mxu0 }
 0x28f   : > { %2147 = vrot.lane.b32.xlu1 %v2870_v5, %s3845_s30  ;;  %2176 = vst.msk [vmem:[#allocation5 + $0x28] sm:$0xff] %vm611_vm3, %v2134_v8  ;;  %v1834_v37 = vmul.f32 %v3763_v36, %v4548_v57  ;;  %v1783_v38 = vpop.f32.mrb[29].mxu0 }
 0x290   : > { %v1832_v39 = vmul.f32 %v4548_v57, %v1783_v38  ;;  %v3764_v41 = vpop.f32.mrb[30].mxu0 }
 0x291   : > { %v1872_v42 = vadd.f32 %v4554_v59, %v1834_v37  ;;  %v1835_v43 = vmul.f32 %v3764_v41, %v4548_v57  ;;  %v1786_v40 = vpop.f32.mrb[31].mxu0  ;;  %v2644_v44 = vpop.permute.xlu0 %2643  ;;  %v2731_v41 = vld [vmem:[#allocation3 + $0x1a0] sm:$0xff] }
 0x292   : > { %2531 = vrot.lane.b32.xlu0 %v2871_v34, %s3848_s10  ;;  %v1870_v45 = vadd.f32 %v4554_v59, %v1832_v39  ;;  %v1833_v46 = vmul.f32 %v4548_v57, %v1786_v40  ;;  %2687 = vst.msk [vmem:[#allocation5 + $0x20] sm:$0xff] %vm1127_vm7, %v2644_v44  ;;  %v2262_v47 = vpop.permute.xlu1 %2261  ;;  %v2730_v39 = vld [vmem:[#allocation3 + $0x198] sm:$0xff] }
 0x293   : > { %2149 = vrot.lane.b32.xlu1 %v2871_v34, %s3845_s30  ;;  %v3087_v48 = vld [vmem:[#allocation5 + $0x18] sm:$0xff]  ;;  %v1904_v49 = vmax.f32 %v1872_v42, 0.0  ;;  %v1873_v50 = vadd.f32 %v4554_v59, %v1835_v43  ;;  %2816 = vst.msk [vmem:[#allocation5 + $0x20] sm:$0xff] %vm1257_vm8, %v4799_v13  ;;  %v2980_v13 = vld [vmem:[#allocation3 + $0x152] sm:$0xff]  ;;  %v2747_v40 = vpack.c.bf16 %v2731_v41, %v2730_v39 }
 0x294   : > { %2304 = vst.msk [vmem:[#allocation5 + $0x28] sm:$0xff] %vm740_vm4, %v2262_v47  ;;  %3780 = vmatmul.mubr.msk.bf16.gmra.mrb[4].mxu1 %vm1584_vm11, %v3087_v48  ;;  %v1902_v51 = vmax.f32 %v1870_v45, 0.0  ;;  %v1871_v53 = vadd.f32 %v4554_v59, %v1833_v46  ;;  %v2858_v45 = vld [vmem:[#allocation3 + $0x199] sm:$0xff]  ;;  %v2859_v46 = vld [vmem:[#allocation3 + $0x1a1] sm:$0xff] }
 0x295   : > { %2944 = vst.msk [vmem:[#allocation5 + $0x20] sm:$0xff] %vm1386_vm9, %v4809_v11  ;;  %v1905_v57 = vmax.f32 %v1873_v50, 0.0  ;;  %v2777_v59 = vpop.permute.xlu0 %2776  ;;  %v2875_v48 = vpack.c.bf16 %v2859_v46, %v2858_v45  ;;  %v2986_v50 = vld [vmem:[#allocation3 + $0x19a] sm:$0xff] }
 0x296   : > { %2432 = vst.msk [vmem:[#allocation5 + $0x28] sm:$0xff] %vm869_vm5, %v4801_v63  ;;  %2659 = vrot.lane.b32.xlu0 %v2999_v27, %s3849_s11  ;;  %v1903_v54 = vmax.f32 %v1871_v53, 0.0  ;;  %v2394_v55 = vpop.permute.xlu1 %2393  ;;  %v2981_v63 = vld [vmem:[#allocation3 + $0x15a] sm:$0xff] }
 0x297   : > { %1991 = vst.msk [vmem:[#allocation3 + $0x181] sm:$0xff] %vm280_vm0, %v1904_v49  ;;  %2277 = vrot.lane.b32.xlu1 %v2999_v27, %s3846_s8  ;;  %1989 = vst.msk [vmem:[#allocation3 + $0x169] sm:$0xff] %vm280_vm0, %v1902_v51  ;;  %v3000_v6 = vpack.c.bf16 %v2981_v63, %v2980_v13  ;;  %v2987_v51 = vld [vmem:[#allocation3 + $0x1a2] sm:$0xff] }
 0x298   : > { %3072 = vst.msk [vmem:[#allocation5 + $0x20] sm:$0xff] %vm1515_vm10, %v4818_v16 }
 0x299   : > { %2560 = vst.msk [vmem:[#allocation5 + $0x28] sm:$0xff] %vm998_vm6, %v4811_v17  ;;  %v2905_v58 = vpop.permute.xlu0 %2904 }
 0x29a   : > { %2688 = vst.msk [vmem:[#allocation5 + $0x28] sm:$0xff] %vm1127_vm7, %v4820_v18  ;;  %2788 = vrot.lane.b32.xlu0 %v4823_v26, %s3850_s14  ;;  %v2522_v60 = vpop.permute.xlu1 %2521 }
 0x29b   : > { %1992 = vst.msk [vmem:[#allocation3 + $0x189] sm:$0xff] %vm280_vm0, %v1905_v57  ;;  %1990 = vst.msk [vmem:[#allocation3 + $0x171] sm:$0xff] %vm280_vm0, %v1903_v54  ;;  %2405 = vrot.lane.b32.xlu1 %v4823_v26, %s3847_s9  ;;  %v3003_v57 = vpack.c.bf16 %v2987_v51, %v2986_v50 }
 0x29d   : > { %v3033_v2 = vpop.permute.xlu0 %3032 }
 0x29e   : > { %2916 = vrot.lane.b32.xlu0 %v2872_v62, %s3851_s19  ;;  %v2726_v3 = vld [vmem:[#allocation3 + $0x168] sm:$0xff]  ;;  %v2650_v5 = vpop.permute.xlu1 %2649  ;;  %v2728_v26 = vld [vmem:[#allocation3 + $0x180] sm:$0xff] }
 0x29f   : > { %v3088_v52 = vld [vmem:[#allocation5 + $0x20] sm:$0xff]  ;;  %2533 = vrot.lane.b32.xlu1 %v2872_v62, %s3848_s10  ;;  %v2856_v31 = vld [vmem:[#allocation3 + $0x181] sm:$0xff] }
 0x2a0   : > { %3783 = vmatprep.mubr.msk.bf16.mxu1 %vm1584_vm11, %v3088_v52  ;;  %v2854_v12 = vld [vmem:[#allocation3 + $0x169] sm:$0xff] }
 0x2a1   : > { %v2268_v0 = vpop.permute.xlu0 %2267 }
 0x2a2   : > { %v2727_v7 = vld [vmem:[#allocation3 + $0x170] sm:$0xff]  ;;  %3044 = vrot.lane.b32.xlu0 %v3000_v6, %s3852_s22  ;;  %v2140_v11 = vpop.permute.xlu1 %2139  ;;  %v2729_v27 = vld [vmem:[#allocation3 + $0x188] sm:$0xff] }
 0x2a3   : > { %v2982_v9 = vld [vmem:[#allocation3 + $0x16a] sm:$0xff]  ;;  %v2983_v1 = vld [vmem:[#allocation3 + $0x172] sm:$0xff]  ;;  %v2745_v10 = vpack.c.bf16 %v2727_v7, %v2726_v3  ;;  %2661 = vrot.lane.b32.xlu1 %v3000_v6, %s3849_s11  ;;  %2179 = vst.msk [vmem:[#allocation5 + $0x40] sm:$0xff] %vm611_vm3, %v2140_v11  ;;  %v2746_v30 = vpack.c.bf16 %v2729_v27, %v2728_v26  ;;  %v2984_v8 = vld [vmem:[#allocation3 + $0x182] sm:$0xff] }
 0x2a4   : > { %v3001_v17 = vpack.c.bf16 %v2983_v1, %v2982_v9  ;;  %2307 = vst.msk [vmem:[#allocation5 + $0x40] sm:$0xff] %vm740_vm4, %v2268_v0  ;;  %v2855_v14 = vld [vmem:[#allocation3 + $0x171] sm:$0xff]  ;;  %v2857_v32 = vld [vmem:[#allocation3 + $0x189] sm:$0xff] }
 0x2a5   : > { %2058 = vst.msk [vmem:[#allocation5 + $0x78] sm:$0xff] %vm280_vm0, %v2745_v10  ;;  %v3031_v16 = vpop.permute.xlu0 %3030  ;;  %v2873_v19 = vpack.c.bf16 %v2855_v14, %v2854_v12  ;;  %v2874_v15 = vpack.c.bf16 %v2857_v32, %v2856_v31  ;;  %v2985_v36 = vld [vmem:[#allocation3 + $0x18a] sm:$0xff] }
 0x2a6   : > { %3046 = vrot.lane.b32.xlu0 %v3001_v17, %s3852_s22  ;;  %v2775_v18 = vpop.permute.xlu1 %2774  ;;  %v3002_v42 = vpack.c.bf16 %v2985_v36, %v2984_v8 }
 0x2a7   : > { %2790 = vrot.lane.b32.xlu1 %v2745_v10, %s3850_s14  ;;  %2817 = vst.msk [vmem:[#allocation5 + $0x28] sm:$0xff] %vm1257_vm8, %v2775_v18 }
 0x2a9   : > { %v2392_v20 = vpop.permute.xlu0 %2391 }
 0x2aa   : > { %2279 = vrot.lane.b32.xlu0 %v3000_v6, %s3846_s8  ;;  %v2903_v21 = vpop.permute.xlu1 %2902  ;;  %2433 = vst.msk [vmem:[#allocation5 + $0x30] sm:$0xff] %vm869_vm5, %v2392_v20 }
 0x2ab   : > { %2918 = vrot.lane.b32.xlu1 %v2873_v19, %s3851_s19  ;;  %2945 = vst.msk [vmem:[#allocation5 + $0x28] sm:$0xff] %vm1386_vm9, %v2903_v21 }
 0x2ac   : > { %3073 = vst.msk [vmem:[#allocation5 + $0x28] sm:$0xff] %vm1515_vm10, %v3031_v16 }
 0x2ad   : > { %v2520_v4 = vpop.permute.xlu0 %2519 }
 0x2ae   : > { %2407 = vrot.lane.b32.xlu0 %v2745_v10, %s3847_s9  ;;  %2561 = vst.msk [vmem:[#allocation5 + $0x30] sm:$0xff] %vm998_vm6, %v2520_v4  ;;  %v2138_v22 = vpop.permute.xlu1 %2137 }
 0x2af   : > { %2151 = vrot.lane.b32.xlu1 %v2872_v62, %s3845_s30  ;;  %2178 = vst.msk [vmem:[#allocation5 + $0x38] sm:$0xff] %vm611_vm3, %v2138_v22 }
 0x2b1   : > { %v2648_v23 = vpop.permute.xlu0 %2647 }
 0x2b2   : > { %2535 = vrot.lane.b32.xlu0 %v2873_v19, %s3848_s10  ;;  %2689 = vst.msk [vmem:[#allocation5 + $0x30] sm:$0xff] %vm1127_vm7, %v2648_v23  ;;  %v2266_v24 = vpop.permute.xlu1 %2265 }
 0x2b3   : > { %2153 = vrot.lane.b32.xlu1 %v2873_v19, %s3845_s30  ;;  %2818 = vst.msk [vmem:[#allocation5 + $0x30] sm:$0xff] %vm1257_vm8, %v2777_v59  ;;  %v3089_v25 = vld [vmem:[#allocation5 + $0x28] sm:$0xff] }
 0x2b4   : > { %2306 = vst.msk [vmem:[#allocation5 + $0x38] sm:$0xff] %vm740_vm4, %v2266_v24  ;;  %3784 = vmatmul.mubr.msk.bf16.gmra.mrb[8].mxu1 %vm1584_vm11, %v3089_v25 }
 0x2b5   : > { %2946 = vst.msk [vmem:[#allocation5 + $0x30] sm:$0xff] %vm1386_vm9, %v2905_v58  ;;  %v2781_v28 = vpop.permute.xlu0 %2780 }
 0x2b6   : > { %2434 = vst.msk [vmem:[#allocation5 + $0x38] sm:$0xff] %vm869_vm5, %v2394_v55  ;;  %2663 = vrot.lane.b32.xlu0 %v3001_v17, %s3849_s11  ;;  %v2398_v29 = vpop.permute.xlu1 %2397 }
 0x2b7   : > { %3074 = vst.msk [vmem:[#allocation5 + $0x30] sm:$0xff] %vm1515_vm10, %v3033_v2  ;;  %2281 = vrot.lane.b32.xlu1 %v3001_v17, %s3846_s8 }
 0x2b8   : > { %2562 = vst.msk [vmem:[#allocation5 + $0x38] sm:$0xff] %vm998_vm6, %v2522_v60 }
 0x2b9   : > { %2690 = vst.msk [vmem:[#allocation5 + $0x38] sm:$0xff] %vm1127_vm7, %v2650_v5  ;;  %v2909_v34 = vpop.permute.xlu0 %2908 }
 0x2ba   : > { %2792 = vrot.lane.b32.xlu0 %v2746_v30, %s3850_s14  ;;  %v2526_v33 = vpop.permute.xlu1 %2525 }
 0x2bb   : > { %2409 = vrot.lane.b32.xlu1 %v2746_v30, %s3847_s9 }
 0x2bd   : > { %v3037_v37 = vpop.permute.xlu0 %3036 }
 0x2be   : > { %v3090_v35 = vld [vmem:[#allocation5 + $0x30] sm:$0xff]  ;;  %2920 = vrot.lane.b32.xlu0 %v2874_v15, %s3851_s19  ;;  %v2654_v38 = vpop.permute.xlu1 %2653 }
 0x2bf   : > { %2537 = vrot.lane.b32.xlu1 %v2874_v15, %s3848_s10  ;;  %3787 = vmatprep.mubr.msk.bf16.mxu1 %vm1584_vm11, %v3090_v35 }
 0x2c1   : > { %v3035_v43 = vpop.permute.xlu0 %3034 }
 0x2c2   : > { %3048 = vrot.lane.b32.xlu0 %v3002_v42, %s3852_s22  ;;  %v2144_v44 = vpop.permute.xlu1 %2143 }
 0x2c3   : > { %2665 = vrot.lane.b32.xlu1 %v3002_v42, %s3849_s11  ;;  %2181 = vst.msk [vmem:[#allocation5 + $0x50] sm:$0xff] %vm611_vm3, %v2144_v44  ;;  %s3601_s11 = sshll.u32 %s5117_s25, 8 }
 0x2c5   : > { %v2396_v47 = vpop.permute.xlu0 %2395 }
 0x2c6   : > { %v2779_v49 = vpop.permute.xlu1 %2778  ;;  %2435 = vst.msk [vmem:[#allocation5 + $0x40] sm:$0xff] %vm869_vm5, %v2396_v47 }
 0x2c7   : > { %2794 = vrot.lane.b32.xlu1 %v2747_v40, %s3850_s14  ;;  %2819 = vst.msk [vmem:[#allocation5 + $0x38] sm:$0xff] %vm1257_vm8, %v2779_v49 }
 0x2c9   : > { %v2524_v53 = vpop.permute.xlu0 %2523 }
 0x2ca   : > { %v2907_v59 = vpop.permute.xlu1 %2906  ;;  %2563 = vst.msk [vmem:[#allocation5 + $0x40] sm:$0xff] %vm998_vm6, %v2524_v53  ;;  %v4995_v53 = vld [vmem:[%s5113_s5] ss:$0 sm:$0xff] }
 0x2cb   : > { %2922 = vrot.lane.b32.xlu1 %v2875_v48, %s3851_s19  ;;  %2947 = vst.msk [vmem:[#allocation5 + $0x38] sm:$0xff] %vm1386_vm9, %v2907_v59 }
 0x2cc   : > { %3075 = vst.msk [vmem:[#allocation5 + $0x38] sm:$0xff] %vm1515_vm10, %v3035_v43 }
 0x2cd   : > { %v2652_v54 = vpop.permute.xlu0 %2651 }
 0x2ce   : > { %2691 = vst.msk [vmem:[#allocation5 + $0x40] sm:$0xff] %vm1127_vm7, %v2652_v54  ;;  %v2142_v55 = vpop.permute.xlu1 %2141 }
 0x2cf   : > { %3050 = vrot.lane.b32.xlu1 %v3003_v57, %s3852_s22  ;;  %2820 = vst.msk [vmem:[#allocation5 + $0x40] sm:$0xff] %vm1257_vm8, %v2781_v28  ;;  %v5000_v57 = vld [vmem:[%s5114_s6] ss:$0 sm:$0xff]  ;;  %s5011_s22 = scalar_lea.vmem %s5115_s7, %s3601_s11 }
 0x2d0   : > { %2180 = vst.msk [vmem:[#allocation5 + $0x48] sm:$0xff] %vm611_vm3, %v2142_v55 }
 0x2d1   : > { %2948 = vst.msk [vmem:[#allocation5 + $0x40] sm:$0xff] %vm1386_vm9, %v2909_v34  ;;  %v2272_v56 = vpop.permute.xlu0 %2271 }
 0x2d2   : > { %3076 = vst.msk [vmem:[#allocation5 + $0x40] sm:$0xff] %vm1515_vm10, %v3037_v37  ;;  %v2270_v58 = vpop.permute.xlu1 %2269 }
 0x2d3   : > { %2309 = vst.msk [vmem:[#allocation5 + $0x50] sm:$0xff] %vm740_vm4, %v2272_v56  ;;  %2308 = vst.msk [vmem:[#allocation5 + $0x48] sm:$0xff] %vm740_vm4, %v2270_v58  ;;  %v3091_v60 = vld [vmem:[#allocation5 + $0x38] sm:$0xff] }
 0x2d4   : > { %2436 = vst.msk [vmem:[#allocation5 + $0x48] sm:$0xff] %vm869_vm5, %v2398_v29  ;;  %3788 = vmatmul.mubr.msk.bf16.gmra.mrb[12].mxu1 %vm1584_vm11, %v3091_v60 }
 0x2d5   : > { %2564 = vst.msk [vmem:[#allocation5 + $0x48] sm:$0xff] %vm998_vm6, %v2526_v33 }
 0x2d6   : > { %2692 = vst.msk [vmem:[#allocation5 + $0x48] sm:$0xff] %vm1127_vm7, %v2654_v38  ;;  %v3039_v61 = vpop.permute.xlu0 %3038 }
 0x2d7   : > { %v2783_v62 = vpop.permute.xlu1 %2782 }
 0x2d8   : > { %2821 = vst.msk [vmem:[#allocation5 + $0x48] sm:$0xff] %vm1257_vm8, %v2783_v62 }
 0x2d9   : > { %v3092_v52 = vld [vmem:[#allocation5 + $0x40] sm:$0xff] }
 0x2da   : > { %3791 = vmatprep.mubr.msk.bf16.mxu1 %vm1584_vm11, %v3092_v52  ;;  %v2400_v63 = vpop.permute.xlu0 %2399 }
 0x2db   : > { %v2911_v13 = vpop.permute.xlu1 %2910  ;;  %2437 = vst.msk [vmem:[#allocation5 + $0x50] sm:$0xff] %vm869_vm5, %v2400_v63 }
 0x2dc   : > { %2949 = vst.msk [vmem:[#allocation5 + $0x48] sm:$0xff] %vm1386_vm9, %v2911_v13 }
 0x2dd   : > { %3077 = vst.msk [vmem:[#allocation5 + $0x48] sm:$0xff] %vm1515_vm10, %v3039_v61 }
 0x2de   : > { %v2528_v2 = vpop.permute.xlu0 %2527 }
 0x2df   : > { %v2146_v3 = vpop.permute.xlu1 %2145  ;;  %2565 = vst.msk [vmem:[#allocation5 + $0x50] sm:$0xff] %vm998_vm6, %v2528_v2 }
 0x2e0   : > { %2182 = vst.msk [vmem:[#allocation5 + $0x58] sm:$0xff] %vm611_vm3, %v2146_v3 }
 0x2e2   : > { %v2656_v5 = vpop.permute.xlu0 %2655 }
 0x2e3   : > { %v2274_v6 = vpop.permute.xlu1 %2273  ;;  %2693 = vst.msk [vmem:[#allocation5 + $0x50] sm:$0xff] %vm1127_vm7, %v2656_v5 }
 0x2e4   : > { %2310 = vst.msk [vmem:[#allocation5 + $0x58] sm:$0xff] %vm740_vm4, %v2274_v6  ;;  %v3093_v7 = vld [vmem:[#allocation5 + $0x48] sm:$0xff] }
 0x2e5   : > { %3792 = vmatmul.mubr.msk.bf16.gmra.mrb[16].mxu1 %vm1584_vm11, %v3093_v7 }
 0x2e6   : > { %v2785_v9 = vpop.permute.xlu0 %2784 }
 0x2e7   : > { %v2402_v1 = vpop.permute.xlu1 %2401  ;;  %2822 = vst.msk [vmem:[#allocation5 + $0x50] sm:$0xff] %vm1257_vm8, %v2785_v9 }
 0x2e8   : > { %2438 = vst.msk [vmem:[#allocation5 + $0x58] sm:$0xff] %vm869_vm5, %v2402_v1 }
 0x2ea   : > { %v2913_v10 = vpop.permute.xlu0 %2912 }
 0x2eb   : > { %v2530_v0 = vpop.permute.xlu1 %2529  ;;  %2950 = vst.msk [vmem:[#allocation5 + $0x50] sm:$0xff] %vm1386_vm9, %v2913_v10 }
 0x2ec   : > { %2566 = vst.msk [vmem:[#allocation5 + $0x58] sm:$0xff] %vm998_vm6, %v2530_v0 }
 0x2ee   : > { %v3041_v11 = vpop.permute.xlu0 %3040 }
 0x2ef   : > { %v2658_v17 = vpop.permute.xlu1 %2657  ;;  %3078 = vst.msk [vmem:[#allocation5 + $0x50] sm:$0xff] %vm1515_vm10, %v3041_v11 }
 0x2f0   : > { %2694 = vst.msk [vmem:[#allocation5 + $0x58] sm:$0xff] %vm1127_vm7, %v2658_v17 }
 0x2f6   : > { %v3094_v12 = vld [vmem:[#allocation5 + $0x50] sm:$0xff] }
 0x2f7   : > { %3795 = vmatprep.mubr.msk.bf16.mxu1 %vm1584_vm11, %v3094_v12 }
 0x2f8   : > { %v3043_v14 = vpop.permute.xlu0 %3042 }
 0x2f9   : > { %v2787_v16 = vpop.permute.xlu1 %2786 }
 0x2fa   : > { %2823 = vst.msk [vmem:[#allocation5 + $0x58] sm:$0xff] %vm1257_vm8, %v2787_v16 }
 0x2fc   : > { %v2276_v18 = vpop.permute.xlu0 %2275 }
 0x2fd   : > { %v2915_v19 = vpop.permute.xlu1 %2914 }
 0x2fe   : > { %2951 = vst.msk [vmem:[#allocation5 + $0x58] sm:$0xff] %vm1386_vm9, %v2915_v19 }
 0x2ff   : > { %3079 = vst.msk [vmem:[#allocation5 + $0x58] sm:$0xff] %vm1515_vm10, %v3043_v14 }
 0x300   : > { %v2404_v21 = vpop.permute.xlu0 %2403 }
 0x301   : > { %v2148_v20 = vpop.permute.xlu1 %2147 }
 0x302   : > { %2183 = vst.msk [vmem:[#allocation5 + $0x60] sm:$0xff] %vm611_vm3, %v2148_v20 }
 0x303   : > { %2311 = vst.msk [vmem:[#allocation5 + $0x60] sm:$0xff] %vm740_vm4, %v2276_v18 }
 0x304   : > { %2439 = vst.msk [vmem:[#allocation5 + $0x60] sm:$0xff] %vm869_vm5, %v2404_v21  ;;  %v2532_v4 = vpop.permute.xlu0 %2531 }
 0x305   : > { %v2150_v22 = vpop.permute.xlu1 %2149  ;;  %2567 = vst.msk [vmem:[#allocation5 + $0x60] sm:$0xff] %vm998_vm6, %v2532_v4 }
 0x306   : > { %2184 = vst.msk [vmem:[#allocation5 + $0x68] sm:$0xff] %vm611_vm3, %v2150_v22  ;;  %v3095_v23 = vld [vmem:[#allocation5 + $0x58] sm:$0xff] }
 0x307   : > { %3796 = vmatmul.mubr.msk.bf16.gmra.mrb[20].mxu1 %vm1584_vm11, %v3095_v23 }
 0x308   : > { %v2660_v24 = vpop.permute.xlu0 %2659 }
 0x309   : > { %v2278_v25 = vpop.permute.xlu1 %2277  ;;  %2695 = vst.msk [vmem:[#allocation5 + $0x60] sm:$0xff] %vm1127_vm7, %v2660_v24 }
 0x30a   : > { %2312 = vst.msk [vmem:[#allocation5 + $0x68] sm:$0xff] %vm740_vm4, %v2278_v25 }
 0x30c   : > { %v2789_v26 = vpop.permute.xlu0 %2788 }
 0x30d   : > { %v2406_v27 = vpop.permute.xlu1 %2405  ;;  %2824 = vst.msk [vmem:[#allocation5 + $0x60] sm:$0xff] %vm1257_vm8, %v2789_v26 }
 0x30e   : > { %2440 = vst.msk [vmem:[#allocation5 + $0x68] sm:$0xff] %vm869_vm5, %v2406_v27 }
 0x310   : > { %v2917_v28 = vpop.permute.xlu0 %2916 }
 0x311   : > { %v2534_v29 = vpop.permute.xlu1 %2533  ;;  %2952 = vst.msk [vmem:[#allocation5 + $0x60] sm:$0xff] %vm1386_vm9, %v2917_v28 }
 0x312   : > { %2568 = vst.msk [vmem:[#allocation5 + $0x68] sm:$0xff] %vm998_vm6, %v2534_v29 }
 0x314   : > { %v3045_v30 = vpop.permute.xlu0 %3044 }
 0x315   : > { %v2662_v31 = vpop.permute.xlu1 %2661  ;;  %3080 = vst.msk [vmem:[#allocation5 + $0x60] sm:$0xff] %vm1515_vm10, %v3045_v30 }
 0x316   : > { %2696 = vst.msk [vmem:[#allocation5 + $0x68] sm:$0xff] %vm1127_vm7, %v2662_v31 }
 0x318   : > { %v3047_v32 = vpop.permute.xlu0 %3046 }
 0x319   : > { %v2791_v34 = vpop.permute.xlu1 %2790 }
 0x31a   : > { %2825 = vst.msk [vmem:[#allocation5 + $0x68] sm:$0xff] %vm1257_vm8, %v2791_v34 }
 0x31c   : > { %v2280_v33 = vpop.permute.xlu0 %2279  ;;  %v3096_v35 = vld [vmem:[#allocation5 + $0x60] sm:$0xff] }
 0x31d   : > { %v2919_v15 = vpop.permute.xlu1 %2918  ;;  %3799 = vmatprep.mubr.msk.bf16.mxu1 %vm1584_vm11, %v3096_v35 }
 0x31e   : > { %2953 = vst.msk [vmem:[#allocation5 + $0x68] sm:$0xff] %vm1386_vm9, %v2919_v15 }
 0x31f   : > { %3081 = vst.msk [vmem:[#allocation5 + $0x68] sm:$0xff] %vm1515_vm10, %v3047_v32 }
 0x320   : > { %v2408_v36 = vpop.permute.xlu0 %2407 }
 0x321   : > { %v2152_v8 = vpop.permute.xlu1 %2151 }
 0x322   : > { %2185 = vst.msk [vmem:[#allocation5 + $0x70] sm:$0xff] %vm611_vm3, %v2152_v8 }
 0x323   : > { %2313 = vst.msk [vmem:[#allocation5 + $0x70] sm:$0xff] %vm740_vm4, %v2280_v33 }
 0x324   : > { %2441 = vst.msk [vmem:[#allocation5 + $0x70] sm:$0xff] %vm869_vm5, %v2408_v36  ;;  %v2536_v37 = vpop.permute.xlu0 %2535 }
 0x325   : > { %v2154_v38 = vpop.permute.xlu1 %2153  ;;  %2569 = vst.msk [vmem:[#allocation5 + $0x70] sm:$0xff] %vm998_vm6, %v2536_v37 }
 0x326   : > { %2186 = vst.msk [vmem:[#allocation5 + $0x78] sm:$0xff] %vm611_vm3, %v2154_v38  ;;  %v3097_v39 = vld [vmem:[#allocation5 + $0x68] sm:$0xff] }
 0x327   : > { %3800 = vmatmul.mubr.msk.bf16.gmra.mrb[24].mxu1 %vm1584_vm11, %v3097_v39 }
 0x328   : > { %v2664_v41 = vpop.permute.xlu0 %2663 }
 0x329   : > { %v2282_v42 = vpop.permute.xlu1 %2281  ;;  %2697 = vst.msk [vmem:[#allocation5 + $0x70] sm:$0xff] %vm1127_vm7, %v2664_v41 }
 0x32a   : > { %2314 = vst.msk [vmem:[#allocation5 + $0x78] sm:$0xff] %vm740_vm4, %v2282_v42 }
 0x32c   : > { %v2793_v43 = vpop.permute.xlu0 %2792 }
 0x32d   : > { %v2410_v40 = vpop.permute.xlu1 %2409  ;;  %2826 = vst.msk [vmem:[#allocation5 + $0x70] sm:$0xff] %vm1257_vm8, %v2793_v43 }
 0x32e   : > { %2442 = vst.msk [vmem:[#allocation5 + $0x78] sm:$0xff] %vm869_vm5, %v2410_v40 }
 0x330   : > { %v2921_v44 = vpop.permute.xlu0 %2920 }
 0x331   : > { %v2538_v45 = vpop.permute.xlu1 %2537  ;;  %2954 = vst.msk [vmem:[#allocation5 + $0x70] sm:$0xff] %vm1386_vm9, %v2921_v44 }
 0x332   : > { %2570 = vst.msk [vmem:[#allocation5 + $0x78] sm:$0xff] %vm998_vm6, %v2538_v45 }
 0x334   : > { %v3049_v46 = vpop.permute.xlu0 %3048 }
 0x335   : > { %v2666_v47 = vpop.permute.xlu1 %2665  ;;  %3082 = vst.msk [vmem:[#allocation5 + $0x70] sm:$0xff] %vm1515_vm10, %v3049_v46 }
 0x336   : > { %2698 = vst.msk [vmem:[#allocation5 + $0x78] sm:$0xff] %vm1127_vm7, %v2666_v47 }
 0x339   : > { %v2795_v48 = vpop.permute.xlu1 %2794 }
 0x33a   : > { %2827 = vst.msk [vmem:[#allocation5 + $0x78] sm:$0xff] %vm1257_vm8, %v2795_v48 }
 0x33c   : > { %v3098_v50 = vld [vmem:[#allocation5 + $0x70] sm:$0xff] }
 0x33d   : > { %v2923_v49 = vpop.permute.xlu1 %2922  ;;  %3803 = vmatprep.mubr.msk.bf16.mxu1 %vm1584_vm11, %v3098_v50 }
 0x33e   : > { %2955 = vst.msk [vmem:[#allocation5 + $0x78] sm:$0xff] %vm1386_vm9, %v2923_v49 }
 0x341   : > { %v3051_v51 = vpop.permute.xlu1 %3050 }
 0x342   : > { %3083 = vst.msk [vmem:[#allocation5 + $0x78] sm:$0xff] %vm1515_vm10, %v3051_v51 }
 0x347   : > { %v3777_v59 = vpop.f32.mrb[0].mxu1 }
 0x348   : > { %v3356_v54 = vmul.f32 %v3777_v59, %v4995_v53  ;;  %v3221_v55 = vpop.f32.mrb[1].mxu1 }
 0x349   : > { %v3099_v56 = vld [vmem:[#allocation5 + $0x78] sm:$0xff]  ;;  %v3354_v58 = vmul.f32 %v4995_v53, %v3221_v55  ;;  %v3778_v60 = vpop.f32.mrb[2].mxu1 }
 0x34a   : > { %3804 = vmatmul.mubr.msk.bf16.gmra.mrb[28].mxu1 %vm1584_vm11, %v3099_v56  ;;  %v3394_v61 = vadd.f32 %v5000_v57, %v3356_v54  ;;  %v3357_v62 = vmul.f32 %v3778_v60, %v4995_v53  ;;  %v3224_v52 = vpop.f32.mrb[3].mxu1 }
 0x34b   : > { %v3392_v13 = vadd.f32 %v5000_v57, %v3354_v58  ;;  %v3355_v63 = vmul.f32 %v4995_v53, %v3224_v52 }
 0x34c   : > { %v3426_v2 = vmax.f32 %v3394_v61, 0.0  ;;  %v3395_v3 = vadd.f32 %v5000_v57, %v3357_v62 }
 0x34d   : > { %v3424_v5 = vmax.f32 %v3392_v13, 0.0  ;;  %v3393_v6 = vadd.f32 %v5000_v57, %v3355_v63 }
 0x34e   : > { %3458 = vst [vmem:[%s5011_s22 + $0x10] sm:$0xff] %v3426_v2  ;;  %v3427_v7 = vmax.f32 %v3395_v3, 0.0 }
 0x34f   : > { %3456 = vst [vmem:[%s5011_s22] sm:$0xff] %v3424_v5  ;;  %v3425_v9 = vmax.f32 %v3393_v6, 0.0 }
 0x350   : > { %3459 = vst [vmem:[%s5011_s22 + $0x18] sm:$0xff] %v3427_v7 }
 0x351   : > { %3457 = vst [vmem:[%s5011_s22 + $0x8] sm:$0xff] %v3425_v9 }
 0x367   : > { %v3781_v1 = vpop.f32.mrb[4].mxu1 }
 0x368   : > { %v3360_v10 = vmul.f32 %v3781_v1, %v4995_v53  ;;  %v3237_v0 = vpop.f32.mrb[5].mxu1 }
 0x369   : > { %v3358_v11 = vmul.f32 %v4995_v53, %v3237_v0  ;;  %v3782_v17 = vpop.f32.mrb[6].mxu1 }
 0x36a   : > { %v3398_v12 = vadd.f32 %v5000_v57, %v3360_v10  ;;  %v3361_v14 = vmul.f32 %v3782_v17, %v4995_v53  ;;  %v3240_v16 = vpop.f32.mrb[7].mxu1 }
 0x36b   : > { %v3396_v18 = vadd.f32 %v5000_v57, %v3358_v11  ;;  %v3359_v19 = vmul.f32 %v4995_v53, %v3240_v16 }
 0x36c   : > { %v3430_v20 = vmax.f32 %v3398_v12, 0.0  ;;  %v3399_v21 = vadd.f32 %v5000_v57, %v3361_v14 }
 0x36d   : > { %v3428_v4 = vmax.f32 %v3396_v18, 0.0  ;;  %v3397_v22 = vadd.f32 %v5000_v57, %v3359_v19 }
 0x36e   : > { %3462 = vst [vmem:[%s5011_s22 + $0x30] sm:$0xff] %v3430_v20  ;;  %v3431_v23 = vmax.f32 %v3399_v21, 0.0 }
 0x36f   : > { %3460 = vst [vmem:[%s5011_s22 + $0x20] sm:$0xff] %v3428_v4  ;;  %v3429_v24 = vmax.f32 %v3397_v22, 0.0 }
 0x370   : > { %3463 = vst [vmem:[%s5011_s22 + $0x38] sm:$0xff] %v3431_v23 }
 0x371   : > { %3461 = vst [vmem:[%s5011_s22 + $0x28] sm:$0xff] %v3429_v24 }
 0x387   : > { %v3785_v25 = vpop.f32.mrb[8].mxu1 }
 0x388   : > { %v3364_v26 = vmul.f32 %v3785_v25, %v4995_v53  ;;  %v3253_v27 = vpop.f32.mrb[9].mxu1 }
 0x389   : > { %v3362_v28 = vmul.f32 %v4995_v53, %v3253_v27  ;;  %v3786_v29 = vpop.f32.mrb[10].mxu1 }
 0x38a   : > { %v3402_v30 = vadd.f32 %v5000_v57, %v3364_v26  ;;  %v3365_v31 = vmul.f32 %v3786_v29, %v4995_v53  ;;  %v3256_v32 = vpop.f32.mrb[11].mxu1 }
 0x38b   : > { %v3400_v34 = vadd.f32 %v5000_v57, %v3362_v28  ;;  %v3363_v33 = vmul.f32 %v4995_v53, %v3256_v32 }
 0x38c   : > { %v3434_v15 = vmax.f32 %v3402_v30, 0.0  ;;  %v3403_v35 = vadd.f32 %v5000_v57, %v3365_v31 }
 0x38d   : > { %v3432_v8 = vmax.f32 %v3400_v34, 0.0  ;;  %v3401_v36 = vadd.f32 %v5000_v57, %v3363_v33 }
 0x38e   : > { %3466 = vst [vmem:[%s5011_s22 + $0x50] sm:$0xff] %v3434_v15  ;;  %v3435_v37 = vmax.f32 %v3403_v35, 0.0 }
 0x38f   : > { %3464 = vst [vmem:[%s5011_s22 + $0x40] sm:$0xff] %v3432_v8  ;;  %v3433_v38 = vmax.f32 %v3401_v36, 0.0 }
 0x390   : > { %3467 = vst [vmem:[%s5011_s22 + $0x58] sm:$0xff] %v3435_v37 }
 0x391   : > { %3465 = vst [vmem:[%s5011_s22 + $0x48] sm:$0xff] %v3433_v38 }
 0x3a7   : > { %v3789_v39 = vpop.f32.mrb[12].mxu1 }
 0x3a8   : > { %v3368_v41 = vmul.f32 %v3789_v39, %v4995_v53  ;;  %v3269_v42 = vpop.f32.mrb[13].mxu1 }
 0x3a9   : > { %v3366_v43 = vmul.f32 %v4995_v53, %v3269_v42  ;;  %v3790_v40 = vpop.f32.mrb[14].mxu1 }
 0x3aa   : > { %v3406_v44 = vadd.f32 %v5000_v57, %v3368_v41  ;;  %v3369_v45 = vmul.f32 %v3790_v40, %v4995_v53  ;;  %v3272_v46 = vpop.f32.mrb[15].mxu1 }
 0x3ab   : > { %v3404_v47 = vadd.f32 %v5000_v57, %v3366_v43  ;;  %v3367_v48 = vmul.f32 %v4995_v53, %v3272_v46 }
 0x3ac   : > { %v3438_v49 = vmax.f32 %v3406_v44, 0.0  ;;  %v3407_v50 = vadd.f32 %v5000_v57, %v3369_v45 }
 0x3ad   : > { %v3436_v51 = vmax.f32 %v3404_v47, 0.0  ;;  %v3405_v59 = vadd.f32 %v5000_v57, %v3367_v48 }
 0x3ae   : > { %3470 = vst [vmem:[%s5011_s22 + $0x70] sm:$0xff] %v3438_v49  ;;  %v3439_v54 = vmax.f32 %v3407_v50, 0.0 }
 0x3af   : > { %3468 = vst [vmem:[%s5011_s22 + $0x60] sm:$0xff] %v3436_v51  ;;  %v3437_v55 = vmax.f32 %v3405_v59, 0.0 }
 0x3b0   : > { %3471 = vst [vmem:[%s5011_s22 + $0x78] sm:$0xff] %v3439_v54 }
 0x3b1   : > { %3469 = vst [vmem:[%s5011_s22 + $0x68] sm:$0xff] %v3437_v55 }
 0x3b8   : > { %v3793_v56 = vpop.f32.mrb[16].mxu1 }
 0x3b9   : > { %v3372_v58 = vmul.f32 %v3793_v56, %v4995_v53  ;;  %v3285_v60 = vpop.f32.mrb[17].mxu1 }
 0x3ba   : > { %v3370_v61 = vmul.f32 %v4995_v53, %v3285_v60  ;;  %v3794_v62 = vpop.f32.mrb[18].mxu1 }
 0x3bb   : > { %v3410_v52 = vadd.f32 %v5000_v57, %v3372_v58  ;;  %v3373_v13 = vmul.f32 %v3794_v62, %v4995_v53  ;;  %v3288_v63 = vpop.f32.mrb[19].mxu1 }
 0x3bc   : > { %v3408_v2 = vadd.f32 %v5000_v57, %v3370_v61  ;;  %v3371_v3 = vmul.f32 %v4995_v53, %v3288_v63 }
 0x3bd   : > { %v3442_v5 = vmax.f32 %v3410_v52, 0.0  ;;  %v3411_v6 = vadd.f32 %v5000_v57, %v3373_v13 }
 0x3be   : > { %v3440_v7 = vmax.f32 %v3408_v2, 0.0  ;;  %v3409_v9 = vadd.f32 %v5000_v57, %v3371_v3 }
 0x3bf   : > { %3474 = vst [vmem:[%s5011_s22 + $0x90] sm:$0xff] %v3442_v5  ;;  %v3443_v1 = vmax.f32 %v3411_v6, 0.0 }
 0x3c0   : > { %3472 = vst [vmem:[%s5011_s22 + $0x80] sm:$0xff] %v3440_v7  ;;  %v3441_v10 = vmax.f32 %v3409_v9, 0.0 }
 0x3c1   : > { %3475 = vst [vmem:[%s5011_s22 + $0x98] sm:$0xff] %v3443_v1 }
 0x3c2   : > { %3473 = vst [vmem:[%s5011_s22 + $0x88] sm:$0xff] %v3441_v10 }
 0x3da   : > { %v3797_v0 = vpop.f32.mrb[20].mxu1 }
 0x3db   : > { %v3376_v11 = vmul.f32 %v3797_v0, %v4995_v53  ;;  %v3301_v17 = vpop.f32.mrb[21].mxu1 }
 0x3dc   : > { %v3374_v12 = vmul.f32 %v4995_v53, %v3301_v17  ;;  %v3798_v14 = vpop.f32.mrb[22].mxu1 }
 0x3dd   : > { %v3414_v16 = vadd.f32 %v5000_v57, %v3376_v11  ;;  %v3377_v18 = vmul.f32 %v3798_v14, %v4995_v53  ;;  %v3304_v19 = vpop.f32.mrb[23].mxu1 }
 0x3de   : > { %v3412_v20 = vadd.f32 %v5000_v57, %v3374_v12  ;;  %v3375_v21 = vmul.f32 %v4995_v53, %v3304_v19 }
 0x3df   : > { %v3446_v4 = vmax.f32 %v3414_v16, 0.0  ;;  %v3415_v22 = vadd.f32 %v5000_v57, %v3377_v18 }
 0x3e0   : > { %v3444_v23 = vmax.f32 %v3412_v20, 0.0  ;;  %v3413_v24 = vadd.f32 %v5000_v57, %v3375_v21 }
 0x3e1   : > { %3478 = vst [vmem:[%s5011_s22 + $0xb0] sm:$0xff] %v3446_v4  ;;  %v3447_v25 = vmax.f32 %v3415_v22, 0.0 }
 0x3e2   : > { %3476 = vst [vmem:[%s5011_s22 + $0xa0] sm:$0xff] %v3444_v23  ;;  %v3445_v26 = vmax.f32 %v3413_v24, 0.0 }
 0x3e3   : > { %3479 = vst [vmem:[%s5011_s22 + $0xb8] sm:$0xff] %v3447_v25 }
 0x3e4   : > { %3477 = vst [vmem:[%s5011_s22 + $0xa8] sm:$0xff] %v3445_v26 }
 0x3fa   : > { %v3801_v27 = vpop.f32.mrb[24].mxu1 }
 0x3fb   : > { %v3380_v28 = vmul.f32 %v3801_v27, %v4995_v53  ;;  %v3317_v29 = vpop.f32.mrb[25].mxu1 }
 0x3fc   : > { %v3378_v30 = vmul.f32 %v4995_v53, %v3317_v29  ;;  %v3802_v31 = vpop.f32.mrb[26].mxu1 }
 0x3fd   : > { %v3418_v32 = vadd.f32 %v5000_v57, %v3380_v28  ;;  %v3381_v34 = vmul.f32 %v3802_v31, %v4995_v53  ;;  %v3320_v33 = vpop.f32.mrb[27].mxu1 }
 0x3fe   : > { %v3416_v15 = vadd.f32 %v5000_v57, %v3378_v30  ;;  %v3379_v35 = vmul.f32 %v4995_v53, %v3320_v33 }
 0x3ff   : > { %v3450_v8 = vmax.f32 %v3418_v32, 0.0  ;;  %v3419_v36 = vadd.f32 %v5000_v57, %v3381_v34 }
 0x400   : > { %v3448_v37 = vmax.f32 %v3416_v15, 0.0  ;;  %v3417_v38 = vadd.f32 %v5000_v57, %v3379_v35 }
 0x401   : > { %3482 = vst [vmem:[%s5011_s22 + $0xd0] sm:$0xff] %v3450_v8  ;;  %v3451_v39 = vmax.f32 %v3419_v36, 0.0 }
 0x402   : > { %3480 = vst [vmem:[%s5011_s22 + $0xc0] sm:$0xff] %v3448_v37  ;;  %v3449_v41 = vmax.f32 %v3417_v38, 0.0 }
 0x403   : > { %3483 = vst [vmem:[%s5011_s22 + $0xd8] sm:$0xff] %v3451_v39 }
 0x404   : > { %3481 = vst [vmem:[%s5011_s22 + $0xc8] sm:$0xff] %v3449_v41 }
 0x41d   : > { %v3805_v42 = vpop.f32.mrb[28].mxu1 }
 0x41e   : > { %v3384_v43 = vmul.f32 %v3805_v42, %v4995_v53  ;;  %v3333_v40 = vpop.f32.mrb[29].mxu1 }
 0x41f   : > { %v3382_v44 = vmul.f32 %v4995_v53, %v3333_v40  ;;  %v3806_v45 = vpop.f32.mrb[30].mxu1 }
 0x420   : > { %v3422_v46 = vadd.f32 %v5000_v57, %v3384_v43  ;;  %v3385_v47 = vmul.f32 %v3806_v45, %v4995_v53  ;;  %v3336_v48 = vpop.f32.mrb[31].mxu1 }
 0x421   : > { %v3420_v49 = vadd.f32 %v5000_v57, %v3382_v44  ;;  %v3383_v50 = vmul.f32 %v4995_v53, %v3336_v48 }
 0x422   : > { %v3454_v51 = vmax.f32 %v3422_v46, 0.0  ;;  %v3423_v59 = vadd.f32 %v5000_v57, %v3385_v47 }
 0x423   : > { %v3452_v54 = vmax.f32 %v3420_v49, 0.0  ;;  %v3421_v55 = vadd.f32 %v5000_v57, %v3383_v50 }
 0x424   : > { %3486 = vst [vmem:[%s5011_s22 + $0xf0] sm:$0xff] %v3454_v51  ;;  %v3455_v56 = vmax.f32 %v3423_v59, 0.0 }
 0x425   : > { %3484 = vst [vmem:[%s5011_s22 + $0xe0] sm:$0xff] %v3452_v54  ;;  %v3453_v58 = vmax.f32 %v3421_v55, 0.0 }
 0x426   : > { %3487 = vst [vmem:[%s5011_s22 + $0xf8] sm:$0xff] %v3455_v56 }
 0x427   : > { %3485 = vst [vmem:[%s5011_s22 + $0xe8] sm:$0xff] %v3453_v58 }
 0x428 PF: > { %s17_s24 = sadd.s32 1, %s3842_s24  }
 0x429   : > { %p14_p4 = scmp.ge.s32.totalorder %s17_s24, 4  }
 0x42b   :  { %16 = sbr.rel (!%p14_p4) target bundleno = 1 (0x1), region = 82 }

</bundles_post_ra>
